<compile_context>
chip_gen: v6e
topology: v6e:2x2x1
jax: 0.10.0
libtpu: 0.0.40
codegen_flags: <defaults>
</compile_context>

<pallas_src>
import jax
import jax.numpy as jnp
from jax import lax
from jax.experimental import pallas as pl
from jax.experimental.pallas import tpu as pltpu


HP = 128  # per-gate lane padding: one full vreg lane-width per gate


def bigru_kernel(lens_ref, x_ref, win_ref, bin_ref, whh_ref, bhhn_ref,
                 out_fwd_ref, out_bwd_ref, hfin_ref):
    """Fused bidirectional GRU recurrence (Hp = 128 lane-padded hidden).

    lens : (Bp, 1)         int32 (padded rows have length 0)
    x    : (T*Bp, E)       f32   time-major, row-blocked by timestep
    win  : (E, 6*Hp)       f32   gate slabs [f_r | f_z | f_n | b_r | b_z | b_n]
    bin  : (1, 6*Hp)       f32   b_ih (+ b_hh for r,z) folded in
    whh  : (2, Hp, 3*Hp)   f32   per-direction fused hidden weights [r|z|n]
    bhhn : (2, 1, Hp)      f32   hidden bias of the n gate (stays per-step)
    out_fwd / out_bwd : (T, Bp, Hp) ;  hfin : (2, Bp, Hp)
    """
    T, Bp, Hp = out_fwd_ref.shape

    lens = lens_ref[...]                                  # (Bp, 1) int32

    # ---- Hoisted input projection: ONE MXU matmul for all timesteps of both
    # directions (removes 2*T tiny matmuls from the serial dependency chain).
    gi_all = (jnp.dot(x_ref[...], win_ref[...],
                      preferred_element_type=jnp.float32)
              + bin_ref[...])                             # (T*Bp, 6*Hp)

    # Hidden-to-hidden weights / n-gate bias, read once per direction.
    whh = [whh_ref[0], whh_ref[1]]                        # (Hp, 3*Hp) each
    bhh_n = [bhhn_ref[0], bhhn_ref[1]]                    # (1, Hp) each

    def step(h, d, t):
        # Static, vreg-aligned slices of the precomputed input projection.
        base = d * 3 * Hp
        rs = t * Bp
        gi = gi_all[rs:rs + Bp, base:base + 3 * Hp]       # (Bp, 3*Hp)
        # Single fused hidden matmul per direction: one MXU push; the three
        # gate slabs are 128-lane-aligned column groups (free to slice).
        gh = jnp.dot(h, whh[d], preferred_element_type=jnp.float32)
        r = jax.nn.sigmoid(gi[:, 0:Hp] + gh[:, 0:Hp])
        z = jax.nn.sigmoid(gi[:, Hp:2 * Hp] + gh[:, Hp:2 * Hp])
        n = jnp.tanh(gi[:, 2 * Hp:3 * Hp]
                     + r * (gh[:, 2 * Hp:3 * Hp] + bhh_n[d]))
        h_new = (1.0 - z) * n + z * h
        valid = lens > t                                  # (Bp, 1) -> bcast
        # Packed-sequence semantics: freeze state and zero outputs past len.
        return jnp.where(valid, h_new, h), jnp.where(valid, h_new, 0.0)

    h_f = jnp.zeros((Bp, Hp), jnp.float32)
    h_b = jnp.zeros((Bp, Hp), jnp.float32)

    # ---- Fused, fully-unrolled time loop (T static & small): the two
    # directions are independent, so their matmul/EUP latency interleaves.
    # TODO(synk): for heavily padded batches, bound the loop at max(lens)
    # via scalar prefetch instead of full static unroll.
    for s in range(T):
        t_f = s
        t_b = T - 1 - s
        h_f, o_f = step(h_f, 0, t_f)
        h_b, o_b = step(h_b, 1, t_b)
        out_fwd_ref[t_f] = o_f                            # lane-dense stores
        out_bwd_ref[t_b] = o_b

    hfin_ref[0] = h_f
    hfin_ref[1] = h_b


def _pad_axis(w, new, old, axis):
    pad = [(0, 0)] * w.ndim
    pad[axis] = (0, new - old)
    return jnp.pad(w, pad)


@jax.jit
def encoder_rnn_forward(input_seq, seq_length, params):
    """input_seq: (B, T) int32, seq_length: (B,) int32.

    Returns (output (B, T, 2H), hidden (2, B, H)).
    """
    emb = params["embedding"][input_seq]                    # (B, T, E) gather
    x = jnp.transpose(emb, (1, 0, 2)).astype(jnp.float32)   # (T, B, E)
    T, B, E = x.shape
    H = params["whh_f"].shape[0]
    Hp = HP
    Bp = ((B + 7) // 8) * 8                                 # sublane-pad batch

    def gates(w):            # (X, 3H) -> [(X, H)] * 3   (PyTorch order r,z,n)
        return [w[:, g * H:(g + 1) * H] for g in range(3)]

    # Input-projection weight & fused bias, each gate slab lane-padded to Hp.
    win_parts, bin_parts = [], []
    for d in ("f", "b"):
        wih_g = gates(params[f"wih_{d}"])
        bih_g = gates(params[f"bih_{d}"])
        bhh_g = gates(params[f"bhh_{d}"])
        for g in range(3):
            win_parts.append(_pad_axis(wih_g[g], Hp, H, 1))
            bias = bih_g[g] + bhh_g[g] if g < 2 else bih_g[g]  # fold b_hh(r,z)
            bin_parts.append(_pad_axis(bias, Hp, H, 1))
    win = jnp.concatenate(win_parts, axis=1)                # (E, 6*Hp)
    bin_ = jnp.concatenate(bin_parts, axis=1)               # (1, 6*Hp)

    # Fused hidden weight per direction: (Hp, 3*Hp), zero-padded rows/cols so
    # padded hidden lanes stay exactly zero through the recurrence.
    whh = jnp.stack([
        jnp.concatenate([_pad_axis(_pad_axis(g, Hp, H, 0), Hp, H, 1)
                         for g in gates(params[f"whh_{d}"])], axis=1)
        for d in ("f", "b")])                               # (2, Hp, 3*Hp)
    bhhn = jnp.stack([_pad_axis(gates(params[f"bhh_{d}"])[2], Hp, H, 1)
                      for d in ("f", "b")])                 # (2, 1, Hp)

    # Sublane-pad the batch; padded rows get length 0 (frozen at zero state).
    x_p = _pad_axis(x, Bp, B, 1)                            # (T, Bp, E)
    x2d = x_p.reshape(T * Bp, E)                            # row-blocked by t
    lens = _pad_axis(seq_length.astype(jnp.int32), Bp, B, 0).reshape(Bp, 1)

    vmem = pl.BlockSpec(memory_space=pltpu.MemorySpace.VMEM)
    out_fwd, out_bwd, h_pad = pl.pallas_call(
        bigru_kernel,
        out_shape=(
            jax.ShapeDtypeStruct((T, Bp, Hp), jnp.float32),
            jax.ShapeDtypeStruct((T, Bp, Hp), jnp.float32),
            jax.ShapeDtypeStruct((2, Bp, Hp), jnp.float32),
        ),
        in_specs=[vmem] * 6,
        out_specs=(vmem, vmem, vmem),
        compiler_params=pltpu.CompilerParams(
            vmem_limit_bytes=32 * 1024 * 1024),
    )(lens, x2d, win, bin_, whh, bhhn)

    # Trim the lane/sublane padding and assemble PyTorch-convention outputs.
    output = jnp.concatenate([out_fwd[:, :B, :H], out_bwd[:, :B, :H]], axis=-1)
    output = jnp.transpose(output, (1, 0, 2))               # (B, T, 2H)
    hidden = h_pad[:, :B, :H]                               # (2, B, H)
    return output, hidden


def make_params(key, vocab, E, H):
    """Deterministic synthetic parameters with PyTorch GRU shapes."""
    ks = jax.random.split(key, 11)
    k = 1.0 / jnp.sqrt(H)

    def u(kk, shape):
        return jax.random.uniform(kk, shape, jnp.float32, -k, k)

    # PyTorch stores weight_ih_l0 as (3H, E); we keep the transposed (E, 3H).
    return {
        "embedding": jax.random.normal(ks[0], (vocab, E), jnp.float32),
        "wih_f": u(ks[1], (3 * H, E)).T,
        "whh_f": u(ks[2], (3 * H, H)).T,
        "bih_f": u(ks[3], (3 * H,)).reshape(1, 3 * H),
        "bhh_f": u(ks[4], (3 * H,)).reshape(1, 3 * H),
        "wih_b": u(ks[5], (3 * H, E)).T,
        "whh_b": u(ks[6], (3 * H, H)).T,
        "bih_b": u(ks[7], (3 * H,)).reshape(1, 3 * H),
        "bhh_b": u(ks[8], (3 * H,)).reshape(1, 3 * H),
    }


def reference_forward(input_seq, seq_length, params):
    """Pure-JAX reference (lax.scan, unfused/unpadded) for correctness."""
    emb = params["embedding"][input_seq]                    # (B, T, E)
    x = jnp.transpose(emb, (1, 0, 2)).astype(jnp.float32)   # (T, B, E)
    T, B, E = x.shape
    H = params["whh_f"].shape[0]
    lens = seq_length.astype(jnp.int32).reshape(B, 1)

    def cell(x_t, h, wih, whh, bih, bhh):
        gi = x_t @ wih + bih
        gh = h @ whh + bhh
        r = jax.nn.sigmoid(gi[:, 0:H] + gh[:, 0:H])
        z = jax.nn.sigmoid(gi[:, H:2 * H] + gh[:, H:2 * H])
        n = jnp.tanh(gi[:, 2 * H:3 * H] + r * gh[:, 2 * H:3 * H])
        return (1.0 - z) * n + z * h

    def run(ts, w):
        def body(h, t):
            h_new = cell(x[t], h, *w)
            valid = lens > t
            h_next = jnp.where(valid, h_new, h)
            return h_next, jnp.where(valid, h_new, 0.0)
        return lax.scan(body, jnp.zeros((B, H), jnp.float32), ts)

    h_f, out_f = run(jnp.arange(T), (params["wih_f"], params["whh_f"],
                                     params["bih_f"], params["bhh_f"]))
    h_b, out_b = run(jnp.arange(T - 1, -1, -1), (params["wih_b"], params["whh_b"],
                                                 params["bih_b"], params["bhh_b"]))
    out_b = out_b[::-1]
    output = jnp.transpose(jnp.concatenate([out_f, out_b], -1), (1, 0, 2))
    hidden = jnp.stack([h_f, h_b], axis=0)
    return output, hidden


if __name__ == "__main__":
    key = jax.random.PRNGKey(0)
    k_param, k_seq = jax.random.split(key)

    vocab, E, H = 50, 32, 32      # enc_emb_size=32, enc_hidden_size=32
    B, T = 4, 8

    params = make_params(k_param, vocab, E, H)
    input_seq = jax.random.randint(k_seq, (B, T), 0, vocab, dtype=jnp.int32)
    # max(seq_length) == T so the pad_packed total length equals T.
    seq_length = jnp.array([8, 5, 3, 6], dtype=jnp.int32)

    output, hidden = encoder_rnn_forward(input_seq, seq_length, params)
    jax.block_until_ready((output, hidden))

    ref_out, ref_hid = reference_forward(input_seq, seq_length, params)
    assert output.shape == (B, T, 2 * H) and hidden.shape == (2, B, H)
    assert jnp.allclose(output, ref_out, atol=2e-5, rtol=2e-5)
    assert jnp.allclose(hidden, ref_hid, atol=2e-5, rtol=2e-5)

    print("KERNEL_OK")
</pallas_src>

<mosaic_0001>
module attributes {stable_mosaic.version = 11 : i64} {
  func.func @bigru_kernel(%arg0: memref<8x1xi32, #tpu.memory_space<vmem>>, %arg1: memref<64x32xf32, #tpu.memory_space<vmem>>, %arg2: memref<32x768xf32, #tpu.memory_space<vmem>>, %arg3: memref<1x768xf32, #tpu.memory_space<vmem>>, %arg4: memref<2x128x384xf32, #tpu.memory_space<vmem>>, %arg5: memref<2x1x128xf32, #tpu.memory_space<vmem>>, %arg6: memref<8x8x128xf32, #tpu.memory_space<vmem>>, %arg7: memref<8x8x128xf32, #tpu.memory_space<vmem>>, %arg8: memref<2x8x128xf32, #tpu.memory_space<vmem>>) attributes {dimension_semantics = [], scalar_prefetch = 0 : i64, scratch_operands = 0 : i64, tpu.core_type = #tpu.core_type<tc>} {
    %c0 = arith.constant 0 : index
    %c0_0 = arith.constant 0 : index
    %0 = vector.load %arg0[%c0, %c0_0] : memref<8x1xi32, #tpu.memory_space<vmem>>, vector<8x1xi32>
    %c0_1 = arith.constant 0 : index
    %c0_2 = arith.constant 0 : index
    %1 = vector.load %arg1[%c0_1, %c0_2] : memref<64x32xf32, #tpu.memory_space<vmem>>, vector<64x32xf32>
    %c0_3 = arith.constant 0 : index
    %c0_4 = arith.constant 0 : index
    %2 = vector.load %arg2[%c0_3, %c0_4] : memref<32x768xf32, #tpu.memory_space<vmem>>, vector<32x768xf32>
    %cst = arith.constant dense<0.000000e+00> : vector<64x768xf32>
    %3 = tpu.matmul %1, %2, %cst {dimension_numbers = #tpu.dot_dimension_numbers<[1], [0], [0], [1], [0, 0, 1, 1], [], []>} : vector<64x32xf32>, vector<32x768xf32>, vector<64x768xf32> -> vector<64x768xf32>
    %c0_5 = arith.constant 0 : index
    %c0_6 = arith.constant 0 : index
    %4 = vector.load %arg3[%c0_5, %c0_6] : memref<1x768xf32, #tpu.memory_space<vmem>>, vector<1x768xf32>
    %5 = vector.broadcast %4 : vector<1x768xf32> to vector<64x768xf32>
    %6 = arith.addf %3, %5 : vector<64x768xf32>
    %c0_7 = arith.constant 0 : index
    %c0_8 = arith.constant 0 : index
    %c0_9 = arith.constant 0 : index
    %7 = vector.load %arg4[%c0_7, %c0_8, %c0_9] : memref<2x128x384xf32, #tpu.memory_space<vmem>>, vector<1x128x384xf32>
    %8 = vector.shape_cast %7 : vector<1x128x384xf32> to vector<128x384xf32>
    %c1 = arith.constant 1 : index
    %c0_10 = arith.constant 0 : index
    %c0_11 = arith.constant 0 : index
    %9 = vector.load %arg4[%c1, %c0_10, %c0_11] : memref<2x128x384xf32, #tpu.memory_space<vmem>>, vector<1x128x384xf32>
    %10 = vector.shape_cast %9 : vector<1x128x384xf32> to vector<128x384xf32>
    %c0_12 = arith.constant 0 : index
    %c0_13 = arith.constant 0 : index
    %c0_14 = arith.constant 0 : index
    %11 = vector.load %arg5[%c0_12, %c0_13, %c0_14] : memref<2x1x128xf32, #tpu.memory_space<vmem>>, vector<1x1x128xf32>
    %12 = vector.shape_cast %11 : vector<1x1x128xf32> to vector<1x128xf32>
    %c1_15 = arith.constant 1 : index
    %c0_16 = arith.constant 0 : index
    %c0_17 = arith.constant 0 : index
    %13 = vector.load %arg5[%c1_15, %c0_16, %c0_17] : memref<2x1x128xf32, #tpu.memory_space<vmem>>, vector<1x1x128xf32>
    %14 = vector.shape_cast %13 : vector<1x1x128xf32> to vector<1x128xf32>
    %cst_18 = arith.constant 0.000000e+00 : f32
    %15 = vector.broadcast %cst_18 : f32 to vector<8x128xf32>
    %cst_19 = arith.constant 0.000000e+00 : f32
    %16 = vector.broadcast %cst_19 : f32 to vector<8x128xf32>
    %17 = vector.extract_strided_slice %6 {offsets = [0, 0], sizes = [8, 384], strides = [1, 1]} : vector<64x768xf32> to vector<8x384xf32>
    %cst_20 = arith.constant dense<0.000000e+00> : vector<8x384xf32>
    %18 = tpu.matmul %15, %8, %cst_20 {dimension_numbers = #tpu.dot_dimension_numbers<[1], [0], [0], [1], [0, 0, 1, 1], [], []>} : vector<8x128xf32>, vector<128x384xf32>, vector<8x384xf32> -> vector<8x384xf32>
    %19 = vector.extract_strided_slice %17 {offsets = [0, 0], sizes = [8, 128], strides = [1, 1]} : vector<8x384xf32> to vector<8x128xf32>
    %20 = vector.extract_strided_slice %18 {offsets = [0, 0], sizes = [8, 128], strides = [1, 1]} : vector<8x384xf32> to vector<8x128xf32>
    %21 = arith.addf %19, %20 : vector<8x128xf32>
    %22 = arith.negf %21 : vector<8x128xf32>
    %23 = math.exp %22 : vector<8x128xf32>
    %cst_21 = arith.constant 1.000000e+00 : f32
    %24 = vector.broadcast %cst_21 : f32 to vector<8x128xf32>
    %25 = arith.addf %24, %23 : vector<8x128xf32>
    %26 = arith.divf %24, %25 : vector<8x128xf32>
    %27 = vector.extract_strided_slice %17 {offsets = [0, 128], sizes = [8, 128], strides = [1, 1]} : vector<8x384xf32> to vector<8x128xf32>
    %28 = vector.extract_strided_slice %18 {offsets = [0, 128], sizes = [8, 128], strides = [1, 1]} : vector<8x384xf32> to vector<8x128xf32>
    %29 = arith.addf %27, %28 : vector<8x128xf32>
    %30 = arith.negf %29 : vector<8x128xf32>
    %31 = math.exp %30 : vector<8x128xf32>
    %cst_22 = arith.constant 1.000000e+00 : f32
    %32 = vector.broadcast %cst_22 : f32 to vector<8x128xf32>
    %33 = arith.addf %32, %31 : vector<8x128xf32>
    %34 = arith.divf %32, %33 : vector<8x128xf32>
    %35 = vector.extract_strided_slice %17 {offsets = [0, 256], sizes = [8, 128], strides = [1, 1]} : vector<8x384xf32> to vector<8x128xf32>
    %36 = vector.extract_strided_slice %18 {offsets = [0, 256], sizes = [8, 128], strides = [1, 1]} : vector<8x384xf32> to vector<8x128xf32>
    %37 = vector.broadcast %12 : vector<1x128xf32> to vector<8x128xf32>
    %38 = arith.addf %36, %37 : vector<8x128xf32>
    %39 = arith.mulf %26, %38 : vector<8x128xf32>
    %40 = arith.addf %35, %39 : vector<8x128xf32>
    %41 = math.tanh %40 : vector<8x128xf32>
    %cst_23 = arith.constant 1.000000e+00 : f32
    %42 = vector.broadcast %cst_23 : f32 to vector<8x128xf32>
    %43 = arith.subf %42, %34 : vector<8x128xf32>
    %44 = arith.mulf %43, %41 : vector<8x128xf32>
    %45 = arith.mulf %34, %15 : vector<8x128xf32>
    %46 = arith.addf %44, %45 : vector<8x128xf32>
    %c0_i32 = arith.constant 0 : i32
    %47 = vector.broadcast %c0_i32 : i32 to vector<8x1xi32>
    %48 = arith.cmpi sgt, %0, %47 : vector<8x1xi32>
    %49 = vector.shape_cast %48 : vector<8x1xi1> to vector<8x1xi1>
    %50 = vector.broadcast %49 : vector<8x1xi1> to vector<8x128xi1>
    %51 = arith.select %50, %46, %15 : vector<8x128xi1>, vector<8x128xf32>
    %cst_24 = arith.constant 0.000000e+00 : f32
    %52 = vector.shape_cast %48 : vector<8x1xi1> to vector<8x1xi1>
    %53 = vector.broadcast %52 : vector<8x1xi1> to vector<8x128xi1>
    %54 = vector.broadcast %cst_24 : f32 to vector<8x128xf32>
    %55 = arith.select %53, %46, %54 : vector<8x128xi1>, vector<8x128xf32>
    %56 = vector.extract_strided_slice %6 {offsets = [56, 384], sizes = [8, 384], strides = [1, 1]} : vector<64x768xf32> to vector<8x384xf32>
    %cst_25 = arith.constant dense<0.000000e+00> : vector<8x384xf32>
    %57 = tpu.matmul %16, %10, %cst_25 {dimension_numbers = #tpu.dot_dimension_numbers<[1], [0], [0], [1], [0, 0, 1, 1], [], []>} : vector<8x128xf32>, vector<128x384xf32>, vector<8x384xf32> -> vector<8x384xf32>
    %58 = vector.extract_strided_slice %56 {offsets = [0, 0], sizes = [8, 128], strides = [1, 1]} : vector<8x384xf32> to vector<8x128xf32>
    %59 = vector.extract_strided_slice %57 {offsets = [0, 0], sizes = [8, 128], strides = [1, 1]} : vector<8x384xf32> to vector<8x128xf32>
    %60 = arith.addf %58, %59 : vector<8x128xf32>
    %61 = arith.negf %60 : vector<8x128xf32>
    %62 = math.exp %61 : vector<8x128xf32>
    %cst_26 = arith.constant 1.000000e+00 : f32
    %63 = vector.broadcast %cst_26 : f32 to vector<8x128xf32>
    %64 = arith.addf %63, %62 : vector<8x128xf32>
    %65 = arith.divf %63, %64 : vector<8x128xf32>
    %66 = vector.extract_strided_slice %56 {offsets = [0, 128], sizes = [8, 128], strides = [1, 1]} : vector<8x384xf32> to vector<8x128xf32>
    %67 = vector.extract_strided_slice %57 {offsets = [0, 128], sizes = [8, 128], strides = [1, 1]} : vector<8x384xf32> to vector<8x128xf32>
    %68 = arith.addf %66, %67 : vector<8x128xf32>
    %69 = arith.negf %68 : vector<8x128xf32>
    %70 = math.exp %69 : vector<8x128xf32>
    %cst_27 = arith.constant 1.000000e+00 : f32
    %71 = vector.broadcast %cst_27 : f32 to vector<8x128xf32>
    %72 = arith.addf %71, %70 : vector<8x128xf32>
    %73 = arith.divf %71, %72 : vector<8x128xf32>
    %74 = vector.extract_strided_slice %56 {offsets = [0, 256], sizes = [8, 128], strides = [1, 1]} : vector<8x384xf32> to vector<8x128xf32>
    %75 = vector.extract_strided_slice %57 {offsets = [0, 256], sizes = [8, 128], strides = [1, 1]} : vector<8x384xf32> to vector<8x128xf32>
    %76 = vector.broadcast %14 : vector<1x128xf32> to vector<8x128xf32>
    %77 = arith.addf %75, %76 : vector<8x128xf32>
    %78 = arith.mulf %65, %77 : vector<8x128xf32>
    %79 = arith.addf %74, %78 : vector<8x128xf32>
    %80 = math.tanh %79 : vector<8x128xf32>
    %cst_28 = arith.constant 1.000000e+00 : f32
    %81 = vector.broadcast %cst_28 : f32 to vector<8x128xf32>
    %82 = arith.subf %81, %73 : vector<8x128xf32>
    %83 = arith.mulf %82, %80 : vector<8x128xf32>
    %84 = arith.mulf %73, %16 : vector<8x128xf32>
    %85 = arith.addf %83, %84 : vector<8x128xf32>
    %c7_i32 = arith.constant 7 : i32
    %86 = vector.broadcast %c7_i32 : i32 to vector<8x1xi32>
    %87 = arith.cmpi sgt, %0, %86 : vector<8x1xi32>
    %88 = vector.shape_cast %87 : vector<8x1xi1> to vector<8x1xi1>
    %89 = vector.broadcast %88 : vector<8x1xi1> to vector<8x128xi1>
    %90 = arith.select %89, %85, %16 : vector<8x128xi1>, vector<8x128xf32>
    %cst_29 = arith.constant 0.000000e+00 : f32
    %91 = vector.shape_cast %87 : vector<8x1xi1> to vector<8x1xi1>
    %92 = vector.broadcast %91 : vector<8x1xi1> to vector<8x128xi1>
    %93 = vector.broadcast %cst_29 : f32 to vector<8x128xf32>
    %94 = arith.select %92, %85, %93 : vector<8x128xi1>, vector<8x128xf32>
    %c0_30 = arith.constant 0 : index
    %c0_31 = arith.constant 0 : index
    %c0_32 = arith.constant 0 : index
    %95 = vector.load %arg6[%c0_30, %c0_31, %c0_32] : memref<8x8x128xf32, #tpu.memory_space<vmem>>, vector<1x8x128xf32>
    %96 = vector.shape_cast %95 : vector<1x8x128xf32> to vector<8x128xf32>
    %97 = vector.shape_cast %55 : vector<8x128xf32> to vector<1x8x128xf32>
    tpu.vector_store %arg6[%c0_30, %c0_31, %c0_32], %97 {strides = array<i32>} : memref<8x8x128xf32, #tpu.memory_space<vmem>>, vector<1x8x128xf32>,
    %c7 = arith.constant 7 : index
    %c0_33 = arith.constant 0 : index
    %c0_34 = arith.constant 0 : index
    %98 = vector.load %arg7[%c7, %c0_33, %c0_34] : memref<8x8x128xf32, #tpu.memory_space<vmem>>, vector<1x8x128xf32>
    %99 = vector.shape_cast %98 : vector<1x8x128xf32> to vector<8x128xf32>
    %100 = vector.shape_cast %94 : vector<8x128xf32> to vector<1x8x128xf32>
    tpu.vector_store %arg7[%c7, %c0_33, %c0_34], %100 {strides = array<i32>} : memref<8x8x128xf32, #tpu.memory_space<vmem>>, vector<1x8x128xf32>,
    %101 = vector.extract_strided_slice %6 {offsets = [8, 0], sizes = [8, 384], strides = [1, 1]} : vector<64x768xf32> to vector<8x384xf32>
    %cst_35 = arith.constant dense<0.000000e+00> : vector<8x384xf32>
    %102 = tpu.matmul %51, %8, %cst_35 {dimension_numbers = #tpu.dot_dimension_numbers<[1], [0], [0], [1], [0, 0, 1, 1], [], []>} : vector<8x128xf32>, vector<128x384xf32>, vector<8x384xf32> -> vector<8x384xf32>
    %103 = vector.extract_strided_slice %101 {offsets = [0, 0], sizes = [8, 128], strides = [1, 1]} : vector<8x384xf32> to vector<8x128xf32>
    %104 = vector.extract_strided_slice %102 {offsets = [0, 0], sizes = [8, 128], strides = [1, 1]} : vector<8x384xf32> to vector<8x128xf32>
    %105 = arith.addf %103, %104 : vector<8x128xf32>
    %106 = arith.negf %105 : vector<8x128xf32>
    %107 = math.exp %106 : vector<8x128xf32>
    %cst_36 = arith.constant 1.000000e+00 : f32
    %108 = vector.broadcast %cst_36 : f32 to vector<8x128xf32>
    %109 = arith.addf %108, %107 : vector<8x128xf32>
    %110 = arith.divf %108, %109 : vector<8x128xf32>
    %111 = vector.extract_strided_slice %101 {offsets = [0, 128], sizes = [8, 128], strides = [1, 1]} : vector<8x384xf32> to vector<8x128xf32>
    %112 = vector.extract_strided_slice %102 {offsets = [0, 128], sizes = [8, 128], strides = [1, 1]} : vector<8x384xf32> to vector<8x128xf32>
    %113 = arith.addf %111, %112 : vector<8x128xf32>
    %114 = arith.negf %113 : vector<8x128xf32>
    %115 = math.exp %114 : vector<8x128xf32>
    %cst_37 = arith.constant 1.000000e+00 : f32
    %116 = vector.broadcast %cst_37 : f32 to vector<8x128xf32>
    %117 = arith.addf %116, %115 : vector<8x128xf32>
    %118 = arith.divf %116, %117 : vector<8x128xf32>
    %119 = vector.extract_strided_slice %101 {offsets = [0, 256], sizes = [8, 128], strides = [1, 1]} : vector<8x384xf32> to vector<8x128xf32>
    %120 = vector.extract_strided_slice %102 {offsets = [0, 256], sizes = [8, 128], strides = [1, 1]} : vector<8x384xf32> to vector<8x128xf32>
    %121 = vector.broadcast %12 : vector<1x128xf32> to vector<8x128xf32>
    %122 = arith.addf %120, %121 : vector<8x128xf32>
    %123 = arith.mulf %110, %122 : vector<8x128xf32>
    %124 = arith.addf %119, %123 : vector<8x128xf32>
    %125 = math.tanh %124 : vector<8x128xf32>
    %cst_38 = arith.constant 1.000000e+00 : f32
    %126 = vector.broadcast %cst_38 : f32 to vector<8x128xf32>
    %127 = arith.subf %126, %118 : vector<8x128xf32>
    %128 = arith.mulf %127, %125 : vector<8x128xf32>
    %129 = arith.mulf %118, %51 : vector<8x128xf32>
    %130 = arith.addf %128, %129 : vector<8x128xf32>
    %c1_i32 = arith.constant 1 : i32
    %131 = vector.broadcast %c1_i32 : i32 to vector<8x1xi32>
    %132 = arith.cmpi sgt, %0, %131 : vector<8x1xi32>
    %133 = vector.shape_cast %132 : vector<8x1xi1> to vector<8x1xi1>
    %134 = vector.broadcast %133 : vector<8x1xi1> to vector<8x128xi1>
    %135 = arith.select %134, %130, %51 : vector<8x128xi1>, vector<8x128xf32>
    %cst_39 = arith.constant 0.000000e+00 : f32
    %136 = vector.shape_cast %132 : vector<8x1xi1> to vector<8x1xi1>
    %137 = vector.broadcast %136 : vector<8x1xi1> to vector<8x128xi1>
    %138 = vector.broadcast %cst_39 : f32 to vector<8x128xf32>
    %139 = arith.select %137, %130, %138 : vector<8x128xi1>, vector<8x128xf32>
    %140 = vector.extract_strided_slice %6 {offsets = [48, 384], sizes = [8, 384], strides = [1, 1]} : vector<64x768xf32> to vector<8x384xf32>
    %cst_40 = arith.constant dense<0.000000e+00> : vector<8x384xf32>
    %141 = tpu.matmul %90, %10, %cst_40 {dimension_numbers = #tpu.dot_dimension_numbers<[1], [0], [0], [1], [0, 0, 1, 1], [], []>} : vector<8x128xf32>, vector<128x384xf32>, vector<8x384xf32> -> vector<8x384xf32>
    %142 = vector.extract_strided_slice %140 {offsets = [0, 0], sizes = [8, 128], strides = [1, 1]} : vector<8x384xf32> to vector<8x128xf32>
    %143 = vector.extract_strided_slice %141 {offsets = [0, 0], sizes = [8, 128], strides = [1, 1]} : vector<8x384xf32> to vector<8x128xf32>
    %144 = arith.addf %142, %143 : vector<8x128xf32>
    %145 = arith.negf %144 : vector<8x128xf32>
    %146 = math.exp %145 : vector<8x128xf32>
    %cst_41 = arith.constant 1.000000e+00 : f32
    %147 = vector.broadcast %cst_41 : f32 to vector<8x128xf32>
    %148 = arith.addf %147, %146 : vector<8x128xf32>
    %149 = arith.divf %147, %148 : vector<8x128xf32>
    %150 = vector.extract_strided_slice %140 {offsets = [0, 128], sizes = [8, 128], strides = [1, 1]} : vector<8x384xf32> to vector<8x128xf32>
    %151 = vector.extract_strided_slice %141 {offsets = [0, 128], sizes = [8, 128], strides = [1, 1]} : vector<8x384xf32> to vector<8x128xf32>
    %152 = arith.addf %150, %151 : vector<8x128xf32>
    %153 = arith.negf %152 : vector<8x128xf32>
    %154 = math.exp %153 : vector<8x128xf32>
    %cst_42 = arith.constant 1.000000e+00 : f32
    %155 = vector.broadcast %cst_42 : f32 to vector<8x128xf32>
    %156 = arith.addf %155, %154 : vector<8x128xf32>
    %157 = arith.divf %155, %156 : vector<8x128xf32>
    %158 = vector.extract_strided_slice %140 {offsets = [0, 256], sizes = [8, 128], strides = [1, 1]} : vector<8x384xf32> to vector<8x128xf32>
    %159 = vector.extract_strided_slice %141 {offsets = [0, 256], sizes = [8, 128], strides = [1, 1]} : vector<8x384xf32> to vector<8x128xf32>
    %160 = vector.broadcast %14 : vector<1x128xf32> to vector<8x128xf32>
    %161 = arith.addf %159, %160 : vector<8x128xf32>
    %162 = arith.mulf %149, %161 : vector<8x128xf32>
    %163 = arith.addf %158, %162 : vector<8x128xf32>
    %164 = math.tanh %163 : vector<8x128xf32>
    %cst_43 = arith.constant 1.000000e+00 : f32
    %165 = vector.broadcast %cst_43 : f32 to vector<8x128xf32>
    %166 = arith.subf %165, %157 : vector<8x128xf32>
    %167 = arith.mulf %166, %164 : vector<8x128xf32>
    %168 = arith.mulf %157, %90 : vector<8x128xf32>
    %169 = arith.addf %167, %168 : vector<8x128xf32>
    %c6_i32 = arith.constant 6 : i32
    %170 = vector.broadcast %c6_i32 : i32 to vector<8x1xi32>
    %171 = arith.cmpi sgt, %0, %170 : vector<8x1xi32>
    %172 = vector.shape_cast %171 : vector<8x1xi1> to vector<8x1xi1>
    %173 = vector.broadcast %172 : vector<8x1xi1> to vector<8x128xi1>
    %174 = arith.select %173, %169, %90 : vector<8x128xi1>, vector<8x128xf32>
    %cst_44 = arith.constant 0.000000e+00 : f32
    %175 = vector.shape_cast %171 : vector<8x1xi1> to vector<8x1xi1>
    %176 = vector.broadcast %175 : vector<8x1xi1> to vector<8x128xi1>
    %177 = vector.broadcast %cst_44 : f32 to vector<8x128xf32>
    %178 = arith.select %176, %169, %177 : vector<8x128xi1>, vector<8x128xf32>
    %c1_45 = arith.constant 1 : index
    %c0_46 = arith.constant 0 : index
    %c0_47 = arith.constant 0 : index
    %179 = vector.load %arg6[%c1_45, %c0_46, %c0_47] : memref<8x8x128xf32, #tpu.memory_space<vmem>>, vector<1x8x128xf32>
    %180 = vector.shape_cast %179 : vector<1x8x128xf32> to vector<8x128xf32>
    %181 = vector.shape_cast %139 : vector<8x128xf32> to vector<1x8x128xf32>
    tpu.vector_store %arg6[%c1_45, %c0_46, %c0_47], %181 {strides = array<i32>} : memref<8x8x128xf32, #tpu.memory_space<vmem>>, vector<1x8x128xf32>,
    %c6 = arith.constant 6 : index
    %c0_48 = arith.constant 0 : index
    %c0_49 = arith.constant 0 : index
    %182 = vector.load %arg7[%c6, %c0_48, %c0_49] : memref<8x8x128xf32, #tpu.memory_space<vmem>>, vector<1x8x128xf32>
    %183 = vector.shape_cast %182 : vector<1x8x128xf32> to vector<8x128xf32>
    %184 = vector.shape_cast %178 : vector<8x128xf32> to vector<1x8x128xf32>
    tpu.vector_store %arg7[%c6, %c0_48, %c0_49], %184 {strides = array<i32>} : memref<8x8x128xf32, #tpu.memory_space<vmem>>, vector<1x8x128xf32>,
    %185 = vector.extract_strided_slice %6 {offsets = [16, 0], sizes = [8, 384], strides = [1, 1]} : vector<64x768xf32> to vector<8x384xf32>
    %cst_50 = arith.constant dense<0.000000e+00> : vector<8x384xf32>
    %186 = tpu.matmul %135, %8, %cst_50 {dimension_numbers = #tpu.dot_dimension_numbers<[1], [0], [0], [1], [0, 0, 1, 1], [], []>} : vector<8x128xf32>, vector<128x384xf32>, vector<8x384xf32> -> vector<8x384xf32>
    %187 = vector.extract_strided_slice %185 {offsets = [0, 0], sizes = [8, 128], strides = [1, 1]} : vector<8x384xf32> to vector<8x128xf32>
    %188 = vector.extract_strided_slice %186 {offsets = [0, 0], sizes = [8, 128], strides = [1, 1]} : vector<8x384xf32> to vector<8x128xf32>
    %189 = arith.addf %187, %188 : vector<8x128xf32>
    %190 = arith.negf %189 : vector<8x128xf32>
    %191 = math.exp %190 : vector<8x128xf32>
    %cst_51 = arith.constant 1.000000e+00 : f32
    %192 = vector.broadcast %cst_51 : f32 to vector<8x128xf32>
    %193 = arith.addf %192, %191 : vector<8x128xf32>
    %194 = arith.divf %192, %193 : vector<8x128xf32>
    %195 = vector.extract_strided_slice %185 {offsets = [0, 128], sizes = [8, 128], strides = [1, 1]} : vector<8x384xf32> to vector<8x128xf32>
    %196 = vector.extract_strided_slice %186 {offsets = [0, 128], sizes = [8, 128], strides = [1, 1]} : vector<8x384xf32> to vector<8x128xf32>
    %197 = arith.addf %195, %196 : vector<8x128xf32>
    %198 = arith.negf %197 : vector<8x128xf32>
    %199 = math.exp %198 : vector<8x128xf32>
    %cst_52 = arith.constant 1.000000e+00 : f32
    %200 = vector.broadcast %cst_52 : f32 to vector<8x128xf32>
    %201 = arith.addf %200, %199 : vector<8x128xf32>
    %202 = arith.divf %200, %201 : vector<8x128xf32>
    %203 = vector.extract_strided_slice %185 {offsets = [0, 256], sizes = [8, 128], strides = [1, 1]} : vector<8x384xf32> to vector<8x128xf32>
    %204 = vector.extract_strided_slice %186 {offsets = [0, 256], sizes = [8, 128], strides = [1, 1]} : vector<8x384xf32> to vector<8x128xf32>
    %205 = vector.broadcast %12 : vector<1x128xf32> to vector<8x128xf32>
    %206 = arith.addf %204, %205 : vector<8x128xf32>
    %207 = arith.mulf %194, %206 : vector<8x128xf32>
    %208 = arith.addf %203, %207 : vector<8x128xf32>
    %209 = math.tanh %208 : vector<8x128xf32>
    %cst_53 = arith.constant 1.000000e+00 : f32
    %210 = vector.broadcast %cst_53 : f32 to vector<8x128xf32>
    %211 = arith.subf %210, %202 : vector<8x128xf32>
    %212 = arith.mulf %211, %209 : vector<8x128xf32>
    %213 = arith.mulf %202, %135 : vector<8x128xf32>
    %214 = arith.addf %212, %213 : vector<8x128xf32>
    %c2_i32 = arith.constant 2 : i32
    %215 = vector.broadcast %c2_i32 : i32 to vector<8x1xi32>
    %216 = arith.cmpi sgt, %0, %215 : vector<8x1xi32>
    %217 = vector.shape_cast %216 : vector<8x1xi1> to vector<8x1xi1>
    %218 = vector.broadcast %217 : vector<8x1xi1> to vector<8x128xi1>
    %219 = arith.select %218, %214, %135 : vector<8x128xi1>, vector<8x128xf32>
    %cst_54 = arith.constant 0.000000e+00 : f32
    %220 = vector.shape_cast %216 : vector<8x1xi1> to vector<8x1xi1>
    %221 = vector.broadcast %220 : vector<8x1xi1> to vector<8x128xi1>
    %222 = vector.broadcast %cst_54 : f32 to vector<8x128xf32>
    %223 = arith.select %221, %214, %222 : vector<8x128xi1>, vector<8x128xf32>
    %224 = vector.extract_strided_slice %6 {offsets = [40, 384], sizes = [8, 384], strides = [1, 1]} : vector<64x768xf32> to vector<8x384xf32>
    %cst_55 = arith.constant dense<0.000000e+00> : vector<8x384xf32>
    %225 = tpu.matmul %174, %10, %cst_55 {dimension_numbers = #tpu.dot_dimension_numbers<[1], [0], [0], [1], [0, 0, 1, 1], [], []>} : vector<8x128xf32>, vector<128x384xf32>, vector<8x384xf32> -> vector<8x384xf32>
    %226 = vector.extract_strided_slice %224 {offsets = [0, 0], sizes = [8, 128], strides = [1, 1]} : vector<8x384xf32> to vector<8x128xf32>
    %227 = vector.extract_strided_slice %225 {offsets = [0, 0], sizes = [8, 128], strides = [1, 1]} : vector<8x384xf32> to vector<8x128xf32>
    %228 = arith.addf %226, %227 : vector<8x128xf32>
    %229 = arith.negf %228 : vector<8x128xf32>
    %230 = math.exp %229 : vector<8x128xf32>
    %cst_56 = arith.constant 1.000000e+00 : f32
    %231 = vector.broadcast %cst_56 : f32 to vector<8x128xf32>
    %232 = arith.addf %231, %230 : vector<8x128xf32>
    %233 = arith.divf %231, %232 : vector<8x128xf32>
    %234 = vector.extract_strided_slice %224 {offsets = [0, 128], sizes = [8, 128], strides = [1, 1]} : vector<8x384xf32> to vector<8x128xf32>
    %235 = vector.extract_strided_slice %225 {offsets = [0, 128], sizes = [8, 128], strides = [1, 1]} : vector<8x384xf32> to vector<8x128xf32>
    %236 = arith.addf %234, %235 : vector<8x128xf32>
    %237 = arith.negf %236 : vector<8x128xf32>
    %238 = math.exp %237 : vector<8x128xf32>
    %cst_57 = arith.constant 1.000000e+00 : f32
    %239 = vector.broadcast %cst_57 : f32 to vector<8x128xf32>
    %240 = arith.addf %239, %238 : vector<8x128xf32>
    %241 = arith.divf %239, %240 : vector<8x128xf32>
    %242 = vector.extract_strided_slice %224 {offsets = [0, 256], sizes = [8, 128], strides = [1, 1]} : vector<8x384xf32> to vector<8x128xf32>
    %243 = vector.extract_strided_slice %225 {offsets = [0, 256], sizes = [8, 128], strides = [1, 1]} : vector<8x384xf32> to vector<8x128xf32>
    %244 = vector.broadcast %14 : vector<1x128xf32> to vector<8x128xf32>
    %245 = arith.addf %243, %244 : vector<8x128xf32>
    %246 = arith.mulf %233, %245 : vector<8x128xf32>
    %247 = arith.addf %242, %246 : vector<8x128xf32>
    %248 = math.tanh %247 : vector<8x128xf32>
    %cst_58 = arith.constant 1.000000e+00 : f32
    %249 = vector.broadcast %cst_58 : f32 to vector<8x128xf32>
    %250 = arith.subf %249, %241 : vector<8x128xf32>
    %251 = arith.mulf %250, %248 : vector<8x128xf32>
    %252 = arith.mulf %241, %174 : vector<8x128xf32>
    %253 = arith.addf %251, %252 : vector<8x128xf32>
    %c5_i32 = arith.constant 5 : i32
    %254 = vector.broadcast %c5_i32 : i32 to vector<8x1xi32>
    %255 = arith.cmpi sgt, %0, %254 : vector<8x1xi32>
    %256 = vector.shape_cast %255 : vector<8x1xi1> to vector<8x1xi1>
    %257 = vector.broadcast %256 : vector<8x1xi1> to vector<8x128xi1>
    %258 = arith.select %257, %253, %174 : vector<8x128xi1>, vector<8x128xf32>
    %cst_59 = arith.constant 0.000000e+00 : f32
    %259 = vector.shape_cast %255 : vector<8x1xi1> to vector<8x1xi1>
    %260 = vector.broadcast %259 : vector<8x1xi1> to vector<8x128xi1>
    %261 = vector.broadcast %cst_59 : f32 to vector<8x128xf32>
    %262 = arith.select %260, %253, %261 : vector<8x128xi1>, vector<8x128xf32>
    %c2 = arith.constant 2 : index
    %c0_60 = arith.constant 0 : index
    %c0_61 = arith.constant 0 : index
    %263 = vector.load %arg6[%c2, %c0_60, %c0_61] : memref<8x8x128xf32, #tpu.memory_space<vmem>>, vector<1x8x128xf32>
    %264 = vector.shape_cast %263 : vector<1x8x128xf32> to vector<8x128xf32>
    %265 = vector.shape_cast %223 : vector<8x128xf32> to vector<1x8x128xf32>
    tpu.vector_store %arg6[%c2, %c0_60, %c0_61], %265 {strides = array<i32>} : memref<8x8x128xf32, #tpu.memory_space<vmem>>, vector<1x8x128xf32>,
    %c5 = arith.constant 5 : index
    %c0_62 = arith.constant 0 : index
    %c0_63 = arith.constant 0 : index
    %266 = vector.load %arg7[%c5, %c0_62, %c0_63] : memref<8x8x128xf32, #tpu.memory_space<vmem>>, vector<1x8x128xf32>
    %267 = vector.shape_cast %266 : vector<1x8x128xf32> to vector<8x128xf32>
    %268 = vector.shape_cast %262 : vector<8x128xf32> to vector<1x8x128xf32>
    tpu.vector_store %arg7[%c5, %c0_62, %c0_63], %268 {strides = array<i32>} : memref<8x8x128xf32, #tpu.memory_space<vmem>>, vector<1x8x128xf32>,
    %269 = vector.extract_strided_slice %6 {offsets = [24, 0], sizes = [8, 384], strides = [1, 1]} : vector<64x768xf32> to vector<8x384xf32>
    %cst_64 = arith.constant dense<0.000000e+00> : vector<8x384xf32>
    %270 = tpu.matmul %219, %8, %cst_64 {dimension_numbers = #tpu.dot_dimension_numbers<[1], [0], [0], [1], [0, 0, 1, 1], [], []>} : vector<8x128xf32>, vector<128x384xf32>, vector<8x384xf32> -> vector<8x384xf32>
    %271 = vector.extract_strided_slice %269 {offsets = [0, 0], sizes = [8, 128], strides = [1, 1]} : vector<8x384xf32> to vector<8x128xf32>
    %272 = vector.extract_strided_slice %270 {offsets = [0, 0], sizes = [8, 128], strides = [1, 1]} : vector<8x384xf32> to vector<8x128xf32>
    %273 = arith.addf %271, %272 : vector<8x128xf32>
    %274 = arith.negf %273 : vector<8x128xf32>
    %275 = math.exp %274 : vector<8x128xf32>
    %cst_65 = arith.constant 1.000000e+00 : f32
    %276 = vector.broadcast %cst_65 : f32 to vector<8x128xf32>
    %277 = arith.addf %276, %275 : vector<8x128xf32>
    %278 = arith.divf %276, %277 : vector<8x128xf32>
    %279 = vector.extract_strided_slice %269 {offsets = [0, 128], sizes = [8, 128], strides = [1, 1]} : vector<8x384xf32> to vector<8x128xf32>
    %280 = vector.extract_strided_slice %270 {offsets = [0, 128], sizes = [8, 128], strides = [1, 1]} : vector<8x384xf32> to vector<8x128xf32>
    %281 = arith.addf %279, %280 : vector<8x128xf32>
    %282 = arith.negf %281 : vector<8x128xf32>
    %283 = math.exp %282 : vector<8x128xf32>
    %cst_66 = arith.constant 1.000000e+00 : f32
    %284 = vector.broadcast %cst_66 : f32 to vector<8x128xf32>
    %285 = arith.addf %284, %283 : vector<8x128xf32>
    %286 = arith.divf %284, %285 : vector<8x128xf32>
    %287 = vector.extract_strided_slice %269 {offsets = [0, 256], sizes = [8, 128], strides = [1, 1]} : vector<8x384xf32> to vector<8x128xf32>
    %288 = vector.extract_strided_slice %270 {offsets = [0, 256], sizes = [8, 128], strides = [1, 1]} : vector<8x384xf32> to vector<8x128xf32>
    %289 = vector.broadcast %12 : vector<1x128xf32> to vector<8x128xf32>
    %290 = arith.addf %288, %289 : vector<8x128xf32>
    %291 = arith.mulf %278, %290 : vector<8x128xf32>
    %292 = arith.addf %287, %291 : vector<8x128xf32>
    %293 = math.tanh %292 : vector<8x128xf32>
    %cst_67 = arith.constant 1.000000e+00 : f32
    %294 = vector.broadcast %cst_67 : f32 to vector<8x128xf32>
    %295 = arith.subf %294, %286 : vector<8x128xf32>
    %296 = arith.mulf %295, %293 : vector<8x128xf32>
    %297 = arith.mulf %286, %219 : vector<8x128xf32>
    %298 = arith.addf %296, %297 : vector<8x128xf32>
    %c3_i32 = arith.constant 3 : i32
    %299 = vector.broadcast %c3_i32 : i32 to vector<8x1xi32>
    %300 = arith.cmpi sgt, %0, %299 : vector<8x1xi32>
    %301 = vector.shape_cast %300 : vector<8x1xi1> to vector<8x1xi1>
    %302 = vector.broadcast %301 : vector<8x1xi1> to vector<8x128xi1>
    %303 = arith.select %302, %298, %219 : vector<8x128xi1>, vector<8x128xf32>
    %cst_68 = arith.constant 0.000000e+00 : f32
    %304 = vector.shape_cast %300 : vector<8x1xi1> to vector<8x1xi1>
    %305 = vector.broadcast %304 : vector<8x1xi1> to vector<8x128xi1>
    %306 = vector.broadcast %cst_68 : f32 to vector<8x128xf32>
    %307 = arith.select %305, %298, %306 : vector<8x128xi1>, vector<8x128xf32>
    %308 = vector.extract_strided_slice %6 {offsets = [32, 384], sizes = [8, 384], strides = [1, 1]} : vector<64x768xf32> to vector<8x384xf32>
    %cst_69 = arith.constant dense<0.000000e+00> : vector<8x384xf32>
    %309 = tpu.matmul %258, %10, %cst_69 {dimension_numbers = #tpu.dot_dimension_numbers<[1], [0], [0], [1], [0, 0, 1, 1], [], []>} : vector<8x128xf32>, vector<128x384xf32>, vector<8x384xf32> -> vector<8x384xf32>
    %310 = vector.extract_strided_slice %308 {offsets = [0, 0], sizes = [8, 128], strides = [1, 1]} : vector<8x384xf32> to vector<8x128xf32>
    %311 = vector.extract_strided_slice %309 {offsets = [0, 0], sizes = [8, 128], strides = [1, 1]} : vector<8x384xf32> to vector<8x128xf32>
    %312 = arith.addf %310, %311 : vector<8x128xf32>
    %313 = arith.negf %312 : vector<8x128xf32>
    %314 = math.exp %313 : vector<8x128xf32>
    %cst_70 = arith.constant 1.000000e+00 : f32
    %315 = vector.broadcast %cst_70 : f32 to vector<8x128xf32>
    %316 = arith.addf %315, %314 : vector<8x128xf32>
    %317 = arith.divf %315, %316 : vector<8x128xf32>
    %318 = vector.extract_strided_slice %308 {offsets = [0, 128], sizes = [8, 128], strides = [1, 1]} : vector<8x384xf32> to vector<8x128xf32>
    %319 = vector.extract_strided_slice %309 {offsets = [0, 128], sizes = [8, 128], strides = [1, 1]} : vector<8x384xf32> to vector<8x128xf32>
    %320 = arith.addf %318, %319 : vector<8x128xf32>
    %321 = arith.negf %320 : vector<8x128xf32>
    %322 = math.exp %321 : vector<8x128xf32>
    %cst_71 = arith.constant 1.000000e+00 : f32
    %323 = vector.broadcast %cst_71 : f32 to vector<8x128xf32>
    %324 = arith.addf %323, %322 : vector<8x128xf32>
    %325 = arith.divf %323, %324 : vector<8x128xf32>
    %326 = vector.extract_strided_slice %308 {offsets = [0, 256], sizes = [8, 128], strides = [1, 1]} : vector<8x384xf32> to vector<8x128xf32>
    %327 = vector.extract_strided_slice %309 {offsets = [0, 256], sizes = [8, 128], strides = [1, 1]} : vector<8x384xf32> to vector<8x128xf32>
    %328 = vector.broadcast %14 : vector<1x128xf32> to vector<8x128xf32>
    %329 = arith.addf %327, %328 : vector<8x128xf32>
    %330 = arith.mulf %317, %329 : vector<8x128xf32>
    %331 = arith.addf %326, %330 : vector<8x128xf32>
    %332 = math.tanh %331 : vector<8x128xf32>
    %cst_72 = arith.constant 1.000000e+00 : f32
    %333 = vector.broadcast %cst_72 : f32 to vector<8x128xf32>
    %334 = arith.subf %333, %325 : vector<8x128xf32>
    %335 = arith.mulf %334, %332 : vector<8x128xf32>
    %336 = arith.mulf %325, %258 : vector<8x128xf32>
    %337 = arith.addf %335, %336 : vector<8x128xf32>
    %c4_i32 = arith.constant 4 : i32
    %338 = vector.broadcast %c4_i32 : i32 to vector<8x1xi32>
    %339 = arith.cmpi sgt, %0, %338 : vector<8x1xi32>
    %340 = vector.shape_cast %339 : vector<8x1xi1> to vector<8x1xi1>
    %341 = vector.broadcast %340 : vector<8x1xi1> to vector<8x128xi1>
    %342 = arith.select %341, %337, %258 : vector<8x128xi1>, vector<8x128xf32>
    %cst_73 = arith.constant 0.000000e+00 : f32
    %343 = vector.shape_cast %339 : vector<8x1xi1> to vector<8x1xi1>
    %344 = vector.broadcast %343 : vector<8x1xi1> to vector<8x128xi1>
    %345 = vector.broadcast %cst_73 : f32 to vector<8x128xf32>
    %346 = arith.select %344, %337, %345 : vector<8x128xi1>, vector<8x128xf32>
    %c3 = arith.constant 3 : index
    %c0_74 = arith.constant 0 : index
    %c0_75 = arith.constant 0 : index
    %347 = vector.load %arg6[%c3, %c0_74, %c0_75] : memref<8x8x128xf32, #tpu.memory_space<vmem>>, vector<1x8x128xf32>
    %348 = vector.shape_cast %347 : vector<1x8x128xf32> to vector<8x128xf32>
    %349 = vector.shape_cast %307 : vector<8x128xf32> to vector<1x8x128xf32>
    tpu.vector_store %arg6[%c3, %c0_74, %c0_75], %349 {strides = array<i32>} : memref<8x8x128xf32, #tpu.memory_space<vmem>>, vector<1x8x128xf32>,
    %c4 = arith.constant 4 : index
    %c0_76 = arith.constant 0 : index
    %c0_77 = arith.constant 0 : index
    %350 = vector.load %arg7[%c4, %c0_76, %c0_77] : memref<8x8x128xf32, #tpu.memory_space<vmem>>, vector<1x8x128xf32>
    %351 = vector.shape_cast %350 : vector<1x8x128xf32> to vector<8x128xf32>
    %352 = vector.shape_cast %346 : vector<8x128xf32> to vector<1x8x128xf32>
    tpu.vector_store %arg7[%c4, %c0_76, %c0_77], %352 {strides = array<i32>} : memref<8x8x128xf32, #tpu.memory_space<vmem>>, vector<1x8x128xf32>,
    %353 = vector.extract_strided_slice %6 {offsets = [32, 0], sizes = [8, 384], strides = [1, 1]} : vector<64x768xf32> to vector<8x384xf32>
    %cst_78 = arith.constant dense<0.000000e+00> : vector<8x384xf32>
    %354 = tpu.matmul %303, %8, %cst_78 {dimension_numbers = #tpu.dot_dimension_numbers<[1], [0], [0], [1], [0, 0, 1, 1], [], []>} : vector<8x128xf32>, vector<128x384xf32>, vector<8x384xf32> -> vector<8x384xf32>
    %355 = vector.extract_strided_slice %353 {offsets = [0, 0], sizes = [8, 128], strides = [1, 1]} : vector<8x384xf32> to vector<8x128xf32>
    %356 = vector.extract_strided_slice %354 {offsets = [0, 0], sizes = [8, 128], strides = [1, 1]} : vector<8x384xf32> to vector<8x128xf32>
    %357 = arith.addf %355, %356 : vector<8x128xf32>
    %358 = arith.negf %357 : vector<8x128xf32>
    %359 = math.exp %358 : vector<8x128xf32>
    %cst_79 = arith.constant 1.000000e+00 : f32
    %360 = vector.broadcast %cst_79 : f32 to vector<8x128xf32>
    %361 = arith.addf %360, %359 : vector<8x128xf32>
    %362 = arith.divf %360, %361 : vector<8x128xf32>
    %363 = vector.extract_strided_slice %353 {offsets = [0, 128], sizes = [8, 128], strides = [1, 1]} : vector<8x384xf32> to vector<8x128xf32>
    %364 = vector.extract_strided_slice %354 {offsets = [0, 128], sizes = [8, 128], strides = [1, 1]} : vector<8x384xf32> to vector<8x128xf32>
    %365 = arith.addf %363, %364 : vector<8x128xf32>
    %366 = arith.negf %365 : vector<8x128xf32>
    %367 = math.exp %366 : vector<8x128xf32>
    %cst_80 = arith.constant 1.000000e+00 : f32
    %368 = vector.broadcast %cst_80 : f32 to vector<8x128xf32>
    %369 = arith.addf %368, %367 : vector<8x128xf32>
    %370 = arith.divf %368, %369 : vector<8x128xf32>
    %371 = vector.extract_strided_slice %353 {offsets = [0, 256], sizes = [8, 128], strides = [1, 1]} : vector<8x384xf32> to vector<8x128xf32>
    %372 = vector.extract_strided_slice %354 {offsets = [0, 256], sizes = [8, 128], strides = [1, 1]} : vector<8x384xf32> to vector<8x128xf32>
    %373 = vector.broadcast %12 : vector<1x128xf32> to vector<8x128xf32>
    %374 = arith.addf %372, %373 : vector<8x128xf32>
    %375 = arith.mulf %362, %374 : vector<8x128xf32>
    %376 = arith.addf %371, %375 : vector<8x128xf32>
    %377 = math.tanh %376 : vector<8x128xf32>
    %cst_81 = arith.constant 1.000000e+00 : f32
    %378 = vector.broadcast %cst_81 : f32 to vector<8x128xf32>
    %379 = arith.subf %378, %370 : vector<8x128xf32>
    %380 = arith.mulf %379, %377 : vector<8x128xf32>
    %381 = arith.mulf %370, %303 : vector<8x128xf32>
    %382 = arith.addf %380, %381 : vector<8x128xf32>
    %c4_i32_82 = arith.constant 4 : i32
    %383 = vector.broadcast %c4_i32_82 : i32 to vector<8x1xi32>
    %384 = arith.cmpi sgt, %0, %383 : vector<8x1xi32>
    %385 = vector.shape_cast %384 : vector<8x1xi1> to vector<8x1xi1>
    %386 = vector.broadcast %385 : vector<8x1xi1> to vector<8x128xi1>
    %387 = arith.select %386, %382, %303 : vector<8x128xi1>, vector<8x128xf32>
    %cst_83 = arith.constant 0.000000e+00 : f32
    %388 = vector.shape_cast %384 : vector<8x1xi1> to vector<8x1xi1>
    %389 = vector.broadcast %388 : vector<8x1xi1> to vector<8x128xi1>
    %390 = vector.broadcast %cst_83 : f32 to vector<8x128xf32>
    %391 = arith.select %389, %382, %390 : vector<8x128xi1>, vector<8x128xf32>
    %392 = vector.extract_strided_slice %6 {offsets = [24, 384], sizes = [8, 384], strides = [1, 1]} : vector<64x768xf32> to vector<8x384xf32>
    %cst_84 = arith.constant dense<0.000000e+00> : vector<8x384xf32>
    %393 = tpu.matmul %342, %10, %cst_84 {dimension_numbers = #tpu.dot_dimension_numbers<[1], [0], [0], [1], [0, 0, 1, 1], [], []>} : vector<8x128xf32>, vector<128x384xf32>, vector<8x384xf32> -> vector<8x384xf32>
    %394 = vector.extract_strided_slice %392 {offsets = [0, 0], sizes = [8, 128], strides = [1, 1]} : vector<8x384xf32> to vector<8x128xf32>
    %395 = vector.extract_strided_slice %393 {offsets = [0, 0], sizes = [8, 128], strides = [1, 1]} : vector<8x384xf32> to vector<8x128xf32>
    %396 = arith.addf %394, %395 : vector<8x128xf32>
    %397 = arith.negf %396 : vector<8x128xf32>
    %398 = math.exp %397 : vector<8x128xf32>
    %cst_85 = arith.constant 1.000000e+00 : f32
    %399 = vector.broadcast %cst_85 : f32 to vector<8x128xf32>
    %400 = arith.addf %399, %398 : vector<8x128xf32>
    %401 = arith.divf %399, %400 : vector<8x128xf32>
    %402 = vector.extract_strided_slice %392 {offsets = [0, 128], sizes = [8, 128], strides = [1, 1]} : vector<8x384xf32> to vector<8x128xf32>
    %403 = vector.extract_strided_slice %393 {offsets = [0, 128], sizes = [8, 128], strides = [1, 1]} : vector<8x384xf32> to vector<8x128xf32>
    %404 = arith.addf %402, %403 : vector<8x128xf32>
    %405 = arith.negf %404 : vector<8x128xf32>
    %406 = math.exp %405 : vector<8x128xf32>
    %cst_86 = arith.constant 1.000000e+00 : f32
    %407 = vector.broadcast %cst_86 : f32 to vector<8x128xf32>
    %408 = arith.addf %407, %406 : vector<8x128xf32>
    %409 = arith.divf %407, %408 : vector<8x128xf32>
    %410 = vector.extract_strided_slice %392 {offsets = [0, 256], sizes = [8, 128], strides = [1, 1]} : vector<8x384xf32> to vector<8x128xf32>
    %411 = vector.extract_strided_slice %393 {offsets = [0, 256], sizes = [8, 128], strides = [1, 1]} : vector<8x384xf32> to vector<8x128xf32>
    %412 = vector.broadcast %14 : vector<1x128xf32> to vector<8x128xf32>
    %413 = arith.addf %411, %412 : vector<8x128xf32>
    %414 = arith.mulf %401, %413 : vector<8x128xf32>
    %415 = arith.addf %410, %414 : vector<8x128xf32>
    %416 = math.tanh %415 : vector<8x128xf32>
    %cst_87 = arith.constant 1.000000e+00 : f32
    %417 = vector.broadcast %cst_87 : f32 to vector<8x128xf32>
    %418 = arith.subf %417, %409 : vector<8x128xf32>
    %419 = arith.mulf %418, %416 : vector<8x128xf32>
    %420 = arith.mulf %409, %342 : vector<8x128xf32>
    %421 = arith.addf %419, %420 : vector<8x128xf32>
    %c3_i32_88 = arith.constant 3 : i32
    %422 = vector.broadcast %c3_i32_88 : i32 to vector<8x1xi32>
    %423 = arith.cmpi sgt, %0, %422 : vector<8x1xi32>
    %424 = vector.shape_cast %423 : vector<8x1xi1> to vector<8x1xi1>
    %425 = vector.broadcast %424 : vector<8x1xi1> to vector<8x128xi1>
    %426 = arith.select %425, %421, %342 : vector<8x128xi1>, vector<8x128xf32>
    %cst_89 = arith.constant 0.000000e+00 : f32
    %427 = vector.shape_cast %423 : vector<8x1xi1> to vector<8x1xi1>
    %428 = vector.broadcast %427 : vector<8x1xi1> to vector<8x128xi1>
    %429 = vector.broadcast %cst_89 : f32 to vector<8x128xf32>
    %430 = arith.select %428, %421, %429 : vector<8x128xi1>, vector<8x128xf32>
    %c4_90 = arith.constant 4 : index
    %c0_91 = arith.constant 0 : index
    %c0_92 = arith.constant 0 : index
    %431 = vector.load %arg6[%c4_90, %c0_91, %c0_92] : memref<8x8x128xf32, #tpu.memory_space<vmem>>, vector<1x8x128xf32>
    %432 = vector.shape_cast %431 : vector<1x8x128xf32> to vector<8x128xf32>
    %433 = vector.shape_cast %391 : vector<8x128xf32> to vector<1x8x128xf32>
    tpu.vector_store %arg6[%c4_90, %c0_91, %c0_92], %433 {strides = array<i32>} : memref<8x8x128xf32, #tpu.memory_space<vmem>>, vector<1x8x128xf32>,
    %c3_93 = arith.constant 3 : index
    %c0_94 = arith.constant 0 : index
    %c0_95 = arith.constant 0 : index
    %434 = vector.load %arg7[%c3_93, %c0_94, %c0_95] : memref<8x8x128xf32, #tpu.memory_space<vmem>>, vector<1x8x128xf32>
    %435 = vector.shape_cast %434 : vector<1x8x128xf32> to vector<8x128xf32>
    %436 = vector.shape_cast %430 : vector<8x128xf32> to vector<1x8x128xf32>
    tpu.vector_store %arg7[%c3_93, %c0_94, %c0_95], %436 {strides = array<i32>} : memref<8x8x128xf32, #tpu.memory_space<vmem>>, vector<1x8x128xf32>,
    %437 = vector.extract_strided_slice %6 {offsets = [40, 0], sizes = [8, 384], strides = [1, 1]} : vector<64x768xf32> to vector<8x384xf32>
    %cst_96 = arith.constant dense<0.000000e+00> : vector<8x384xf32>
    %438 = tpu.matmul %387, %8, %cst_96 {dimension_numbers = #tpu.dot_dimension_numbers<[1], [0], [0], [1], [0, 0, 1, 1], [], []>} : vector<8x128xf32>, vector<128x384xf32>, vector<8x384xf32> -> vector<8x384xf32>
    %439 = vector.extract_strided_slice %437 {offsets = [0, 0], sizes = [8, 128], strides = [1, 1]} : vector<8x384xf32> to vector<8x128xf32>
    %440 = vector.extract_strided_slice %438 {offsets = [0, 0], sizes = [8, 128], strides = [1, 1]} : vector<8x384xf32> to vector<8x128xf32>
    %441 = arith.addf %439, %440 : vector<8x128xf32>
    %442 = arith.negf %441 : vector<8x128xf32>
    %443 = math.exp %442 : vector<8x128xf32>
    %cst_97 = arith.constant 1.000000e+00 : f32
    %444 = vector.broadcast %cst_97 : f32 to vector<8x128xf32>
    %445 = arith.addf %444, %443 : vector<8x128xf32>
    %446 = arith.divf %444, %445 : vector<8x128xf32>
    %447 = vector.extract_strided_slice %437 {offsets = [0, 128], sizes = [8, 128], strides = [1, 1]} : vector<8x384xf32> to vector<8x128xf32>
    %448 = vector.extract_strided_slice %438 {offsets = [0, 128], sizes = [8, 128], strides = [1, 1]} : vector<8x384xf32> to vector<8x128xf32>
    %449 = arith.addf %447, %448 : vector<8x128xf32>
    %450 = arith.negf %449 : vector<8x128xf32>
    %451 = math.exp %450 : vector<8x128xf32>
    %cst_98 = arith.constant 1.000000e+00 : f32
    %452 = vector.broadcast %cst_98 : f32 to vector<8x128xf32>
    %453 = arith.addf %452, %451 : vector<8x128xf32>
    %454 = arith.divf %452, %453 : vector<8x128xf32>
    %455 = vector.extract_strided_slice %437 {offsets = [0, 256], sizes = [8, 128], strides = [1, 1]} : vector<8x384xf32> to vector<8x128xf32>
    %456 = vector.extract_strided_slice %438 {offsets = [0, 256], sizes = [8, 128], strides = [1, 1]} : vector<8x384xf32> to vector<8x128xf32>
    %457 = vector.broadcast %12 : vector<1x128xf32> to vector<8x128xf32>
    %458 = arith.addf %456, %457 : vector<8x128xf32>
    %459 = arith.mulf %446, %458 : vector<8x128xf32>
    %460 = arith.addf %455, %459 : vector<8x128xf32>
    %461 = math.tanh %460 : vector<8x128xf32>
    %cst_99 = arith.constant 1.000000e+00 : f32
    %462 = vector.broadcast %cst_99 : f32 to vector<8x128xf32>
    %463 = arith.subf %462, %454 : vector<8x128xf32>
    %464 = arith.mulf %463, %461 : vector<8x128xf32>
    %465 = arith.mulf %454, %387 : vector<8x128xf32>
    %466 = arith.addf %464, %465 : vector<8x128xf32>
    %c5_i32_100 = arith.constant 5 : i32
    %467 = vector.broadcast %c5_i32_100 : i32 to vector<8x1xi32>
    %468 = arith.cmpi sgt, %0, %467 : vector<8x1xi32>
    %469 = vector.shape_cast %468 : vector<8x1xi1> to vector<8x1xi1>
    %470 = vector.broadcast %469 : vector<8x1xi1> to vector<8x128xi1>
    %471 = arith.select %470, %466, %387 : vector<8x128xi1>, vector<8x128xf32>
    %cst_101 = arith.constant 0.000000e+00 : f32
    %472 = vector.shape_cast %468 : vector<8x1xi1> to vector<8x1xi1>
    %473 = vector.broadcast %472 : vector<8x1xi1> to vector<8x128xi1>
    %474 = vector.broadcast %cst_101 : f32 to vector<8x128xf32>
    %475 = arith.select %473, %466, %474 : vector<8x128xi1>, vector<8x128xf32>
    %476 = vector.extract_strided_slice %6 {offsets = [16, 384], sizes = [8, 384], strides = [1, 1]} : vector<64x768xf32> to vector<8x384xf32>
    %cst_102 = arith.constant dense<0.000000e+00> : vector<8x384xf32>
    %477 = tpu.matmul %426, %10, %cst_102 {dimension_numbers = #tpu.dot_dimension_numbers<[1], [0], [0], [1], [0, 0, 1, 1], [], []>} : vector<8x128xf32>, vector<128x384xf32>, vector<8x384xf32> -> vector<8x384xf32>
    %478 = vector.extract_strided_slice %476 {offsets = [0, 0], sizes = [8, 128], strides = [1, 1]} : vector<8x384xf32> to vector<8x128xf32>
    %479 = vector.extract_strided_slice %477 {offsets = [0, 0], sizes = [8, 128], strides = [1, 1]} : vector<8x384xf32> to vector<8x128xf32>
    %480 = arith.addf %478, %479 : vector<8x128xf32>
    %481 = arith.negf %480 : vector<8x128xf32>
    %482 = math.exp %481 : vector<8x128xf32>
    %cst_103 = arith.constant 1.000000e+00 : f32
    %483 = vector.broadcast %cst_103 : f32 to vector<8x128xf32>
    %484 = arith.addf %483, %482 : vector<8x128xf32>
    %485 = arith.divf %483, %484 : vector<8x128xf32>
    %486 = vector.extract_strided_slice %476 {offsets = [0, 128], sizes = [8, 128], strides = [1, 1]} : vector<8x384xf32> to vector<8x128xf32>
    %487 = vector.extract_strided_slice %477 {offsets = [0, 128], sizes = [8, 128], strides = [1, 1]} : vector<8x384xf32> to vector<8x128xf32>
    %488 = arith.addf %486, %487 : vector<8x128xf32>
    %489 = arith.negf %488 : vector<8x128xf32>
    %490 = math.exp %489 : vector<8x128xf32>
    %cst_104 = arith.constant 1.000000e+00 : f32
    %491 = vector.broadcast %cst_104 : f32 to vector<8x128xf32>
    %492 = arith.addf %491, %490 : vector<8x128xf32>
    %493 = arith.divf %491, %492 : vector<8x128xf32>
    %494 = vector.extract_strided_slice %476 {offsets = [0, 256], sizes = [8, 128], strides = [1, 1]} : vector<8x384xf32> to vector<8x128xf32>
    %495 = vector.extract_strided_slice %477 {offsets = [0, 256], sizes = [8, 128], strides = [1, 1]} : vector<8x384xf32> to vector<8x128xf32>
    %496 = vector.broadcast %14 : vector<1x128xf32> to vector<8x128xf32>
    %497 = arith.addf %495, %496 : vector<8x128xf32>
    %498 = arith.mulf %485, %497 : vector<8x128xf32>
    %499 = arith.addf %494, %498 : vector<8x128xf32>
    %500 = math.tanh %499 : vector<8x128xf32>
    %cst_105 = arith.constant 1.000000e+00 : f32
    %501 = vector.broadcast %cst_105 : f32 to vector<8x128xf32>
    %502 = arith.subf %501, %493 : vector<8x128xf32>
    %503 = arith.mulf %502, %500 : vector<8x128xf32>
    %504 = arith.mulf %493, %426 : vector<8x128xf32>
    %505 = arith.addf %503, %504 : vector<8x128xf32>
    %c2_i32_106 = arith.constant 2 : i32
    %506 = vector.broadcast %c2_i32_106 : i32 to vector<8x1xi32>
    %507 = arith.cmpi sgt, %0, %506 : vector<8x1xi32>
    %508 = vector.shape_cast %507 : vector<8x1xi1> to vector<8x1xi1>
    %509 = vector.broadcast %508 : vector<8x1xi1> to vector<8x128xi1>
    %510 = arith.select %509, %505, %426 : vector<8x128xi1>, vector<8x128xf32>
    %cst_107 = arith.constant 0.000000e+00 : f32
    %511 = vector.shape_cast %507 : vector<8x1xi1> to vector<8x1xi1>
    %512 = vector.broadcast %511 : vector<8x1xi1> to vector<8x128xi1>
    %513 = vector.broadcast %cst_107 : f32 to vector<8x128xf32>
    %514 = arith.select %512, %505, %513 : vector<8x128xi1>, vector<8x128xf32>
    %c5_108 = arith.constant 5 : index
    %c0_109 = arith.constant 0 : index
    %c0_110 = arith.constant 0 : index
    %515 = vector.load %arg6[%c5_108, %c0_109, %c0_110] : memref<8x8x128xf32, #tpu.memory_space<vmem>>, vector<1x8x128xf32>
    %516 = vector.shape_cast %515 : vector<1x8x128xf32> to vector<8x128xf32>
    %517 = vector.shape_cast %475 : vector<8x128xf32> to vector<1x8x128xf32>
    tpu.vector_store %arg6[%c5_108, %c0_109, %c0_110], %517 {strides = array<i32>} : memref<8x8x128xf32, #tpu.memory_space<vmem>>, vector<1x8x128xf32>,
    %c2_111 = arith.constant 2 : index
    %c0_112 = arith.constant 0 : index
    %c0_113 = arith.constant 0 : index
    %518 = vector.load %arg7[%c2_111, %c0_112, %c0_113] : memref<8x8x128xf32, #tpu.memory_space<vmem>>, vector<1x8x128xf32>
    %519 = vector.shape_cast %518 : vector<1x8x128xf32> to vector<8x128xf32>
    %520 = vector.shape_cast %514 : vector<8x128xf32> to vector<1x8x128xf32>
    tpu.vector_store %arg7[%c2_111, %c0_112, %c0_113], %520 {strides = array<i32>} : memref<8x8x128xf32, #tpu.memory_space<vmem>>, vector<1x8x128xf32>,
    %521 = vector.extract_strided_slice %6 {offsets = [48, 0], sizes = [8, 384], strides = [1, 1]} : vector<64x768xf32> to vector<8x384xf32>
    %cst_114 = arith.constant dense<0.000000e+00> : vector<8x384xf32>
    %522 = tpu.matmul %471, %8, %cst_114 {dimension_numbers = #tpu.dot_dimension_numbers<[1], [0], [0], [1], [0, 0, 1, 1], [], []>} : vector<8x128xf32>, vector<128x384xf32>, vector<8x384xf32> -> vector<8x384xf32>
    %523 = vector.extract_strided_slice %521 {offsets = [0, 0], sizes = [8, 128], strides = [1, 1]} : vector<8x384xf32> to vector<8x128xf32>
    %524 = vector.extract_strided_slice %522 {offsets = [0, 0], sizes = [8, 128], strides = [1, 1]} : vector<8x384xf32> to vector<8x128xf32>
    %525 = arith.addf %523, %524 : vector<8x128xf32>
    %526 = arith.negf %525 : vector<8x128xf32>
    %527 = math.exp %526 : vector<8x128xf32>
    %cst_115 = arith.constant 1.000000e+00 : f32
    %528 = vector.broadcast %cst_115 : f32 to vector<8x128xf32>
    %529 = arith.addf %528, %527 : vector<8x128xf32>
    %530 = arith.divf %528, %529 : vector<8x128xf32>
    %531 = vector.extract_strided_slice %521 {offsets = [0, 128], sizes = [8, 128], strides = [1, 1]} : vector<8x384xf32> to vector<8x128xf32>
    %532 = vector.extract_strided_slice %522 {offsets = [0, 128], sizes = [8, 128], strides = [1, 1]} : vector<8x384xf32> to vector<8x128xf32>
    %533 = arith.addf %531, %532 : vector<8x128xf32>
    %534 = arith.negf %533 : vector<8x128xf32>
    %535 = math.exp %534 : vector<8x128xf32>
    %cst_116 = arith.constant 1.000000e+00 : f32
    %536 = vector.broadcast %cst_116 : f32 to vector<8x128xf32>
    %537 = arith.addf %536, %535 : vector<8x128xf32>
    %538 = arith.divf %536, %537 : vector<8x128xf32>
    %539 = vector.extract_strided_slice %521 {offsets = [0, 256], sizes = [8, 128], strides = [1, 1]} : vector<8x384xf32> to vector<8x128xf32>
    %540 = vector.extract_strided_slice %522 {offsets = [0, 256], sizes = [8, 128], strides = [1, 1]} : vector<8x384xf32> to vector<8x128xf32>
    %541 = vector.broadcast %12 : vector<1x128xf32> to vector<8x128xf32>
    %542 = arith.addf %540, %541 : vector<8x128xf32>
    %543 = arith.mulf %530, %542 : vector<8x128xf32>
    %544 = arith.addf %539, %543 : vector<8x128xf32>
    %545 = math.tanh %544 : vector<8x128xf32>
    %cst_117 = arith.constant 1.000000e+00 : f32
    %546 = vector.broadcast %cst_117 : f32 to vector<8x128xf32>
    %547 = arith.subf %546, %538 : vector<8x128xf32>
    %548 = arith.mulf %547, %545 : vector<8x128xf32>
    %549 = arith.mulf %538, %471 : vector<8x128xf32>
    %550 = arith.addf %548, %549 : vector<8x128xf32>
    %c6_i32_118 = arith.constant 6 : i32
    %551 = vector.broadcast %c6_i32_118 : i32 to vector<8x1xi32>
    %552 = arith.cmpi sgt, %0, %551 : vector<8x1xi32>
    %553 = vector.shape_cast %552 : vector<8x1xi1> to vector<8x1xi1>
    %554 = vector.broadcast %553 : vector<8x1xi1> to vector<8x128xi1>
    %555 = arith.select %554, %550, %471 : vector<8x128xi1>, vector<8x128xf32>
    %cst_119 = arith.constant 0.000000e+00 : f32
    %556 = vector.shape_cast %552 : vector<8x1xi1> to vector<8x1xi1>
    %557 = vector.broadcast %556 : vector<8x1xi1> to vector<8x128xi1>
    %558 = vector.broadcast %cst_119 : f32 to vector<8x128xf32>
    %559 = arith.select %557, %550, %558 : vector<8x128xi1>, vector<8x128xf32>
    %560 = vector.extract_strided_slice %6 {offsets = [8, 384], sizes = [8, 384], strides = [1, 1]} : vector<64x768xf32> to vector<8x384xf32>
    %cst_120 = arith.constant dense<0.000000e+00> : vector<8x384xf32>
    %561 = tpu.matmul %510, %10, %cst_120 {dimension_numbers = #tpu.dot_dimension_numbers<[1], [0], [0], [1], [0, 0, 1, 1], [], []>} : vector<8x128xf32>, vector<128x384xf32>, vector<8x384xf32> -> vector<8x384xf32>
    %562 = vector.extract_strided_slice %560 {offsets = [0, 0], sizes = [8, 128], strides = [1, 1]} : vector<8x384xf32> to vector<8x128xf32>
    %563 = vector.extract_strided_slice %561 {offsets = [0, 0], sizes = [8, 128], strides = [1, 1]} : vector<8x384xf32> to vector<8x128xf32>
    %564 = arith.addf %562, %563 : vector<8x128xf32>
    %565 = arith.negf %564 : vector<8x128xf32>
    %566 = math.exp %565 : vector<8x128xf32>
    %cst_121 = arith.constant 1.000000e+00 : f32
    %567 = vector.broadcast %cst_121 : f32 to vector<8x128xf32>
    %568 = arith.addf %567, %566 : vector<8x128xf32>
    %569 = arith.divf %567, %568 : vector<8x128xf32>
    %570 = vector.extract_strided_slice %560 {offsets = [0, 128], sizes = [8, 128], strides = [1, 1]} : vector<8x384xf32> to vector<8x128xf32>
    %571 = vector.extract_strided_slice %561 {offsets = [0, 128], sizes = [8, 128], strides = [1, 1]} : vector<8x384xf32> to vector<8x128xf32>
    %572 = arith.addf %570, %571 : vector<8x128xf32>
    %573 = arith.negf %572 : vector<8x128xf32>
    %574 = math.exp %573 : vector<8x128xf32>
    %cst_122 = arith.constant 1.000000e+00 : f32
    %575 = vector.broadcast %cst_122 : f32 to vector<8x128xf32>
    %576 = arith.addf %575, %574 : vector<8x128xf32>
    %577 = arith.divf %575, %576 : vector<8x128xf32>
    %578 = vector.extract_strided_slice %560 {offsets = [0, 256], sizes = [8, 128], strides = [1, 1]} : vector<8x384xf32> to vector<8x128xf32>
    %579 = vector.extract_strided_slice %561 {offsets = [0, 256], sizes = [8, 128], strides = [1, 1]} : vector<8x384xf32> to vector<8x128xf32>
    %580 = vector.broadcast %14 : vector<1x128xf32> to vector<8x128xf32>
    %581 = arith.addf %579, %580 : vector<8x128xf32>
    %582 = arith.mulf %569, %581 : vector<8x128xf32>
    %583 = arith.addf %578, %582 : vector<8x128xf32>
    %584 = math.tanh %583 : vector<8x128xf32>
    %cst_123 = arith.constant 1.000000e+00 : f32
    %585 = vector.broadcast %cst_123 : f32 to vector<8x128xf32>
    %586 = arith.subf %585, %577 : vector<8x128xf32>
    %587 = arith.mulf %586, %584 : vector<8x128xf32>
    %588 = arith.mulf %577, %510 : vector<8x128xf32>
    %589 = arith.addf %587, %588 : vector<8x128xf32>
    %c1_i32_124 = arith.constant 1 : i32
    %590 = vector.broadcast %c1_i32_124 : i32 to vector<8x1xi32>
    %591 = arith.cmpi sgt, %0, %590 : vector<8x1xi32>
    %592 = vector.shape_cast %591 : vector<8x1xi1> to vector<8x1xi1>
    %593 = vector.broadcast %592 : vector<8x1xi1> to vector<8x128xi1>
    %594 = arith.select %593, %589, %510 : vector<8x128xi1>, vector<8x128xf32>
    %cst_125 = arith.constant 0.000000e+00 : f32
    %595 = vector.shape_cast %591 : vector<8x1xi1> to vector<8x1xi1>
    %596 = vector.broadcast %595 : vector<8x1xi1> to vector<8x128xi1>
    %597 = vector.broadcast %cst_125 : f32 to vector<8x128xf32>
    %598 = arith.select %596, %589, %597 : vector<8x128xi1>, vector<8x128xf32>
    %c6_126 = arith.constant 6 : index
    %c0_127 = arith.constant 0 : index
    %c0_128 = arith.constant 0 : index
    %599 = vector.load %arg6[%c6_126, %c0_127, %c0_128] : memref<8x8x128xf32, #tpu.memory_space<vmem>>, vector<1x8x128xf32>
    %600 = vector.shape_cast %599 : vector<1x8x128xf32> to vector<8x128xf32>
    %601 = vector.shape_cast %559 : vector<8x128xf32> to vector<1x8x128xf32>
    tpu.vector_store %arg6[%c6_126, %c0_127, %c0_128], %601 {strides = array<i32>} : memref<8x8x128xf32, #tpu.memory_space<vmem>>, vector<1x8x128xf32>,
    %c1_129 = arith.constant 1 : index
    %c0_130 = arith.constant 0 : index
    %c0_131 = arith.constant 0 : index
    %602 = vector.load %arg7[%c1_129, %c0_130, %c0_131] : memref<8x8x128xf32, #tpu.memory_space<vmem>>, vector<1x8x128xf32>
    %603 = vector.shape_cast %602 : vector<1x8x128xf32> to vector<8x128xf32>
    %604 = vector.shape_cast %598 : vector<8x128xf32> to vector<1x8x128xf32>
    tpu.vector_store %arg7[%c1_129, %c0_130, %c0_131], %604 {strides = array<i32>} : memref<8x8x128xf32, #tpu.memory_space<vmem>>, vector<1x8x128xf32>,
    %605 = vector.extract_strided_slice %6 {offsets = [56, 0], sizes = [8, 384], strides = [1, 1]} : vector<64x768xf32> to vector<8x384xf32>
    %cst_132 = arith.constant dense<0.000000e+00> : vector<8x384xf32>
    %606 = tpu.matmul %555, %8, %cst_132 {dimension_numbers = #tpu.dot_dimension_numbers<[1], [0], [0], [1], [0, 0, 1, 1], [], []>} : vector<8x128xf32>, vector<128x384xf32>, vector<8x384xf32> -> vector<8x384xf32>
    %607 = vector.extract_strided_slice %605 {offsets = [0, 0], sizes = [8, 128], strides = [1, 1]} : vector<8x384xf32> to vector<8x128xf32>
    %608 = vector.extract_strided_slice %606 {offsets = [0, 0], sizes = [8, 128], strides = [1, 1]} : vector<8x384xf32> to vector<8x128xf32>
    %609 = arith.addf %607, %608 : vector<8x128xf32>
    %610 = arith.negf %609 : vector<8x128xf32>
    %611 = math.exp %610 : vector<8x128xf32>
    %cst_133 = arith.constant 1.000000e+00 : f32
    %612 = vector.broadcast %cst_133 : f32 to vector<8x128xf32>
    %613 = arith.addf %612, %611 : vector<8x128xf32>
    %614 = arith.divf %612, %613 : vector<8x128xf32>
    %615 = vector.extract_strided_slice %605 {offsets = [0, 128], sizes = [8, 128], strides = [1, 1]} : vector<8x384xf32> to vector<8x128xf32>
    %616 = vector.extract_strided_slice %606 {offsets = [0, 128], sizes = [8, 128], strides = [1, 1]} : vector<8x384xf32> to vector<8x128xf32>
    %617 = arith.addf %615, %616 : vector<8x128xf32>
    %618 = arith.negf %617 : vector<8x128xf32>
    %619 = math.exp %618 : vector<8x128xf32>
    %cst_134 = arith.constant 1.000000e+00 : f32
    %620 = vector.broadcast %cst_134 : f32 to vector<8x128xf32>
    %621 = arith.addf %620, %619 : vector<8x128xf32>
    %622 = arith.divf %620, %621 : vector<8x128xf32>
    %623 = vector.extract_strided_slice %605 {offsets = [0, 256], sizes = [8, 128], strides = [1, 1]} : vector<8x384xf32> to vector<8x128xf32>
    %624 = vector.extract_strided_slice %606 {offsets = [0, 256], sizes = [8, 128], strides = [1, 1]} : vector<8x384xf32> to vector<8x128xf32>
    %625 = vector.broadcast %12 : vector<1x128xf32> to vector<8x128xf32>
    %626 = arith.addf %624, %625 : vector<8x128xf32>
    %627 = arith.mulf %614, %626 : vector<8x128xf32>
    %628 = arith.addf %623, %627 : vector<8x128xf32>
    %629 = math.tanh %628 : vector<8x128xf32>
    %cst_135 = arith.constant 1.000000e+00 : f32
    %630 = vector.broadcast %cst_135 : f32 to vector<8x128xf32>
    %631 = arith.subf %630, %622 : vector<8x128xf32>
    %632 = arith.mulf %631, %629 : vector<8x128xf32>
    %633 = arith.mulf %622, %555 : vector<8x128xf32>
    %634 = arith.addf %632, %633 : vector<8x128xf32>
    %c7_i32_136 = arith.constant 7 : i32
    %635 = vector.broadcast %c7_i32_136 : i32 to vector<8x1xi32>
    %636 = arith.cmpi sgt, %0, %635 : vector<8x1xi32>
    %637 = vector.shape_cast %636 : vector<8x1xi1> to vector<8x1xi1>
    %638 = vector.broadcast %637 : vector<8x1xi1> to vector<8x128xi1>
    %639 = arith.select %638, %634, %555 : vector<8x128xi1>, vector<8x128xf32>
    %cst_137 = arith.constant 0.000000e+00 : f32
    %640 = vector.shape_cast %636 : vector<8x1xi1> to vector<8x1xi1>
    %641 = vector.broadcast %640 : vector<8x1xi1> to vector<8x128xi1>
    %642 = vector.broadcast %cst_137 : f32 to vector<8x128xf32>
    %643 = arith.select %641, %634, %642 : vector<8x128xi1>, vector<8x128xf32>
    %644 = vector.extract_strided_slice %6 {offsets = [0, 384], sizes = [8, 384], strides = [1, 1]} : vector<64x768xf32> to vector<8x384xf32>
    %cst_138 = arith.constant dense<0.000000e+00> : vector<8x384xf32>
    %645 = tpu.matmul %594, %10, %cst_138 {dimension_numbers = #tpu.dot_dimension_numbers<[1], [0], [0], [1], [0, 0, 1, 1], [], []>} : vector<8x128xf32>, vector<128x384xf32>, vector<8x384xf32> -> vector<8x384xf32>
    %646 = vector.extract_strided_slice %644 {offsets = [0, 0], sizes = [8, 128], strides = [1, 1]} : vector<8x384xf32> to vector<8x128xf32>
    %647 = vector.extract_strided_slice %645 {offsets = [0, 0], sizes = [8, 128], strides = [1, 1]} : vector<8x384xf32> to vector<8x128xf32>
    %648 = arith.addf %646, %647 : vector<8x128xf32>
    %649 = arith.negf %648 : vector<8x128xf32>
    %650 = math.exp %649 : vector<8x128xf32>
    %cst_139 = arith.constant 1.000000e+00 : f32
    %651 = vector.broadcast %cst_139 : f32 to vector<8x128xf32>
    %652 = arith.addf %651, %650 : vector<8x128xf32>
    %653 = arith.divf %651, %652 : vector<8x128xf32>
    %654 = vector.extract_strided_slice %644 {offsets = [0, 128], sizes = [8, 128], strides = [1, 1]} : vector<8x384xf32> to vector<8x128xf32>
    %655 = vector.extract_strided_slice %645 {offsets = [0, 128], sizes = [8, 128], strides = [1, 1]} : vector<8x384xf32> to vector<8x128xf32>
    %656 = arith.addf %654, %655 : vector<8x128xf32>
    %657 = arith.negf %656 : vector<8x128xf32>
    %658 = math.exp %657 : vector<8x128xf32>
    %cst_140 = arith.constant 1.000000e+00 : f32
    %659 = vector.broadcast %cst_140 : f32 to vector<8x128xf32>
    %660 = arith.addf %659, %658 : vector<8x128xf32>
    %661 = arith.divf %659, %660 : vector<8x128xf32>
    %662 = vector.extract_strided_slice %644 {offsets = [0, 256], sizes = [8, 128], strides = [1, 1]} : vector<8x384xf32> to vector<8x128xf32>
    %663 = vector.extract_strided_slice %645 {offsets = [0, 256], sizes = [8, 128], strides = [1, 1]} : vector<8x384xf32> to vector<8x128xf32>
    %664 = vector.broadcast %14 : vector<1x128xf32> to vector<8x128xf32>
    %665 = arith.addf %663, %664 : vector<8x128xf32>
    %666 = arith.mulf %653, %665 : vector<8x128xf32>
    %667 = arith.addf %662, %666 : vector<8x128xf32>
    %668 = math.tanh %667 : vector<8x128xf32>
    %cst_141 = arith.constant 1.000000e+00 : f32
    %669 = vector.broadcast %cst_141 : f32 to vector<8x128xf32>
    %670 = arith.subf %669, %661 : vector<8x128xf32>
    %671 = arith.mulf %670, %668 : vector<8x128xf32>
    %672 = arith.mulf %661, %594 : vector<8x128xf32>
    %673 = arith.addf %671, %672 : vector<8x128xf32>
    %c0_i32_142 = arith.constant 0 : i32
    %674 = vector.broadcast %c0_i32_142 : i32 to vector<8x1xi32>
    %675 = arith.cmpi sgt, %0, %674 : vector<8x1xi32>
    %676 = vector.shape_cast %675 : vector<8x1xi1> to vector<8x1xi1>
    %677 = vector.broadcast %676 : vector<8x1xi1> to vector<8x128xi1>
    %678 = arith.select %677, %673, %594 : vector<8x128xi1>, vector<8x128xf32>
    %cst_143 = arith.constant 0.000000e+00 : f32
    %679 = vector.shape_cast %675 : vector<8x1xi1> to vector<8x1xi1>
    %680 = vector.broadcast %679 : vector<8x1xi1> to vector<8x128xi1>
    %681 = vector.broadcast %cst_143 : f32 to vector<8x128xf32>
    %682 = arith.select %680, %673, %681 : vector<8x128xi1>, vector<8x128xf32>
    %c7_144 = arith.constant 7 : index
    %c0_145 = arith.constant 0 : index
    %c0_146 = arith.constant 0 : index
    %683 = vector.load %arg6[%c7_144, %c0_145, %c0_146] : memref<8x8x128xf32, #tpu.memory_space<vmem>>, vector<1x8x128xf32>
    %684 = vector.shape_cast %683 : vector<1x8x128xf32> to vector<8x128xf32>
    %685 = vector.shape_cast %643 : vector<8x128xf32> to vector<1x8x128xf32>
    tpu.vector_store %arg6[%c7_144, %c0_145, %c0_146], %685 {strides = array<i32>} : memref<8x8x128xf32, #tpu.memory_space<vmem>>, vector<1x8x128xf32>,
    %c0_147 = arith.constant 0 : index
    %c0_148 = arith.constant 0 : index
    %c0_149 = arith.constant 0 : index
    %686 = vector.load %arg7[%c0_147, %c0_148, %c0_149] : memref<8x8x128xf32, #tpu.memory_space<vmem>>, vector<1x8x128xf32>
    %687 = vector.shape_cast %686 : vector<1x8x128xf32> to vector<8x128xf32>
    %688 = vector.shape_cast %682 : vector<8x128xf32> to vector<1x8x128xf32>
    tpu.vector_store %arg7[%c0_147, %c0_148, %c0_149], %688 {strides = array<i32>} : memref<8x8x128xf32, #tpu.memory_space<vmem>>, vector<1x8x128xf32>,
    %c0_150 = arith.constant 0 : index
    %c0_151 = arith.constant 0 : index
    %c0_152 = arith.constant 0 : index
    %689 = vector.load %arg8[%c0_150, %c0_151, %c0_152] : memref<2x8x128xf32, #tpu.memory_space<vmem>>, vector<1x8x128xf32>
    %690 = vector.shape_cast %689 : vector<1x8x128xf32> to vector<8x128xf32>
    %691 = vector.shape_cast %639 : vector<8x128xf32> to vector<1x8x128xf32>
    tpu.vector_store %arg8[%c0_150, %c0_151, %c0_152], %691 {strides = array<i32>} : memref<2x8x128xf32, #tpu.memory_space<vmem>>, vector<1x8x128xf32>,
    %c1_153 = arith.constant 1 : index
    %c0_154 = arith.constant 0 : index
    %c0_155 = arith.constant 0 : index
    %692 = vector.load %arg8[%c1_153, %c0_154, %c0_155] : memref<2x8x128xf32, #tpu.memory_space<vmem>>, vector<1x8x128xf32>
    %693 = vector.shape_cast %692 : vector<1x8x128xf32> to vector<8x128xf32>
    %694 = vector.shape_cast %678 : vector<8x128xf32> to vector<1x8x128xf32>
    tpu.vector_store %arg8[%c1_153, %c0_154, %c0_155], %694 {strides = array<i32>} : memref<2x8x128xf32, #tpu.memory_space<vmem>>, vector<1x8x128xf32>,
    return
  }
}

</mosaic_0001>

<bundles_post_ra>
// kernel: encoder_rnn_forward.1
= control target key start
LH: loop header
LB: loop body
LE: loop exit
PB: predicated region body
PF: predicated region fallthrough
CT: control target
= control target key end

     0   :  { %v7888_v3 = vmov 0.0   ;;  %vm91_vm0 = vcmask 261120   ;;  %v7880_v30 = vmov 0   ;;  %vm4627_vm2 = vmmov 0   ;;  %s7871_s2 = inlined_call_operand.vmem [shape: f32[32,768], index: 2, kind: input, shape index: {}]   ;;  %s7872_s1 = inlined_call_operand.vmem [shape: f32[64,32], index: 1, kind: input, shape index: {}]   ;;  %s7873_s4 = inlined_call_operand.vmem [shape: f32[2,128,384], index: 4, kind: input, shape index: {}]   ;;  %s7874_s0 = inlined_call_operand.vmem [shape: s32[8,1], index: 0, kind: input, shape index: {}]   ;;  %s7875_s3 = inlined_call_operand.vmem [shape: f32[1,768], index: 3, kind: input, shape index: {}]   ;;  %s7876_s5 = inlined_call_operand.vmem [shape: f32[2,1,128], index: 5, kind: input, shape index: {}]   ;;  %s7877_s6 = inlined_call_operand.vmem [shape: f32[8,8,128], index: 6, kind: output, shape index: {0}]   ;;  %s7878_s7 = inlined_call_operand.vmem [shape: f32[8,8,128], index: 7, kind: output, shape index: {1}]   ;;  %s7879_s8 = inlined_call_operand.vmem [shape: f32[2,8,128], index: 8, kind: output, shape index: {2}]  }
   0x1   :  { %v54_v0 = vld [vmem:[%s7871_s2 + $0x98] sm:$0xff]  ;;  %v53_v1 = vld [vmem:[%s7871_s2 + $0x90] sm:$0xff]  ;;  %v48_v2 = vld [vmem:[%s7871_s2 + $0x68] sm:$0xff]  ;;  %204 = vmatprep.mubr.f32.mxu1 %v7888_v3  ;;  %180 = vmatprep.mubr.f32.mxu0 %v7888_v3 }
   0x2   :  { %4256 = vmatprep.subr.mxu1 %v54_v0  ;;  %v47_v4 = vld [vmem:[%s7871_s2 + $0x60] sm:$0xff]  ;;  %140 = vmatprep.subr.mxu0 %v54_v0  ;;  %v42_v5 = vld [vmem:[%s7871_s2 + $0x38] sm:$0xff]  ;;  %v41_v6 = vld [vmem:[%s7871_s2 + $0x30] sm:$0xff] }
   0x3   :  { %4260 = vmatpush1.msra.mxu1 %v53_v1  ;;  %141 = vmatpush1.msra.mxu0 %v53_v1  ;;  %v36_v7 = vld [vmem:[%s7871_s2 + $0x8] sm:$0xff]  ;;  %v35_v8 = vld [vmem:[%s7871_s2] sm:$0xff]  ;;  %v50_v12 = vld [vmem:[%s7871_s2 + $0x78] sm:$0xff] }
   0x4   :  { %4257 = vmatprep.subr.mxu1 %v48_v2  ;;  %142 = vmatprep.subr.mxu0 %v48_v2  ;;  %v4702_v9 = vld [vmem:[%s7872_s1 + $0x20] sm:$0xff]  ;;  %v56_v10 = vld [vmem:[%s7871_s2 + $0xa8] sm:$0xff]  ;;  %v49_v13 = vld [vmem:[%s7871_s2 + $0x70] sm:$0xff] }
   0x5   :  { %4261 = vmatpush1.msra.mxu1 %v47_v4  ;;  %143 = vmatpush1.msra.mxu0 %v47_v4  ;;  %v55_v11 = vld [vmem:[%s7871_s2 + $0xa0] sm:$0xff]  ;;  %v4722_v14 = vld [vmem:[%s7872_s1 + $0x28] sm:$0xff]  ;;  %v38_v18 = vld [vmem:[%s7871_s2 + $0x18] sm:$0xff] }
   0x6   :  { %4258 = vmatprep.subr.mxu1 %v42_v5  ;;  %144 = vmatprep.subr.mxu0 %v42_v5  ;;  %v44_v15 = vld [vmem:[%s7871_s2 + $0x48] sm:$0xff]  ;;  %v4730_v16 = vld [vmem:[%s7872_s1] sm:$0xff]  ;;  %v37_v19 = vld [vmem:[%s7871_s2 + $0x10] sm:$0xff] }
   0x7   :  { %4262 = vmatpush1.msra.mxu1 %v41_v6  ;;  %145 = vmatpush1.msra.mxu0 %v41_v6  ;;  %v43_v17 = vld [vmem:[%s7871_s2 + $0x40] sm:$0xff]  ;;  %v58_v20 = vld [vmem:[%s7871_s2 + $0xb8] sm:$0xff]  ;;  %v4753_v21 = vld [vmem:[%s7872_s1 + $0x30] sm:$0xff] }
   0x8   :  { %4259 = vmatprep.subr.mxu1 %v36_v7  ;;  %146 = vmatprep.subr.mxu0 %v36_v7  ;;  %v4758_v22 = vld [vmem:[%s7873_s4 + $0x170] sm:$0xff]  ;;  %v52_v24 = vld [vmem:[%s7871_s2 + $0x88] sm:$0xff]  ;;  %v51_v26 = vld [vmem:[%s7871_s2 + $0x80] sm:$0xff] }
   0x9   :  { %4263 = vmatpush1.msra.mxu1 %v35_v8  ;;  %147 = vmatpush1.msra.mxu0 %v35_v8  ;;  %v57_v23 = vld [vmem:[%s7871_s2 + $0xb0] sm:$0xff]  ;;  %v4772_v25 = vld [vmem:[%s7872_s1 + $0x8] sm:$0xff]  ;;  %v4781_v27 = vld [vmem:[%s7872_s1 + $0x38] sm:$0xff] }
   0xa   :  { %3302 = vmatmul.mubr.msk.f32.vlgmr.msra.gmra.mxu1 %vm91_vm0, %v4702_v9  ;;  %253 = vmatprep.subr.mxu1 %v56_v10  ;;  %v46_v28 = vld [vmem:[%s7871_s2 + $0x58] sm:$0xff]  ;;  %v45_v29 = vld [vmem:[%s7871_s2 + $0x50] sm:$0xff]  ;;  %v40_v32 = vld [vmem:[%s7871_s2 + $0x28] sm:$0xff] }
   0xb   :  { %254 = vmatpush1.msra.mxu1 %v55_v11  ;;  %210 = vmatprep.mubr.f32.mxu1 %v7888_v3  ;;  %v4798_v31 = vld [vmem:[%s7872_s1 + $0x10] sm:$0xff]  ;;  %v39_v33 = vld [vmem:[%s7871_s2 + $0x20] sm:$0xff]  ;;  %v4812_v34 = vld [vmem:[%s7873_s4 + $0x168] sm:$0xff] }
   0xc   :  { %255 = vmatprep.subr.mxu1 %v50_v12  ;;  %3298 = vmatmul.mubr.msk.f32.vlgmr.msra.gmra.mxu0 %vm91_vm0, %v4730_v16  ;;  %v4818_v35 = vld [vmem:[%s7873_s4 + $0x158] sm:$0xff]  ;;  %v4826_v36 = vld [vmem:[%s7873_s4 + $0x150] sm:$0xff]  ;;  %v4833_v37 = vld [vmem:[%s7873_s4 + $0x140] sm:$0xff] }
   0xd   :  { %256 = vmatpush1.msra.mxu1 %v49_v13  ;;  %186 = vmatprep.mubr.f32.mxu0 %v7888_v3  ;;  %v4838_v38 = vld [vmem:[%s7872_s1 + $0x18] sm:$0xff]  ;;  %v4852_v40 = vld [vmem:[%s7873_s4 + $0x128] sm:$0xff]  ;;  %v4861_v41 = vld [vmem:[%s7873_s4 + $0x120] sm:$0xff] }
   0xe   :  { %3303 = vmatmul.mubr.msk.f32.gmra.mxu1 %vm91_vm0, %v4722_v14  ;;  %257 = vmatprep.subr.mxu1 %v44_v15  ;;  %v4844_v39 = vld [vmem:[%s7873_s4 + $0x138] sm:$0xff]  ;;  %v4868_v42 = vld [vmem:[%s7873_s4 + $0x110] sm:$0xff]  ;;  %v4874_v43 = vld [vmem:[%s7873_s4 + $0x108] sm:$0xff] }
   0xf   :  { %216 = vmatprep.mubr.f32.mxu1 %v7888_v3  ;;  %258 = vmatpush1.msra.mxu1 %v43_v17  ;;  %v4881_v44 = vld [vmem:[%s7873_s4 + $0xf8] sm:$0xff]  ;;  %v4896_v46 = vld [vmem:[%s7873_s4 + $0xf0] sm:$0xff]  ;;  %v4903_v47 = vld [vmem:[%s7873_s4 + $0xe0] sm:$0xff] }
  0x10   :  { %259 = vmatprep.subr.mxu1 %v38_v18  ;;  %366 = vmatprep.subr.mxu0 %v58_v20  ;;  %v4888_v45 = vld [vmem:[%s7873_s4 + $0x178] sm:$0xff]  ;;  %v4916_v49 = vld [vmem:[%s7873_s4 + $0xc8] sm:$0xff]  ;;  %v4922_v50 = vld [vmem:[%s7873_s4 + $0x160] sm:$0xff] }
  0x11   :  { %260 = vmatpush1.msra.mxu1 %v37_v19  ;;  %367 = vmatpush1.msra.mxu0 %v57_v23  ;;  %v4909_v48 = vld [vmem:[%s7873_s4 + $0xd8] sm:$0xff]  ;;  %v4930_v51 = vld [vmem:[%s7873_s4 + $0xc0] sm:$0xff]  ;;  %v4937_v52 = vld [vmem:[%s7873_s4 + $0xb0] sm:$0xff] }
  0x12   :  { %3304 = vmatmul.mubr.msk.f32.gmra.mxu1 %vm91_vm0, %v4753_v21  ;;  %555 = vmatprep.subr.mxu1 %v4758_v22  ;;  %v4943_v53 = vld [vmem:[%s7873_s4 + $0xa8] sm:$0xff]  ;;  %v4950_v54 = vld [vmem:[%s7873_s4 + $0x98] sm:$0xff]  ;;  %v4959_v55 = vld [vmem:[%s7873_s4 + $0x90] sm:$0xff] }
  0x13   :  { %222 = vmatprep.mubr.f32.mxu1 %v7888_v3  ;;  %3299 = vmatmul.mubr.msk.f32.gmra.mxu0 %vm91_vm0, %v4772_v25  ;;  %v4966_v56 = vld [vmem:[%s7873_s4 + $0x80] sm:$0xff]  ;;  %v4972_v57 = vld [vmem:[%s7873_s4 + $0x78] sm:$0xff]  ;;  %v4979_v58 = vld [vmem:[%s7873_s4 + $0x68] sm:$0xff] }
  0x14   :  { %368 = vmatprep.subr.mxu0 %v52_v24  ;;  %192 = vmatprep.mubr.f32.mxu0 %v7888_v3  ;;  %v4986_v59 = vld [vmem:[%s7873_s4 + $0x148] sm:$0xff]  ;;  %v4994_v60 = vld [vmem:[%s7873_s4 + $0x60] sm:$0xff]  ;;  %v5001_v61 = vld [vmem:[%s7873_s4 + $0x50] sm:$0xff] }
  0x15   :  { %369 = vmatpush1.msra.mxu0 %v51_v26  ;;  %4267 = vset.pattern.permute.xlu0 %v7880_v30  ;;  %v5007_v62 = vld [vmem:[%s7873_s4 + $0x48] sm:$0xff]  ;;  %v5014_v63 = vld [vmem:[%s7873_s4 + $0x38] sm:$0xff]  ;;  %v5020_v0 = vld [vmem:[%s7873_s4 + $0x130] sm:$0xff] }
  0x16   :  { %3305 = vmatmul.mubr.msk.f32.gmra.mxu1 %vm91_vm0, %v4781_v27  ;;  %370 = vmatprep.subr.mxu0 %v46_v28  ;;  %v5028_v1 = vld [vmem:[%s7873_s4 + $0x30] sm:$0xff]  ;;  %v5035_v2 = vld [vmem:[%s7873_s4 + $0x20] sm:$0xff]  ;;  %v5041_v4 = vld [vmem:[%s7873_s4 + $0x18] sm:$0xff] }
  0x17   :  { %293 = vmatprep.mubr.f32.mxu1 %v7888_v3  ;;  %3300 = vmatmul.mubr.msk.f32.gmra.mxu0 %vm91_vm0, %v4798_v31  ;;  %v5048_v5 = vld [vmem:[%s7873_s4 + $0x8] sm:$0xff]  ;;  %v5057_v6 = vld [vmem:[%s7873_s4] sm:$0xff]  ;;  %v5064_v7 = vld [vmem:[%s7873_s4 + $0x2f0] sm:$0xff] }
  0x18   :  { %371 = vmatpush1.msra.mxu0 %v45_v29  ;;  %198 = vmatprep.mubr.f32.mxu0 %v7888_v3  ;;  %v5070_v8 = vld [vmem:[%s7873_s4 + $0x2e8] sm:$0xff]  ;;  %v5076_v10 = vld [vmem:[%s7873_s4 + $0x118] sm:$0xff]  ;;  %v5091_v12 = vld [vmem:[%s7873_s4 + $0x2d0] sm:$0xff] }
  0x19   :  { %372 = vmatprep.subr.mxu0 %v40_v32  ;;  %4268 = vset.pattern.permute.xlu1 %v7880_v30  ;;  %v5082_v11 = vld [vmem:[%s7873_s4 + $0x2d8] sm:$0xff]  ;;  %v5096_v13 = vld [vmem:[%s7873_s4 + $0x100] sm:$0xff]  ;;  %v5116_v17 = vld [vmem:[%s7873_s4 + $0x2a8] sm:$0xff] }
  0x1a   :  { %3306 = vmatmul.mubr.msk.f32.vlgmr.msra.gmra.mxu1 %vm91_vm0, %v4730_v16  ;;  %373 = vmatpush1.msra.mxu0 %v39_v33  ;;  %v5102_v15 = vld [vmem:[%s7873_s4 + $0x2c0] sm:$0xff]  ;;  %v5129_v19 = vld [vmem:[%s7873_s4 + $0xe8] sm:$0xff]  ;;  %v5135_v20 = vld [vmem:[%s7873_s4 + $0x290] sm:$0xff] }
  0x1b   :  { %556 = vmatpush1.msra.mxu1 %v4812_v34  ;;  %299 = vmatprep.mubr.f32.mxu1 %v7888_v3  ;;  %v5123_v18 = vld [vmem:[%s7873_s4 + $0x2a0] sm:$0xff]  ;;  %8079 = vst [vmem:[#allocation3_spill] sm:$0xff] %v5135_v20  ;;  %v5142_v23 = vld [vmem:[%s7873_s4 + $0x288] sm:$0xff]  ;;  %v5149_v24 = vld [vmem:[%s7873_s4 + $0xd0] sm:$0xff] }
  0x1c   :  { %557 = vmatprep.subr.mxu1 %v4818_v35  ;;  %3301 = vmatmul.mubr.msk.f32.gmra.mxu0 %vm91_vm0, %v4838_v38  ;;  %8078 = vst [vmem:[#allocation2_spill] sm:$0xff] %v5123_v18  ;;  %8080 = vst [vmem:[#allocation4_spill] sm:$0xff] %v5142_v23  ;;  %v5162_v26 = vld [vmem:[%s7873_s4 + $0x270] sm:$0xff]  ;;  %v5169_v28 = vld [vmem:[%s7873_s4 + $0x260] sm:$0xff] }
  0x1d   :  { %558 = vmatpush1.msra.mxu1 %v4826_v36  ;;  %406 = vmatprep.mubr.f32.mxu0 %v7888_v3  ;;  %8082 = vst [vmem:[#allocation6_spill] sm:$0xff] %v5162_v26  ;;  %8083 = vst [vmem:[#allocation7_spill] sm:$0xff] %v5169_v28  ;;  %v5176_v29 = vld [vmem:[%s7873_s4 + $0x258] sm:$0xff]  ;;  %v5188_v32 = vld [vmem:[%s7873_s4 + $0x248] sm:$0xff] }
  0x1e   :  { %559 = vmatprep.subr.mxu1 %v4833_v37  ;;  %3307 = vmatmul.mubr.msk.f32.gmra.mxu1 %vm91_vm0, %v4772_v25  ;;  %8084 = vst [vmem:[#allocation8_spill] sm:$0xff] %v5176_v29  ;;  %8085 = vst [vmem:[#allocation9_spill] sm:$0xff] %v5188_v32  ;;  %v5195_v33 = vld [vmem:[%s7873_s4 + $0x240] sm:$0xff]  ;;  %v5209_v30 = vld [vmem:[%s7873_s4 + $0x230] sm:$0xff] }
  0x1f   :  { %560 = vmatpush1.msra.mxu1 %v4844_v39  ;;  %305 = vmatprep.mubr.f32.mxu1 %v7888_v3  ;;  %8086 = vst [vmem:[#allocation10_spill] sm:$0xff] %v5195_v33  ;;  %8087 = vst [vmem:[#allocation11_spill] sm:$0xff] %v5209_v30 }
  0x20   :  { %561 = vmatprep.subr.mxu1 %v4852_v40  ;;  %3696 = vmatprep.subr.mxu0 %v7888_v3 }
  0x21   :  { %562 = vmatpush1.msra.mxu1 %v4861_v41  ;;  %3314 = vmatmul.mubr.msk.f32.vlgmr.msra.gmra.mxu0 %vm91_vm0, %v4730_v16  ;;  %v5109_v16 = vld [vmem:[%s7873_s4 + $0x2b8] sm:$0xff] }
  0x22   :  { %563 = vmatprep.subr.mxu1 %v4868_v42  ;;  %3308 = vmatmul.mubr.msk.f32.gmra.mxu1 %vm91_vm0, %v4798_v31 }
  0x23   :  { %564 = vmatpush1.msra.mxu1 %v4874_v43  ;;  %311 = vmatprep.mubr.f32.mxu1 %v7888_v3 }
  0x24   :  { %565 = vmatprep.subr.mxu1 %v4881_v44  ;;  %3697 = vmatpush3.msra.mxu0 %v4888_v45 }
  0x25   :  { %566 = vmatpush1.msra.mxu1 %v4896_v46  ;;  %3698 = vmatprep.subr.mxu0 %v7888_v3 }
  0x26   :  { %567 = vmatprep.subr.mxu1 %v4903_v47  ;;  %3309 = vmatmul.mubr.msk.f32.gmra.mxu1 %vm91_vm0, %v4838_v38 }
  0x27   :  { %568 = vmatpush1.msra.mxu1 %v4909_v48  ;;  %317 = vmatprep.mubr.f32.mxu1 %v7888_v3 }
  0x28   :  { %569 = vmatprep.subr.mxu1 %v4916_v49  ;;  %3699 = vmatpush3.msra.mxu0 %v4922_v50 }
  0x29   :  { %570 = vmatpush1.msra.mxu1 %v4930_v51  ;;  %412 = vmatprep.mubr.f32.mxu0 %v7888_v3 }
  0x2a   :  { %571 = vmatprep.subr.mxu1 %v4937_v52  ;;  %3310 = vmatmul.mubr.msk.f32.gmra.mxu1 %vm91_vm0, %v4702_v9 }
  0x2b   :  { %572 = vmatpush1.msra.mxu1 %v4943_v53  ;;  %323 = vmatprep.mubr.f32.mxu1 %v7888_v3 }
  0x2c   :  { %573 = vmatprep.subr.mxu1 %v4950_v54  ;;  %3700 = vmatprep.subr.mxu0 %v7888_v3 }
  0x2d   :  { %574 = vmatpush1.msra.mxu1 %v4959_v55  ;;  %3315 = vmatmul.mubr.msk.f32.gmra.mxu0 %vm91_vm0, %v4772_v25  ;;  %v5155_v25 = vld [vmem:[%s7873_s4 + $0x278] sm:$0xff] }
  0x2e   :  { %575 = vmatprep.subr.mxu1 %v4966_v56  ;;  %3311 = vmatmul.mubr.msk.f32.gmra.mxu1 %vm91_vm0, %v4722_v14  ;;  %8081 = vst [vmem:[#allocation5_spill] sm:$0xff] %v5155_v25 }
  0x2f   :  { %576 = vmatpush1.msra.mxu1 %v4972_v57  ;;  %329 = vmatprep.mubr.f32.mxu1 %v7888_v3 }
  0x30   :  { %577 = vmatprep.subr.mxu1 %v4979_v58  ;;  %3701 = vmatpush3.msra.mxu0 %v4986_v59 }
  0x31   :  { %578 = vmatpush1.msra.mxu1 %v4994_v60  ;;  %3702 = vmatprep.subr.mxu0 %v7888_v3 }
  0x32   :  { %579 = vmatprep.subr.mxu1 %v5001_v61  ;;  %3312 = vmatmul.mubr.msk.f32.gmra.mxu1 %vm91_vm0, %v4753_v21 }
  0x33   :  { %580 = vmatpush1.msra.mxu1 %v5007_v62  ;;  %335 = vmatprep.mubr.f32.mxu1 %v7888_v3 }
  0x34   :  { %581 = vmatprep.subr.mxu1 %v5014_v63  ;;  %3703 = vmatpush3.msra.mxu0 %v5020_v0 }
  0x35   :  { %582 = vmatpush1.msra.mxu1 %v5028_v1  ;;  %418 = vmatprep.mubr.f32.mxu0 %v7888_v3 }
  0x36   :  { %583 = vmatprep.subr.mxu1 %v5035_v2  ;;  %3313 = vmatmul.mubr.msk.f32.gmra.mxu1 %vm91_vm0, %v4781_v27 }
  0x37   :  { %584 = vmatpush1.msra.mxu1 %v5041_v4  ;;  %619 = vmatprep.mubr.f32.mxu1 %v7888_v3 }
  0x38   :  { %585 = vmatprep.subr.mxu1 %v5048_v5  ;;  %3704 = vmatprep.subr.mxu0 %v7888_v3 }
  0x39   :  { %586 = vmatpush1.msra.mxu1 %v5057_v6  ;;  %3316 = vmatmul.mubr.msk.f32.gmra.mxu0 %vm91_vm0, %v4798_v31  ;;  %v5182_v31 = vld [vmem:[%s7873_s4 + $0xb8] sm:$0xff] }
  0x3a   :  { %731 = vmatprep.subr.mxu1 %v5064_v7  ;;  %620 = vmatmul.mubr.f32.vlgmr.msra.gmra.mxu1 %v7888_v3 }
  0x3b   :  { %732 = vmatpush1.msra.mxu1 %v5070_v8  ;;  %3705 = vmatpush3.msra.mxu0 %v5076_v10 }
  0x3c   :  { %733 = vmatprep.subr.mxu1 %v5082_v11  ;;  %3706 = vmatprep.subr.mxu0 %v7888_v3 }
  0x3d   :  { %734 = vmatpush1.msra.mxu1 %v5091_v12  ;;  %3707 = vmatpush3.msra.mxu0 %v5096_v13 }
  0x3e   :  { %735 = vmatprep.subr.mxu1 %v5102_v15  ;;  %424 = vmatprep.mubr.f32.mxu0 %v7888_v3 }
  0x3f   :  { %736 = vmatpush1.msra.mxu1 %v5109_v16  ;;  %3708 = vmatprep.subr.mxu0 %v7888_v3 }
  0x40   :  { %737 = vmatprep.subr.mxu1 %v5116_v17  ;;  %3317 = vmatmul.mubr.msk.f32.gmra.mxu0 %vm91_vm0, %v4838_v38  ;;  %v5202_v38 = vld [vmem:[%s7873_s4 + $0xa0] sm:$0xff] }
  0x41   :  { %738 = vmatpush1.msra.mxu1 %v5123_v18  ;;  %3709 = vmatpush3.msra.mxu0 %v5129_v19 }
  0x42   :  { %739 = vmatprep.subr.mxu1 %v5135_v20  ;;  %3710 = vmatprep.subr.mxu0 %v7888_v3  ;;  %v5395_v20 = vld [vmem:[%s7873_s4 + $0x2b0] sm:$0xff] }
  0x43   :  { %740 = vmatpush1.msra.mxu1 %v5142_v23  ;;  %3711 = vmatpush3.msra.mxu0 %v5149_v24  ;;  %v5349_v23 = vld [vmem:[%s7873_s4 + $0x10] sm:$0xff] }
  0x44   :  { %741 = vmatprep.subr.mxu1 %v5155_v25  ;;  %430 = vmatprep.mubr.f32.mxu0 %v7888_v3  ;;  %v5341_v25 = vld [vmem:[%s7874_s0] sm:$0xff] }
  0x45   :  { %742 = vmatpush1.msra.mxu1 %v5162_v26  ;;  %3712 = vmatprep.subr.mxu0 %v7888_v3  ;;  %v5303_v26 = vld [vmem:[%s7873_s4 + $0x40] sm:$0xff]  ;;  %vm724_vm1 = vcmp.gt.s32.totalorder %v5341_v25, 0  ;;  %vm900_vm3 = vcmp.gt.s32.totalorder %v5341_v25, 7  ;;  %vm1419_vm4 = vcmp.gt.s32.totalorder %v5341_v25, 2  ;;  %vm1765_vm5 = vcmp.gt.s32.totalorder %v5341_v25, 3 }
  0x46   :  { %743 = vmatprep.subr.mxu1 %v5169_v28  ;;  %3318 = vmatmul.mubr.msk.f32.gmra.mxu0 %vm91_vm0, %v4702_v9  ;;  %v5216_v9 = vld [vmem:[%s7873_s4 + $0x228] sm:$0xff]  ;;  %v5250_v28 = vld [vmem:[%s7873_s4 + $0x1f8] sm:$0xff]  ;;  %vm1073_vm6 = vcmp.gt.s32.totalorder %v5341_v25, 1  ;;  %vm1244_vm7 = vcmp.gt.s32.totalorder %v5341_v25, 6  ;;  %vm1590_vm8 = vcmp.gt.s32.totalorder %v5341_v25, 5  ;;  %vm1936_vm9 = vcmp.gt.s32.totalorder %v5341_v25, 4 }
  0x47   :  { %744 = vmatpush1.msra.mxu1 %v5176_v29  ;;  %3713 = vmatpush3.msra.mxu0 %v5182_v31  ;;  %8088 = vst [vmem:[#allocation12_spill] sm:$0xff] %v5216_v9  ;;  %v5223_v29 = vld [vmem:[%s7873_s4 + $0x218] sm:$0xff]  ;;  %8092 = vst [vmem:[#allocation16_spill] sm:$0xff] %v5250_v28 }
  0x48   :  { %745 = vmatprep.subr.mxu1 %v5188_v32  ;;  %3714 = vmatprep.subr.mxu0 %v7888_v3  ;;  %8089 = vst [vmem:[#allocation13_spill] sm:$0xff] %v5223_v29  ;;  %v5230_v32 = vld [vmem:[%s7873_s4 + $0x210] sm:$0xff] }
  0x49   :  { %746 = vmatpush1.msra.mxu1 %v5195_v33  ;;  %3715 = vmatpush3.msra.mxu0 %v5202_v38  ;;  %8090 = vst [vmem:[#allocation14_spill] sm:$0xff] %v5230_v32  ;;  %v5235_v33 = vld [vmem:[%s7873_s4 + $0x88] sm:$0xff] }
  0x4a   :  { %747 = vmatprep.subr.mxu1 %v5209_v30  ;;  %436 = vmatprep.mubr.f32.mxu0 %v7888_v3  ;;  %v5242_v30 = vld [vmem:[%s7873_s4 + $0x200] sm:$0xff] }
  0x4b   :  { %748 = vmatpush1.msra.mxu1 %v5216_v9  ;;  %3716 = vmatprep.subr.mxu0 %v7888_v3  ;;  %8091 = vst [vmem:[#allocation15_spill] sm:$0xff] %v5242_v30  ;;  %v5255_v9 = vld [vmem:[%s7873_s4 + $0x70] sm:$0xff]  ;;  %v5262_v3 = vld [vmem:[%s7873_s4 + $0x1e8] sm:$0xff] }
  0x4c   :  { %749 = vmatprep.subr.mxu1 %v5223_v29  ;;  %3319 = vmatmul.mubr.msk.f32.gmra.mxu0 %vm91_vm0, %v4722_v14  ;;  %8093 = vst [vmem:[#allocation17_spill] sm:$0xff] %v5262_v3  ;;  %v8094_v14 = vmov 0.0   ;;  %v5269_v29 = vld [vmem:[%s7873_s4 + $0x1e0] sm:$0xff] }
  0x4d   :  { %750 = vmatpush1.msra.mxu1 %v5230_v32  ;;  %3717 = vmatpush3.msra.mxu0 %v5235_v33  ;;  %8095 = vst [vmem:[#allocation18_spill] sm:$0xff] %v5269_v29  ;;  %v5276_v32 = vld [vmem:[%s7873_s4 + $0x1d0] sm:$0xff] }
  0x4e   :  { %751 = vmatprep.subr.mxu1 %v5242_v30  ;;  %3718 = vmatprep.subr.mxu0 %v8094_v14  ;;  %8096 = vst [vmem:[#allocation19_spill] sm:$0xff] %v5276_v32  ;;  %v5283_v30 = vld [vmem:[%s7873_s4 + $0x58] sm:$0xff] }
  0x4f   :  { %752 = vmatpush1.msra.mxu1 %v5250_v28  ;;  %3719 = vmatpush3.msra.mxu0 %v5255_v9  ;;  %v5288_v28 = vld [vmem:[%s7873_s4 + $0x1c8] sm:$0xff] }
  0x50   :  { %753 = vmatprep.subr.mxu1 %v5262_v3  ;;  %442 = vmatprep.mubr.f32.mxu0 %v8094_v14  ;;  %8097 = vst [vmem:[#allocation20_spill] sm:$0xff] %v5288_v28  ;;  %v5295_v3 = vld [vmem:[%s7873_s4 + $0x1b8] sm:$0xff] }
  0x51   :  { %3720 = vmatprep.subr.mxu0 %v8094_v14  ;;  %754 = vmatpush1.msra.mxu1 %v5269_v29  ;;  %8098 = vst [vmem:[#allocation21_spill] sm:$0xff] %v5295_v3  ;;  %v5310_v29 = vld [vmem:[%s7873_s4 + $0x1b0] sm:$0xff] }
  0x52   :  { %3320 = vmatmul.mubr.msk.f32.gmra.mxu0 %vm91_vm0, %v4753_v21  ;;  %755 = vmatprep.subr.mxu1 %v5276_v32  ;;  %8099 = vst [vmem:[#allocation22_spill] sm:$0xff] %v5310_v29  ;;  %v5317_v21 = vld [vmem:[%s7873_s4 + $0x1a0] sm:$0xff]  ;;  %v5329_v32 = vld [vmem:[%s7873_s4 + $0x198] sm:$0xff] }
  0x53   :  { %3721 = vmatpush3.msra.mxu0 %v5283_v30  ;;  %756 = vmatpush1.msra.mxu1 %v5288_v28  ;;  %8100 = vst [vmem:[#allocation23_spill] sm:$0xff] %v5317_v21  ;;  %v5324_v28 = vld [vmem:[%s7873_s4 + $0x28] sm:$0xff]  ;;  %8101 = vst [vmem:[#allocation24_spill] sm:$0xff] %v5329_v32 }
  0x54   :  { %3722 = vmatprep.subr.mxu0 %v8094_v14  ;;  %757 = vmatprep.subr.mxu1 %v5295_v3  ;;  %v5336_v3 = vld [vmem:[%s7873_s4 + $0x188] sm:$0xff] }
  0x55   :  { %3723 = vmatpush3.msra.mxu0 %v5303_v26  ;;  %448 = vmatprep.mubr.f32.mxu0 %v8094_v14  ;;  %8102 = vst [vmem:[#allocation25_spill] sm:$0xff] %v5336_v3 }
  0x56   :  { %3724 = vmatprep.subr.mxu0 %v8094_v14  ;;  %758 = vmatpush1.msra.mxu1 %v5310_v29  ;;  %v5356_v29 = vld [vmem:[%s7873_s4 + $0x180] sm:$0xff] }
  0x57   :  { %3321 = vmatmul.mubr.msk.f32.gmra.mxu0 %vm91_vm0, %v4781_v27  ;;  %759 = vmatprep.subr.mxu1 %v5317_v21  ;;  %8103 = vst [vmem:[#allocation26_spill] sm:$0xff] %v5356_v29  ;;  %v5367_v27 = vld [vmem:[%s7873_s4 + $0x2f8] sm:$0xff] }
  0x58   :  { %3725 = vmatpush3.msra.mxu0 %v5324_v28  ;;  %760 = vmatpush1.msra.mxu1 %v5329_v32  ;;  %v8104_v32 = vmov 0  }
  0x59   :  { %3726 = vmatprep.subr.mxu0 %v8094_v14  ;;  %761 = vmatprep.subr.mxu1 %v5336_v3  ;;  %v5376_v3 = vld [vmem:[%s7873_s4 + $0x2e0] sm:$0xff]  ;;  %v725_v21 = vsel %vm724_vm1, 1, %v8104_v32  ;;  %v901_v18 = vsel %vm900_vm3, 1, %v8104_v32 }
  0x5a   :  { %3727 = vmatpush3.msra.mxu0 %v5349_v23  ;;  %3728 = vmatprep.mubr.msk.f32.mxu0 %vm4627_vm2, %v8094_v14 }
  0x5b   :  { %762 = vmatpush1.msra.mxu1 %v5356_v29  ;;  %795 = vmatprep.mubr.f32.mxu1 %v8094_v14  ;;  %v5386_v29 = vld [vmem:[%s7873_s4 + $0x2c8] sm:$0xff] }
  0x5c   :  { %3731 = vmatprep.subr.mxu0 %v8094_v14  ;;  %3729 = vmatmul.mubr.f32.vlgmr.msra.gmra.mxu0 %v8094_v14 }
  0x5d   :  { %796 = vmatmul.mubr.f32.vlgmr.msra.gmra.mxu1 %v8094_v14  ;;  %3732 = vmatpush3.msra.mxu0 %v5367_v27 }
  0x5e   :  { %3733 = vmatprep.subr.mxu0 %v8094_v14  ;;  %3763 = vmatprep.mubr.msk.f32.mxu0 %vm4627_vm2, %v8094_v14 }
  0x5f   :  { %3734 = vmatpush3.msra.mxu0 %v5376_v3  ;;  %727 = vperm.xlu0 %4267, %v725_v21   ;;  %v5406_v21 = vld [vmem:[%s7873_s4 + $0x298] sm:$0xff] }
  0x60   :  { %3735 = vmatprep.subr.mxu0 %v8094_v14  ;;  %910 = vmatprep.subr.mxu1 %v4758_v22  ;;  %v5414_v22 = vld [vmem:[%s7873_s4 + $0x280] sm:$0xff] }
  0x61   :  { %3736 = vmatpush3.msra.mxu0 %v5386_v29  ;;  %911 = vmatpush1.msra.mxu1 %v4812_v34  ;;  %v1420_v34 = vsel %vm1419_vm4, 1, %v8104_v32 }
  0x62   :  { %3737 = vmatprep.subr.mxu0 %v8094_v14  ;;  %912 = vmatprep.subr.mxu1 %v4818_v35  ;;  %v5425_v35 = vld [vmem:[%s7873_s4 + $0x268] sm:$0xff] }
  0x63   :  { %3738 = vmatpush3.msra.mxu0 %v5395_v20  ;;  %903 = vperm.xlu0 %4267, %v901_v18  }
  0x64   :  { %3739 = vmatprep.subr.mxu0 %v8094_v14  ;;  %913 = vmatpush1.msra.mxu1 %v4826_v36  ;;  %v5433_v36 = vld [vmem:[%s7873_s4 + $0x250] sm:$0xff] }
  0x65   :  { %3740 = vmatpush3.msra.mxu0 %v5406_v21  ;;  %914 = vmatprep.subr.mxu1 %v4833_v37  ;;  %v1766_v37 = vsel %vm1765_vm5, 1, %v8104_v32 }
  0x66   :  { %3741 = vmatprep.subr.mxu0 %v8094_v14  ;;  %915 = vmatpush1.msra.mxu1 %v4844_v39  ;;  %v5443_v39 = vld [vmem:[%s7873_s4 + $0x238] sm:$0xff] }
  0x67   :  { %3742 = vmatpush3.msra.mxu0 %v5414_v22  ;;  %1422 = vperm.xlu0 %4267, %v1420_v34  }
  0x68   :  { %3743 = vmatprep.subr.mxu0 %v8094_v14  ;;  %916 = vmatprep.subr.mxu1 %v4852_v40  ;;  %v5451_v40 = vld [vmem:[%s7873_s4 + $0x220] sm:$0xff] }
  0x69   :  { %3744 = vmatpush3.msra.mxu0 %v5425_v35  ;;  %917 = vmatpush1.msra.mxu1 %v4861_v41  ;;  %v5460_v41 = vld [vmem:[%s7873_s4 + $0x208] sm:$0xff] }
  0x6a   :  { %3745 = vmatprep.subr.mxu0 %v8094_v14  ;;  %918 = vmatprep.subr.mxu1 %v4868_v42  ;;  %v5469_v42 = vld [vmem:[%s7873_s4 + $0x1f0] sm:$0xff] }
  0x6b   :  { %3746 = vmatpush3.msra.mxu0 %v5433_v36  ;;  %1768 = vperm.xlu0 %4267, %v1766_v37   ;;  %v1074_v37 = vsel %vm1073_vm6, 1, %v8104_v32 }
  0x6c   :  { %3747 = vmatprep.subr.mxu0 %v8094_v14  ;;  %919 = vmatpush1.msra.mxu1 %v4874_v43  ;;  %v5478_v43 = vld [vmem:[%s7873_s4 + $0x1d8] sm:$0xff] }
  0x6d   :  { %3748 = vmatpush3.msra.mxu0 %v5443_v39  ;;  %920 = vmatprep.subr.mxu1 %v4881_v44  ;;  %v5487_v44 = vld [vmem:[%s7873_s4 + $0x1c0] sm:$0xff] }
  0x6e   :  { %3749 = vmatprep.subr.mxu0 %v8094_v14  ;;  %921 = vmatpush1.msra.mxu1 %v4896_v46  ;;  %v5496_v46 = vld [vmem:[%s7873_s4 + $0x1a8] sm:$0xff] }
  0x6f   :  { %3750 = vmatpush3.msra.mxu0 %v5451_v40  ;;  %922 = vmatprep.subr.mxu1 %v4903_v47  ;;  %v5505_v47 = vld [vmem:[%s7873_s4 + $0x190] sm:$0xff] }
  0x70   :  { %3751 = vmatprep.subr.mxu0 %v8094_v14  ;;  %923 = vmatpush1.msra.mxu1 %v4909_v48 }
  0x71   :  { %3752 = vmatpush3.msra.mxu0 %v5460_v41  ;;  %924 = vmatprep.subr.mxu1 %v4916_v49 }
  0x72   :  { %3753 = vmatprep.subr.mxu0 %v8094_v14  ;;  %925 = vmatpush1.msra.mxu1 %v4930_v51 }
  0x73   :  { %3754 = vmatpush3.msra.mxu0 %v5469_v42  ;;  %926 = vmatprep.subr.mxu1 %v4937_v52 }
  0x74   :  { %3755 = vmatprep.subr.mxu0 %v8094_v14  ;;  %927 = vmatpush1.msra.mxu1 %v4943_v53 }
  0x75   :  { %3756 = vmatpush3.msra.mxu0 %v5478_v43  ;;  %928 = vmatprep.subr.mxu1 %v4950_v54 }
  0x76   :  { %3757 = vmatprep.subr.mxu0 %v8094_v14  ;;  %929 = vmatpush1.msra.mxu1 %v4959_v55 }
  0x77   :  { %3758 = vmatpush3.msra.mxu0 %v5487_v44  ;;  %930 = vmatprep.subr.mxu1 %v4966_v56 }
  0x78   :  { %3759 = vmatprep.subr.mxu0 %v8094_v14  ;;  %931 = vmatpush1.msra.mxu1 %v4972_v57 }
  0x79   :  { %3760 = vmatpush3.msra.mxu0 %v5496_v46  ;;  %932 = vmatprep.subr.mxu1 %v4979_v58 }
  0x7a   :  { %3761 = vmatprep.subr.mxu0 %v8094_v14  ;;  %933 = vmatpush1.msra.mxu1 %v4994_v60 }
  0x7b   :  { %3762 = vmatpush3.msra.mxu0 %v5505_v47  ;;  %934 = vmatprep.subr.mxu1 %v5001_v61 }
  0x7c   :  { %3764 = vmatmul.mubr.f32.vlgmr.msra.gmra.mxu0 %v8094_v14  ;;  %3766 = vmatprep.subr.mxu0 %v8094_v14 }
  0x7d   :  { %3767 = vmatpush3.msra.mxu0 %v4888_v45  ;;  %935 = vmatpush1.msra.mxu1 %v5007_v62  ;;  %v61_v45 = vlaneseq }
  0x7e   :  { %3768 = vmatprep.subr.mxu0 %v8094_v14  ;;  %936 = vmatprep.subr.mxu1 %v5014_v63 }
  0x7f   :  { %3769 = vmatpush3.msra.mxu0 %v4922_v50  ;;  %937 = vmatpush1.msra.mxu1 %v5028_v1  ;;  %v62_v48 = vshrl.u32 %v61_v45, 7  ;;  %v59_v50 = vld [vmem:[%s7875_s3] sm:$0x3f] }
  0x80   :  { %3770 = vmatprep.subr.mxu0 %v8094_v14  ;;  %938 = vmatprep.subr.mxu1 %v5035_v2 }
  0x81   :  { %3771 = vmatpush3.msra.mxu0 %v4986_v59  ;;  %939 = vmatpush1.msra.mxu1 %v5041_v4  ;;  %v63_v49 = vsub.s32 0, %v62_v48  ;;  %v67_v51 = vsub.s32 1, %v62_v48 }
  0x82   :  { %3772 = vmatprep.subr.mxu0 %v8094_v14  ;;  %940 = vmatprep.subr.mxu1 %v5048_v5 }
  0x83   :  { %3773 = vmatpush3.msra.mxu0 %v5020_v0  ;;  %941 = vmatpush1.msra.mxu1 %v5057_v6  ;;  %v5562_v52 = vrot.slane %v59_v50, %v63_v49  ;;  %v5564_v53 = vrot.slane %v59_v50, %v67_v51 }
  0x84   :  { %3774 = vmatprep.subr.mxu0 %v8094_v14  ;;  %974 = vmatprep.mubr.f32.mxu1 %v8094_v14 }
  0x85   :  { %3775 = vmatpush3.msra.mxu0 %v5076_v10  ;;  %3798 = vmatprep.mubr.msk.f32.mxu0 %vm4627_vm2, %v8094_v14 }
  0x86   :  { %3776 = vmatprep.subr.mxu0 %v8094_v14  ;;  %1081 = vmatprep.subr.mxu1 %v5064_v7  ;;  %v75_v7 = vsub.s32 3, %v62_v48 }
  0x87   :  { %3777 = vmatpush3.msra.mxu0 %v5096_v13  ;;  %1076 = vperm.xlu1 %4268, %v1074_v37  }
  0x88   :  { %3778 = vmatprep.subr.mxu0 %v8094_v14 }
  0x89   :  { %3779 = vmatpush3.msra.mxu0 %v5129_v19 }
  0x8a   :  { %3780 = vmatprep.subr.mxu0 %v8094_v14 }
  0x8b   :  { %3781 = vmatpush3.msra.mxu0 %v5149_v24 }
  0x8c   :  { %3782 = vmatprep.subr.mxu0 %v8094_v14 }
  0x8d   :  { %3783 = vmatpush3.msra.mxu0 %v5182_v31 }
  0x8e   :  { %3784 = vmatprep.subr.mxu0 %v8094_v14 }
  0x8f   :  { %3785 = vmatpush3.msra.mxu0 %v5202_v38 }
  0x90   :  { %3786 = vmatprep.subr.mxu0 %v8094_v14 }
  0x91   :  { %3787 = vmatpush3.msra.mxu0 %v5235_v33 }
  0x92   :  { %3788 = vmatprep.subr.mxu0 %v8094_v14 }
  0x93   :  { %3789 = vmatpush3.msra.mxu0 %v5255_v9 }
  0x94   :  { %3790 = vmatprep.subr.mxu0 %v8094_v14 }
  0x95   :  { %3791 = vmatpush3.msra.mxu0 %v5283_v30 }
  0x96   :  { %3792 = vmatprep.subr.mxu0 %v8094_v14 }
  0x97   :  { %3793 = vmatpush3.msra.mxu0 %v5303_v26 }
  0x98   :  { %3794 = vmatprep.subr.mxu0 %v8094_v14 }
  0x99   :  { %3795 = vmatpush3.msra.mxu0 %v5324_v28 }
  0x9a   :  { %3796 = vmatprep.subr.mxu0 %v8094_v14 }
  0x9b   :  { %3797 = vmatpush3.msra.mxu0 %v5349_v23 }
  0x9c   :  { %3801 = vmatprep.subr.mxu0 %v8094_v14 }
  0xca   :  { %v206_v54 = vpop.f32.mrf.mxu1 }
  0xcb   :  { %v5567_v55 = vadd.f32 %v206_v54, %v5562_v52  ;;  %v71_v54 = vsub.s32 2, %v62_v48 }
  0xcc   :  { %v208_v56 = vpop.f32.mrf.mxu1  ;;  %v5569_v57 = vpop.f32.mrf.mxu0 }
  0xcd   :  { %8105 = vst [vmem:[#allocation27_spill] sm:$0xff] %v5567_v55  ;;  %v5572_v58 = vadd.f32 %v208_v56, %v5564_v53  ;;  %v5606_v56 = vrot.slane %v59_v50, %v75_v7  ;;  %v5615_v37 = vrot.slane %v59_v50, %v71_v54 }
  0xce   :  { %v212_v59 = vpop.f32.mrf.mxu1  ;;  %v5577_v61 = vpop.f32.mrf.mxu0 }
  0xcf   :  { %8106 = vst [vmem:[#allocation28_spill] sm:$0xff] %v5572_v58  ;;  %v5575_v60 = vadd.f32 %v212_v59, %v5562_v52 }
  0xd0   :  { %v214_v62 = vpop.f32.mrf.mxu1 }
  0xd1   :  { %8107 = vst [vmem:[#allocation29_spill] sm:$0xff] %v5575_v60  ;;  %v5580_v63 = vadd.f32 %v214_v62, %v5564_v53  ;;  %v1245_v62 = vsel %vm1244_vm7, 1, %v8104_v32 }
  0xd2   :  { %v218_v0 = vpop.f32.mrf.mxu1  ;;  %1247 = vperm.xlu1 %4268, %v1245_v62  }
  0xd3   :  { %8108 = vst [vmem:[#allocation30_spill] sm:$0xff] %v5580_v63  ;;  %v5583_v1 = vadd.f32 %v218_v0, %v5562_v52  ;;  %v188_v2 = vpop.f32.mrf.mxu0 }
  0xd4   :  { %v220_v4 = vpop.f32.mrf.mxu1  ;;  %v5586_v5 = vadd.f32 %v188_v2, %v5562_v52 }
  0xd5   :  { %8109 = vst [vmem:[#allocation31_spill] sm:$0xff] %v5583_v1  ;;  %v5589_v6 = vadd.f32 %v220_v4, %v5564_v53  ;;  %v190_v10 = vpop.f32.mrf.mxu0  ;;  %v79_v4 = vsub.s32 4, %v62_v48 }
  0xd6   :  { %v224_v13 = vpop.f32.mrf.mxu1  ;;  %v5592_v18 = vadd.f32 %v190_v10, %v5564_v53 }
  0xd7   :  { %8110 = vst [vmem:[#allocation32_spill] sm:$0xff] %v5589_v6  ;;  %v5597_v19 = vadd.f32 %v224_v13, %v5562_v52  ;;  %v194_v34 = vpop.f32.mrf.mxu0  ;;  %v5624_v6 = vrot.slane %v59_v50, %v79_v4 }
  0xd8   :  { %v226_v45 = vpop.f32.mrf.mxu1  ;;  %v5601_v49 = vadd.f32 %v194_v34, %v5562_v52  ;;  %v83_v34 = vsub.s32 5, %v62_v48 }
  0xd9   :  { %8111 = vst [vmem:[#allocation33_spill] sm:$0xff] %v5597_v19  ;;  %v5604_v51 = vadd.f32 %v226_v45, %v5564_v53  ;;  %v196_v59 = vpop.f32.mrf.mxu0 }
  0xda   :  { %8112 = vst [vmem:[#allocation34_spill] sm:$0xff] %v5601_v49  ;;  %v5609_v0 = vpop.f32.mrf.mxu1  ;;  %v5612_v2 = vadd.f32 %v196_v59, %v5564_v53  ;;  %v5633_v62 = vrot.slane %v59_v50, %v83_v34 }
  0xdb   :  { %8113 = vst [vmem:[#allocation35_spill] sm:$0xff] %v5604_v51  ;;  %v1591_v51 = vsel %vm1590_vm8, 1, %v8104_v32 }
  0xdc   :  { %8114 = vst [vmem:[#allocation36_spill] sm:$0xff] %v5612_v2  ;;  %v297_v10 = vpop.f32.mrf.mxu1  ;;  %v200_v13 = vpop.f32.mrf.mxu0  ;;  %1593 = vperm.xlu1 %4268, %v1591_v51  }
  0xdd   :  { %v5618_v7 = vadd.f32 %v297_v10, %v5606_v56  ;;  %v5621_v45 = vadd.f32 %v200_v13, %v5562_v52 }
  0xde   :  { %v301_v19 = vpop.f32.mrf.mxu1  ;;  %v202_v59 = vpop.f32.mrf.mxu0 }
  0xdf   :  { %8115 = vst [vmem:[#allocation37_spill] sm:$0xff] %v5618_v7  ;;  %8116 = vst [vmem:[#allocation38_spill] sm:$0xff] %v5621_v45  ;;  %v5628_v1 = vadd.f32 %v301_v19, %v5615_v37  ;;  %v5631_v48 = vadd.f32 %v202_v59, %v5564_v53  ;;  %v1937_v7 = vsel %vm1936_vm9, 1, %v8104_v32 }
  0xe0   :  { %v303_v54 = vpop.f32.mrf.mxu1  ;;  %1939 = vperm.xlu1 %4268, %v1937_v7  }
  0xe1   :  { %8117 = vst [vmem:[#allocation39_spill] sm:$0xff] %v5631_v48  ;;  %v5636_v10 = vadd.f32 %v303_v54, %v5606_v56  ;;  %v408_v13 = vpop.f32.mrf.mxu0  ;;  %v296_v48 = vadd.f32 %v5609_v0, %v5615_v37  ;;  %v5730_v0 = vpop.permute.xlu0 %727 }
  0xe2   :  { %v307_v4 = vpop.f32.mrf.mxu1  ;;  %v5640_v63 = vadd.f32 %v408_v13, %v5624_v6  ;;  %8142 = vst [vmem:[#allocation64_spill] sm:$0xff] %v5730_v0  ;;  %vm729_vm10 = vcmp.eq.s32.totalorder %v5730_v0, 1  ;;  %v6018_v0 = vld [vmem:[%s7873_s4 + $0x78] sm:$0xff] }
  0xe3   :  { %8118 = vst [vmem:[#allocation40_spill] sm:$0xff] %v5636_v10  ;;  %v5643_v25 = vadd.f32 %v307_v4, %v5615_v37  ;;  %v410_v19 = vpop.f32.mrf.mxu0 }
  0xe4   :  { %8119 = vst [vmem:[#allocation41_spill] sm:$0xff] %v5640_v63  ;;  %v309_v59 = vpop.f32.mrf.mxu1  ;;  %v5646_v60 = vadd.f32 %v410_v19, %v5633_v62 }
  0xe5   :  { %8120 = vst [vmem:[#allocation42_spill] sm:$0xff] %v5643_v25  ;;  %v5649_v50 = vadd.f32 %v309_v59, %v5606_v56 }
  0xe6   :  { %8121 = vst [vmem:[#allocation43_spill] sm:$0xff] %v5646_v60  ;;  %v313_v51 = vpop.f32.mrf.mxu1 }
  0xe7   :  { %8122 = vst [vmem:[#allocation44_spill] sm:$0xff] %v5649_v50  ;;  %v5652_v34 = vadd.f32 %v313_v51, %v5615_v37 }
  0xe8   :  { %v315_v32 = vpop.f32.mrf.mxu1 }
  0xe9   :  { %8123 = vst [vmem:[#allocation45_spill] sm:$0xff] %v5652_v34  ;;  %v5655_v54 = vadd.f32 %v315_v32, %v5606_v56 }
  0xea   :  { %v319_v13 = vpop.f32.mrf.mxu1 }
  0xeb   :  { %8124 = vst [vmem:[#allocation46_spill] sm:$0xff] %v5655_v54  ;;  %v5658_v4 = vadd.f32 %v319_v13, %v5615_v37 }
  0xec   :  { %v321_v63 = vpop.f32.mrf.mxu1 }
  0xed   :  { %8125 = vst [vmem:[#allocation47_spill] sm:$0xff] %v5658_v4  ;;  %v5661_v19 = vadd.f32 %v321_v63, %v5606_v56  ;;  %v414_v7 = vpop.f32.mrf.mxu0 }
  0xee   :  { %v325_v60 = vpop.f32.mrf.mxu1  ;;  %v5664_v59 = vadd.f32 %v414_v7, %v5624_v6 }
  0xef   :  { %8126 = vst [vmem:[#allocation48_spill] sm:$0xff] %v5661_v19  ;;  %v5667_v51 = vadd.f32 %v325_v60, %v5615_v37  ;;  %v416_v10 = vpop.f32.mrf.mxu0 }
  0xf0   :  { %8127 = vst [vmem:[#allocation49_spill] sm:$0xff] %v5664_v59  ;;  %v327_v50 = vpop.f32.mrf.mxu1  ;;  %v5670_v32 = vadd.f32 %v416_v10, %v5633_v62  ;;  %v183_v10 = vadd.f32 %v5569_v57, %v5562_v52 }
  0xf1   :  { %8128 = vst [vmem:[#allocation50_spill] sm:$0xff] %v5667_v51  ;;  %v5673_v13 = vadd.f32 %v327_v50, %v5606_v56 }
  0xf2   :  { %8129 = vst [vmem:[#allocation51_spill] sm:$0xff] %v5670_v32  ;;  %v331_v4 = vpop.f32.mrf.mxu1 }
  0xf3   :  { %8130 = vst [vmem:[#allocation52_spill] sm:$0xff] %v5673_v13  ;;  %v5676_v63 = vadd.f32 %v331_v4, %v5615_v37 }
  0xf4   :  { %v333_v54 = vpop.f32.mrf.mxu1 }
  0xf5   :  { %8131 = vst [vmem:[#allocation53_spill] sm:$0xff] %v5676_v63  ;;  %v5679_v58 = vadd.f32 %v333_v54, %v5606_v56 }
  0xf6   :  { %v337_v7 = vpop.f32.mrf.mxu1 }
  0xf7   :  { %v5682_v60 = vadd.f32 %v337_v7, %v5615_v37  ;;  %v185_v7 = vadd.f32 %v5577_v61, %v5564_v53 }
  0xf8   :  { %v339_v59 = vpop.f32.mrf.mxu1 }
  0xf9   :  { %8132 = vst [vmem:[#allocation54_spill] sm:$0xff] %v5682_v60  ;;  %v420_v32 = vpop.f32.mrf.mxu0 }
  0xfa   :  { %v621_v51 = vpop.f32.mrf.mxu1  ;;  %v5687_v50 = vadd.f32 %v420_v32, %v5624_v6 }
  0xfb   :  { %v696_v55 = vadd.f32 %v621_v51, %v183_v10  ;;  %v422_v4 = vpop.f32.mrf.mxu0 }
  0xfc   :  { %8133 = vst [vmem:[#allocation55_spill] sm:$0xff] %v5687_v50  ;;  %v5690_v63 = vadd.f32 %v422_v4, %v5633_v62  ;;  %v623_v34 = vpop.f32.mrf.mxu1 }
  0xfd   :  { %v3371_v54 = vmul.f32 -1.442695, %v696_v55  ;;  %v703_v57 = vadd.f32 %v623_v34, %v185_v7 }
  0xfe   :  { %8134 = vst [vmem:[#allocation56_spill] sm:$0xff] %v5690_v63 }
  0xff   :  { %4269 = vpow2.f32 %v3371_v54  ;;  %v3372_v10 = vmul.f32 -1.442695, %v703_v57 }
 0x100   :  { %v426_v19 = vpop.f32.mrf.mxu0 }
 0x101   :  { %v5695_v60 = vadd.f32 %v426_v19, %v5624_v6  ;;  %4271 = vpow2.f32 %v3372_v10 }
 0x102   :  { %v428_v52 = vpop.f32.mrf.mxu0 }
 0x103   :  { %8135 = vst [vmem:[#allocation57_spill] sm:$0xff] %v5695_v60  ;;  %v5698_v32 = vadd.f32 %v428_v52, %v5633_v62 }
 0x105   :  { %8136 = vst [vmem:[#allocation58_spill] sm:$0xff] %v5698_v32 }
 0x106   :  { %v432_v51 = vpop.f32.mrf.mxu0 }
 0x107   :  { %v5701_v4 = vadd.f32 %v432_v51, %v5624_v6 }
 0x108   :  { %v434_v55 = vpop.f32.mrf.mxu0 }
 0x109   :  { %8137 = vst [vmem:[#allocation59_spill] sm:$0xff] %v5701_v4  ;;  %v5704_v54 = vadd.f32 %v434_v55, %v5633_v62 }
 0x10b   :  { %8138 = vst [vmem:[#allocation60_spill] sm:$0xff] %v5704_v54 }
 0x10c   :  { %v4270_v63 = vpop.eup %4269  ;;  %v438_v53 = vpop.f32.mrf.mxu0 }
 0x10d   :  { %v700_v61 = vadd.f32 1.0, %v4270_v63  ;;  %v5707_v19 = vadd.f32 %v438_v53, %v5624_v6  ;;  %v5723_v63 = vld [vmem:[%s7876_s5] ss:$0 sm:$0xff] }
 0x10e   :  { %v440_v34 = vpop.f32.mrf.mxu0  ;;  %v4272_v50 = vpop.eup %4271  ;;  %8141 = vst [vmem:[#allocation63_spill] sm:$0xff] %v5723_v63 }
 0x10f   :  { %8139 = vst [vmem:[#allocation61_spill] sm:$0xff] %v5707_v19  ;;  %4273 = vrcp.f32 %v700_v61  ;;  %v5710_v7 = vadd.f32 %v440_v34, %v5633_v62  ;;  %v707_v53 = vadd.f32 1.0, %v4272_v50  ;;  %v340_v34 = vadd.f32 %v339_v59, %v5606_v56 }
 0x111   :  { %8140 = vst [vmem:[#allocation62_spill] sm:$0xff] %v5710_v7  ;;  %4275 = vrcp.f32 %v707_v53  ;;  %v8149_v53 = vld [vmem:[#allocation8_spill] sm:$0xff] }
 0x112   :  { %v444_v52 = vpop.f32.mrf.mxu0 }
 0x113   :  { %v5713_v57 = vadd.f32 %v444_v52, %v5624_v6 }
 0x114   :  { %v446_v51 = vpop.f32.mrf.mxu0 }
 0x115   :  { %v5716_v55 = vadd.f32 %v446_v51, %v5633_v62 }
 0x117   :  { %v450_v10 = vpop.f32.mrf.mxu0 }
 0x118   :  { %v451_v13 = vadd.f32 %v450_v10, %v5624_v6 }
 0x119   :  { %v5718_v32 = vpop.f32.mrf.mxu0 }
 0x11c   :  { %v4274_v61 = vpop.eup %4273  ;;  %v692_v60 = vpop.f32.mrf.mxu0 }
 0x11d   :  { %v716_v52 = vadd.f32 %v5723_v63, %v692_v60  ;;  %v797_v54 = vpop.f32.mrf.mxu1 }
 0x11e   :  { %v872_v4 = vadd.f32 %v797_v54, %v340_v34  ;;  %v3730_v51 = vpop.f32.mrf.mxu0  ;;  %v4276_v59 = vpop.eup %4275 }
 0x11f   :  { %v717_v45 = vmul.f32 %v4274_v61, %v716_v52  ;;  %v799_v25 = vpop.f32.mrf.mxu1  ;;  %v720_v2 = vsub.f32 1.0, %v4276_v59  ;;  %v722_v49 = vmul.f32 0.0, %v4276_v59  ;;  %v8150_v61 = vld [vmem:[#allocation9_spill] sm:$0xff]  ;;  %v8153_v52 = vld [vmem:[#allocation12_spill] sm:$0xff]  ;;  %v8156_v59 = vld [vmem:[#allocation15_spill] sm:$0xff] }
 0x120   :  { %v3374_v7 = vmul.f32 -1.442695, %v872_v4  ;;  %v879_v50 = vadd.f32 %v799_v25, %v451_v13  ;;  %v8146_v25 = vld [vmem:[#allocation5_spill] sm:$0xff]  ;;  %v453_v13 = vadd.f32 %v5718_v32, %v5633_v62  ;;  %v8151_v62 = vld [vmem:[#allocation10_spill] sm:$0xff]  ;;  %v8152_v32 = vld [vmem:[#allocation11_spill] sm:$0xff] }
 0x121   :  { %v718_v19 = vadd.f32 %v717_v45, %v296_v48  ;;  %v8145_v48 = vld [vmem:[#allocation4_spill] sm:$0xff] }
 0x122   :  { %4277 = vpow2.f32 %v3374_v7  ;;  %v3375_v56 = vmul.f32 -1.442695, %v879_v50  ;;  %v8148_v7 = vld [vmem:[#allocation7_spill] sm:$0xff]  ;;  %v8154_v50 = vld [vmem:[#allocation13_spill] sm:$0xff] }
 0x123   :  { %4279 = vtanh.f32 %v718_v19  ;;  %v8147_v19 = vld [vmem:[#allocation6_spill] sm:$0xff] }
 0x124   :  { %4281 = vpow2.f32 %v3375_v56  ;;  %v8155_v56 = vld [vmem:[#allocation14_spill] sm:$0xff] }
 0x12f   :  { %v4278_v60 = vpop.eup %4277 }
 0x130   :  { %v4280_v54 = vpop.eup %4279  ;;  %v876_v34 = vadd.f32 1.0, %v4278_v60  ;;  %v8157_v60 = vld [vmem:[#allocation16_spill] sm:$0xff] }
 0x131   :  { %v721_v51 = vmul.f32 %v4280_v54, %v720_v2  ;;  %v8143_v2 = vld [vmem:[#allocation2_spill] sm:$0xff]  ;;  %v8158_v54 = vld [vmem:[#allocation17_spill] sm:$0xff] }
 0x132   :  { %4283 = vrcp.f32 %v876_v34  ;;  %v8159_v34 = vld [vmem:[#allocation18_spill] sm:$0xff] }
 0x133   :  { %v723_v37 = vadd.f32 %v722_v49, %v721_v51  ;;  %v4282_v49 = vpop.eup %4281 }
 0x135   :  { %v5735_v6 = vsel %vm729_vm10, %v723_v37, 0.0  ;;  %3378 = vmatmul.mubr.msk.f32.vlgmr.msra.gmra.mxu1 %vm729_vm10, %v723_v37  ;;  %3799 = vmatmul.mubr.msk.f32.vlgmr.msra.gmra.mxu0 %vm729_vm10, %v723_v37  ;;  %v8160_v37 = vld [vmem:[#allocation19_spill] sm:$0xff] }
 0x136   :  { %907 = vst [vmem:[%s7877_s6] sm:$0xff] %v5735_v6  ;;  %1082 = vmatpush1.msra.mxu1 %v5070_v8  ;;  %3802 = vmatpush3.msra.mxu0 %v5367_v27  ;;  %v5758_v8 = vld [vmem:[%s7876_s5 + $0x1] ss:$0 sm:$0xff] }
 0x137   :  { %1083 = vmatprep.subr.mxu1 %v5082_v11  ;;  %3803 = vmatprep.subr.mxu0 %v8094_v14  ;;  %v883_v11 = vadd.f32 1.0, %v4282_v49  ;;  %v8161_v49 = vld [vmem:[#allocation20_spill] sm:$0xff] }
 0x138   :  { %1084 = vmatpush1.msra.mxu1 %v5091_v12  ;;  %3804 = vmatpush3.msra.mxu0 %v5376_v3 }
 0x139   :  { %1085 = vmatprep.subr.mxu1 %v5102_v15  ;;  %3805 = vmatprep.subr.mxu0 %v8094_v14  ;;  %4285 = vrcp.f32 %v883_v11  ;;  %v8162_v11 = vld [vmem:[#allocation21_spill] sm:$0xff] }
 0x13a   :  { %1086 = vmatpush1.msra.mxu1 %v5109_v16  ;;  %3806 = vmatpush3.msra.mxu0 %v5386_v29  ;;  %v8144_v16 = vld [vmem:[#allocation3_spill] sm:$0xff] }
 0x13b   :  { %1087 = vmatprep.subr.mxu1 %v5116_v17  ;;  %3807 = vmatprep.subr.mxu0 %v8094_v14 }
 0x13c   :  { %v868_v12 = vpop.f32.mrf.mxu0  ;;  %1088 = vmatpush1.msra.mxu1 %v8143_v2  ;;  %3808 = vmatpush3.msra.mxu0 %v5395_v20 }
 0x13d   :  { %v892_v15 = vadd.f32 %v5758_v8, %v868_v12  ;;  %1089 = vmatprep.subr.mxu1 %v8144_v16  ;;  %3809 = vmatprep.subr.mxu0 %v8094_v14  ;;  %v8163_v12 = vld [vmem:[#allocation22_spill] sm:$0xff]  ;;  %v8164_v16 = vld [vmem:[#allocation23_spill] sm:$0xff] }
 0x13e   :  { %v3765_v45 = vpop.f32.mrf.mxu0  ;;  %1090 = vmatpush1.msra.mxu1 %v8145_v48  ;;  %3810 = vmatpush3.msra.mxu0 %v5406_v21 }
 0x13f   :  { %v4284_v17 = vpop.eup %4283  ;;  %1091 = vmatprep.subr.mxu1 %v8146_v25  ;;  %3811 = vmatprep.subr.mxu0 %v8094_v14  ;;  %v8165_v45 = vld [vmem:[#allocation24_spill] sm:$0xff]  ;;  %v8166_v25 = vld [vmem:[#allocation25_spill] sm:$0xff] }
 0x140   :  { %v893_v4 = vmul.f32 %v4284_v17, %v892_v15  ;;  %1092 = vmatpush1.msra.mxu1 %v8147_v19  ;;  %3812 = vmatpush3.msra.mxu0 %v5414_v22  ;;  %8190 = vst [vmem:[#allocation24_spill] sm:$0xff] %v6018_v0 }
 0x141   :  { %1093 = vmatprep.subr.mxu1 %v8148_v7  ;;  %3813 = vmatprep.subr.mxu0 %v8094_v14 }
 0x142   :  { %v894_v10 = vadd.f32 %v893_v4, %v453_v13  ;;  %1094 = vmatpush1.msra.mxu1 %v8149_v53  ;;  %3814 = vmatpush3.msra.mxu0 %v5425_v35  ;;  %v5813_v13 = vpop.permute.xlu0 %903  ;;  %v8168_v4 = vld [vmem:[#allocation26_spill] sm:$0xff]  ;;  %v5843_v53 = vld [vmem:[%s7873_s4 + $0x168] sm:$0xff] }
 0x143   :  { %1095 = vmatprep.subr.mxu1 %v8150_v61  ;;  %3815 = vmatprep.subr.mxu0 %v8094_v14  ;;  %8167 = vst [vmem:[#allocation2_spill] sm:$0xff] %v5813_v13  ;;  %vm905_vm11 = vcmp.eq.s32.totalorder %v5813_v13, 1  ;;  %v5849_v61 = vld [vmem:[%s7873_s4 + $0x178] sm:$0xff]  ;;  %v6032_v13 = vld [vmem:[%s7873_s4 + $0x60] sm:$0xff] }
 0x144   :  { %4287 = vtanh.f32 %v894_v10  ;;  %1096 = vmatpush1.msra.mxu1 %v8151_v62  ;;  %3816 = vmatpush3.msra.mxu0 %v5433_v36  ;;  %v5832_v10 = vld [vmem:[%s7873_s4 + $0x170] sm:$0xff]  ;;  %v5855_v62 = vld [vmem:[%s7873_s4 + $0x158] sm:$0xff]  ;;  %8192 = vst [vmem:[#allocation26_spill] sm:$0xff] %v6032_v13 }
 0x145   :  { %1097 = vmatprep.subr.mxu1 %v8152_v32  ;;  %3817 = vmatprep.subr.mxu0 %v8094_v14  ;;  %v5862_v32 = vld [vmem:[%s7873_s4 + $0x150] sm:$0xff] }
 0x146   :  { %1098 = vmatpush1.msra.mxu1 %v8153_v52  ;;  %3818 = vmatpush3.msra.mxu0 %v5443_v39  ;;  %v4286_v51 = vpop.eup %4285  ;;  %v5868_v52 = vld [vmem:[%s7873_s4 + $0x160] sm:$0xff] }
 0x147   :  { %1099 = vmatprep.subr.mxu1 %v8154_v50  ;;  %3819 = vmatprep.subr.mxu0 %v8094_v14  ;;  %v896_v2 = vsub.f32 1.0, %v4286_v51  ;;  %v898_v17 = vmul.f32 0.0, %v4286_v51  ;;  %v5874_v50 = vld [vmem:[%s7873_s4 + $0x140] sm:$0xff]  ;;  %v5912_v51 = vld [vmem:[%s7873_s4 + $0x110] sm:$0xff] }
 0x148   :  { %1100 = vmatpush1.msra.mxu1 %v8155_v56  ;;  %3820 = vmatpush3.msra.mxu0 %v5451_v40  ;;  %v5881_v56 = vld [vmem:[%s7873_s4 + $0x138] sm:$0xff]  ;;  %8174 = vst [vmem:[#allocation8_spill] sm:$0xff] %v5912_v51 }
 0x149   :  { %1101 = vmatprep.subr.mxu1 %v8156_v59  ;;  %3821 = vmatprep.subr.mxu0 %v8094_v14  ;;  %8169 = vst [vmem:[#allocation3_spill] sm:$0xff] %v5881_v56  ;;  %v5887_v59 = vld [vmem:[%s7873_s4 + $0x148] sm:$0xff] }
 0x14a   :  { %1102 = vmatpush1.msra.mxu1 %v8157_v60  ;;  %3822 = vmatpush3.msra.mxu0 %v5460_v41  ;;  %8170 = vst [vmem:[#allocation4_spill] sm:$0xff] %v5887_v59  ;;  %v5893_v60 = vld [vmem:[%s7873_s4 + $0x128] sm:$0xff] }
 0x14b   :  { %1103 = vmatprep.subr.mxu1 %v8158_v54  ;;  %3823 = vmatprep.subr.mxu0 %v8094_v14  ;;  %8171 = vst [vmem:[#allocation5_spill] sm:$0xff] %v5893_v60  ;;  %v5900_v54 = vld [vmem:[%s7873_s4 + $0x120] sm:$0xff] }
 0x14c   :  { %1104 = vmatpush1.msra.mxu1 %v8159_v34  ;;  %3824 = vmatpush3.msra.mxu0 %v5469_v42  ;;  %8172 = vst [vmem:[#allocation6_spill] sm:$0xff] %v5900_v54  ;;  %v5906_v34 = vld [vmem:[%s7873_s4 + $0x130] sm:$0xff] }
 0x14d   :  { %1105 = vmatprep.subr.mxu1 %v8160_v37  ;;  %3825 = vmatprep.subr.mxu0 %v8094_v14  ;;  %8173 = vst [vmem:[#allocation7_spill] sm:$0xff] %v5906_v34  ;;  %v5919_v37 = vld [vmem:[%s7873_s4 + $0x108] sm:$0xff] }
 0x14e   :  { %1106 = vmatpush1.msra.mxu1 %v8161_v49  ;;  %3826 = vmatpush3.msra.mxu0 %v5478_v43  ;;  %8175 = vst [vmem:[#allocation9_spill] sm:$0xff] %v5919_v37  ;;  %v5925_v49 = vld [vmem:[%s7873_s4 + $0x118] sm:$0xff] }
 0x14f   :  { %1107 = vmatprep.subr.mxu1 %v8162_v11  ;;  %3827 = vmatprep.subr.mxu0 %v8094_v14  ;;  %8176 = vst [vmem:[#allocation10_spill] sm:$0xff] %v5925_v49  ;;  %v5931_v11 = vld [vmem:[%s7873_s4 + $0xf8] sm:$0xff] }
 0x150   :  { %1108 = vmatpush1.msra.mxu1 %v8163_v12  ;;  %3828 = vmatpush3.msra.mxu0 %v5487_v44  ;;  %8177 = vst [vmem:[#allocation11_spill] sm:$0xff] %v5931_v11  ;;  %v5938_v12 = vld [vmem:[%s7873_s4 + $0xf0] sm:$0xff] }
 0x151   :  { %v4288_v15 = vpop.eup %4287  ;;  %1109 = vmatprep.subr.mxu1 %v8164_v16  ;;  %3829 = vmatprep.subr.mxu0 %v8094_v14  ;;  %8178 = vst [vmem:[#allocation12_spill] sm:$0xff] %v5938_v12  ;;  %v5957_v16 = vld [vmem:[%s7873_s4 + $0xd8] sm:$0xff] }
 0x152   :  { %1110 = vmatpush1.msra.mxu1 %v8165_v45  ;;  %3830 = vmatpush3.msra.mxu0 %v5496_v46  ;;  %v897_v48 = vmul.f32 %v4288_v15, %v896_v2  ;;  %v5944_v2 = vld [vmem:[%s7873_s4 + $0x100] sm:$0xff]  ;;  %8181 = vst [vmem:[#allocation15_spill] sm:$0xff] %v5957_v16  ;;  %v5963_v45 = vld [vmem:[%s7873_s4 + $0xe8] sm:$0xff] }
 0x153   :  { %1111 = vmatprep.subr.mxu1 %v8166_v25  ;;  %3831 = vmatprep.subr.mxu0 %v8094_v14  ;;  %8179 = vst [vmem:[#allocation13_spill] sm:$0xff] %v5944_v2  ;;  %v5950_v15 = vld [vmem:[%s7873_s4 + $0xe0] sm:$0xff]  ;;  %8182 = vst [vmem:[#allocation16_spill] sm:$0xff] %v5963_v45  ;;  %v5983_v25 = vld [vmem:[%s7873_s4 + $0xb0] sm:$0xff] }
 0x154   :  { %1112 = vmatpush1.msra.mxu1 %v8168_v4  ;;  %1145 = vmatprep.mubr.f32.mxu1 %v8094_v14  ;;  %v899_v19 = vadd.f32 %v898_v17, %v897_v48  ;;  %8180 = vst [vmem:[#allocation14_spill] sm:$0xff] %v5950_v15  ;;  %v5969_v48 = vld [vmem:[%s7873_s4 + $0xc8] sm:$0xff]  ;;  %v5976_v17 = vld [vmem:[%s7873_s4 + $0xc0] sm:$0xff]  ;;  %8185 = vst [vmem:[#allocation19_spill] sm:$0xff] %v5983_v25 }
 0x155   :  { %3832 = vmatpush3.msra.mxu0 %v5505_v47  ;;  %3833 = vmatprep.mubr.msk.f32.mxu0 %vm4627_vm2, %v8094_v14  ;;  %8183 = vst [vmem:[#allocation17_spill] sm:$0xff] %v5969_v48  ;;  %8184 = vst [vmem:[#allocation18_spill] sm:$0xff] %v5976_v17  ;;  %v5990_v4 = vld [vmem:[%s7873_s4 + $0xa8] sm:$0xff] }
 0x156   :  { %3382 = vmatmul.mubr.msk.f32.vlgmr.msra.gmra.mxu1 %vm905_vm11, %v899_v19  ;;  %3834 = vmatmul.mubr.msk.f32.vlgmr.msra.gmra.mxu0 %vm905_vm11, %v899_v19  ;;  %v5827_v7 = vsel %vm905_vm11, %v899_v19, 0.0  ;;  %8186 = vst [vmem:[#allocation20_spill] sm:$0xff] %v5990_v4  ;;  %v6004_v19 = vld [vmem:[%s7873_s4 + $0x90] sm:$0xff] }
 0x157   :  { %1256 = vmatprep.subr.mxu1 %v5832_v10  ;;  %3836 = vmatprep.subr.mxu0 %v8094_v14  ;;  %3377 = vst [vmem:[%s7878_s7 + $0x38] sm:$0xff] %v5827_v7  ;;  %8188 = vst [vmem:[#allocation22_spill] sm:$0xff] %v6004_v19 }
 0x158   :  { %1257 = vmatpush1.msra.mxu1 %v5843_v53  ;;  %3837 = vmatpush3.msra.mxu0 %v5849_v61 }
 0x159   :  { %1258 = vmatprep.subr.mxu1 %v5855_v62  ;;  %3838 = vmatprep.subr.mxu0 %v8094_v14 }
 0x15a   :  { %1259 = vmatpush1.msra.mxu1 %v5862_v32  ;;  %3839 = vmatpush3.msra.mxu0 %v5868_v52 }
 0x15b   :  { %1260 = vmatprep.subr.mxu1 %v5874_v50  ;;  %3840 = vmatprep.subr.mxu0 %v8094_v14 }
 0x15c   :  { %1261 = vmatpush1.msra.mxu1 %v5881_v56  ;;  %3841 = vmatpush3.msra.mxu0 %v5887_v59 }
 0x15d   :  { %1262 = vmatprep.subr.mxu1 %v5893_v60  ;;  %3842 = vmatprep.subr.mxu0 %v8094_v14 }
 0x15e   :  { %1263 = vmatpush1.msra.mxu1 %v5900_v54  ;;  %3843 = vmatpush3.msra.mxu0 %v5906_v34 }
 0x15f   :  { %1264 = vmatprep.subr.mxu1 %v5912_v51  ;;  %3844 = vmatprep.subr.mxu0 %v8094_v14 }
 0x160   :  { %1265 = vmatpush1.msra.mxu1 %v5919_v37  ;;  %3845 = vmatpush3.msra.mxu0 %v5925_v49 }
 0x161   :  { %1266 = vmatprep.subr.mxu1 %v5931_v11  ;;  %3846 = vmatprep.subr.mxu0 %v8094_v14 }
 0x162   :  { %1267 = vmatpush1.msra.mxu1 %v5938_v12  ;;  %3847 = vmatpush3.msra.mxu0 %v5944_v2 }
 0x163   :  { %1268 = vmatprep.subr.mxu1 %v5950_v15  ;;  %3848 = vmatprep.subr.mxu0 %v8094_v14 }
 0x164   :  { %1269 = vmatpush1.msra.mxu1 %v5957_v16  ;;  %3849 = vmatpush3.msra.mxu0 %v5963_v45 }
 0x165   :  { %1270 = vmatprep.subr.mxu1 %v5969_v48  ;;  %3850 = vmatprep.subr.mxu0 %v8094_v14 }
 0x166   :  { %1271 = vmatpush1.msra.mxu1 %v5976_v17  ;;  %3851 = vmatpush3.msra.mxu0 %v5149_v24  ;;  %v5997_v24 = vld [vmem:[%s7873_s4 + $0x98] sm:$0xff] }
 0x167   :  { %1272 = vmatprep.subr.mxu1 %v5983_v25  ;;  %3852 = vmatprep.subr.mxu0 %v8094_v14  ;;  %8187 = vst [vmem:[#allocation21_spill] sm:$0xff] %v5997_v24 }
 0x168   :  { %1273 = vmatpush1.msra.mxu1 %v5990_v4  ;;  %3853 = vmatpush3.msra.mxu0 %v5182_v31  ;;  %v6011_v31 = vld [vmem:[%s7873_s4 + $0x80] sm:$0xff] }
 0x169   :  { %1274 = vmatprep.subr.mxu1 %v5997_v24  ;;  %3854 = vmatprep.subr.mxu0 %v8094_v14  ;;  %8189 = vst [vmem:[#allocation23_spill] sm:$0xff] %v6011_v31 }
 0x16a   :  { %1275 = vmatpush1.msra.mxu1 %v6004_v19  ;;  %3855 = vmatpush3.msra.mxu0 %v5202_v38  ;;  %v6025_v38 = vld [vmem:[%s7873_s4 + $0x68] sm:$0xff] }
 0x16b   :  { %1276 = vmatprep.subr.mxu1 %v6011_v31  ;;  %3856 = vmatprep.subr.mxu0 %v8094_v14  ;;  %8191 = vst [vmem:[#allocation25_spill] sm:$0xff] %v6025_v38 }
 0x16c   :  { %1277 = vmatpush1.msra.mxu1 %v6018_v0  ;;  %3857 = vmatpush3.msra.mxu0 %v5235_v33  ;;  %v6039_v33 = vld [vmem:[%s7873_s4 + $0x50] sm:$0xff] }
 0x16d   :  { %1278 = vmatprep.subr.mxu1 %v6025_v38  ;;  %3858 = vmatprep.subr.mxu0 %v8094_v14  ;;  %8193 = vst [vmem:[#allocation65_spill] sm:$0xff] %v6039_v33  ;;  %v6046_v38 = vld [vmem:[%s7873_s4 + $0x48] sm:$0xff] }
 0x16e   :  { %1279 = vmatpush1.msra.mxu1 %v6032_v13  ;;  %3859 = vmatpush3.msra.mxu0 %v5255_v9  ;;  %8194 = vst [vmem:[#allocation66_spill] sm:$0xff] %v6046_v38  ;;  %v6053_v9 = vld [vmem:[%s7873_s4 + $0x38] sm:$0xff] }
 0x16f   :  { %1280 = vmatprep.subr.mxu1 %v6039_v33  ;;  %3860 = vmatprep.subr.mxu0 %v8094_v14  ;;  %8195 = vst [vmem:[#allocation67_spill] sm:$0xff] %v6053_v9  ;;  %v6060_v33 = vld [vmem:[%s7873_s4 + $0x30] sm:$0xff] }
 0x170   :  { %1281 = vmatpush1.msra.mxu1 %v6046_v38  ;;  %3861 = vmatpush3.msra.mxu0 %v5283_v30  ;;  %8196 = vst [vmem:[#allocation68_spill] sm:$0xff] %v6060_v33  ;;  %v6067_v30 = vld [vmem:[%s7873_s4 + $0x20] sm:$0xff] }
 0x171   :  { %1282 = vmatprep.subr.mxu1 %v6053_v9  ;;  %3862 = vmatprep.subr.mxu0 %v8094_v14  ;;  %8197 = vst [vmem:[#allocation69_spill] sm:$0xff] %v6067_v30  ;;  %v6074_v9 = vld [vmem:[%s7873_s4 + $0x18] sm:$0xff] }
 0x172   :  { %1283 = vmatpush1.msra.mxu1 %v6060_v33  ;;  %3863 = vmatpush3.msra.mxu0 %v5303_v26  ;;  %8198 = vst [vmem:[#allocation70_spill] sm:$0xff] %v6074_v9  ;;  %v6081_v26 = vld [vmem:[%s7873_s4 + $0x8] sm:$0xff] }
 0x173   :  { %1284 = vmatprep.subr.mxu1 %v6067_v30  ;;  %3864 = vmatprep.subr.mxu0 %v8094_v14  ;;  %8199 = vst [vmem:[#allocation71_spill] sm:$0xff] %v6081_v26  ;;  %v6088_v30 = vld [vmem:[%s7873_s4] sm:$0xff] }
 0x174   :  { %1285 = vmatpush1.msra.mxu1 %v6074_v9  ;;  %3865 = vmatpush3.msra.mxu0 %v5324_v28  ;;  %8200 = vst [vmem:[#allocation72_spill] sm:$0xff] %v6088_v30  ;;  %v6098_v28 = vld [vmem:[%s7873_s4 + $0x2f0] sm:$0xff] }
 0x175   :  { %1286 = vmatprep.subr.mxu1 %v6081_v26  ;;  %3866 = vmatprep.subr.mxu0 %v8094_v14  ;;  %8201 = vst [vmem:[#allocation73_spill] sm:$0xff] %v6098_v28 }
 0x176   :  { %1287 = vmatpush1.msra.mxu1 %v6088_v30  ;;  %3867 = vmatpush3.msra.mxu0 %v5349_v23 }
 0x177   :  { %1320 = vmatprep.mubr.f32.mxu1 %v8094_v14  ;;  %3868 = vmatprep.mubr.msk.f32.mxu0 %vm4627_vm2, %v8094_v14 }
 0x178   :  { %1427 = vmatprep.subr.mxu1 %v6098_v28  ;;  %3871 = vmatprep.subr.mxu0 %v8094_v14 }
 0x1f5   :  { %v976_v26 = vpop.f32.mrf.mxu1  ;;  %v1047_v9 = vpop.f32.mrf.mxu0 }
 0x1f6   :  { %v1051_v30 = vadd.f32 %v976_v26, %v5586_v5  ;;  %v1065_v28 = vadd.f32 %v5723_v63, %v1047_v9  ;;  %v6108_v63 = vpop.permute.xlu1 %1076 }
 0x1f7   :  { %v3800_v33 = vpop.f32.mrf.mxu0  ;;  %v978_v38 = vpop.f32.mrf.mxu1  ;;  %8202 = vst [vmem:[#allocation74_spill] sm:$0xff] %v6108_v63  ;;  %vm1078_vm12 = vcmp.eq.s32.totalorder %v6108_v63, 1  ;;  %v8214_v63 = vld [vmem:[#allocation21_spill] sm:$0xff] }
 0x1f8   :  { %v3380_v23 = vmul.f32 -1.442695, %v1051_v30  ;;  %v1058_v13 = vadd.f32 %v978_v38, %v5592_v18 }
 0x1fa   :  { %4289 = vpow2.f32 %v3380_v23  ;;  %v3381_v0 = vmul.f32 -1.442695, %v1058_v13 }
 0x1fc   :  { %4291 = vpow2.f32 %v3381_v0 }
 0x207   :  { %v4290_v31 = vpop.eup %4289 }
 0x208   :  { %v1055_v19 = vadd.f32 1.0, %v4290_v31 }
 0x209   :  { %v4292_v24 = vpop.eup %4291 }
 0x20a   :  { %4293 = vrcp.f32 %v1055_v19  ;;  %v1062_v4 = vadd.f32 1.0, %v4292_v24 }
 0x20c   :  { %4295 = vrcp.f32 %v1062_v4  ;;  %v6127_v4 = vld [vmem:[%s7873_s4 + $0x2e8] sm:$0xff] }
 0x216   :  { %v1147_v25 = vpop.f32.mrf.mxu1  ;;  %v1218_v17 = vpop.f32.mrf.mxu0 }
 0x217   :  { %v4294_v48 = vpop.eup %4293  ;;  %v1222_v5 = vadd.f32 %v1147_v25, %v5679_v58 }
 0x218   :  { %v1066_v33 = vmul.f32 %v4294_v48, %v1065_v28  ;;  %v3835_v30 = vpop.f32.mrf.mxu0  ;;  %v1149_v13 = vpop.f32.mrf.mxu1 }
 0x219   :  { %v3384_v26 = vmul.f32 -1.442695, %v1222_v5  ;;  %v1229_v0 = vadd.f32 %v1149_v13, %v5713_v57  ;;  %v4296_v24 = vpop.eup %4295  ;;  %v6141_v5 = vld [vmem:[%s7873_s4 + $0x2d0] sm:$0xff] }
 0x21a   :  { %v1067_v18 = vadd.f32 %v1066_v33, %v5628_v1  ;;  %v1069_v38 = vsub.f32 1.0, %v4296_v24  ;;  %v1071_v48 = vmul.f32 %v4296_v24, %v5735_v6  ;;  %v6155_v33 = vld [vmem:[%s7873_s4 + $0x2b8] sm:$0xff]  ;;  %v6206_v24 = vld [vmem:[%s7873_s4 + $0x260] sm:$0xff] }
 0x21b   :  { %4297 = vpow2.f32 %v3384_v26  ;;  %v3385_v19 = vmul.f32 -1.442695, %v1229_v0  ;;  %v6169_v26 = vld [vmem:[%s7873_s4 + $0x2a0] sm:$0xff]  ;;  %v6184_v0 = vld [vmem:[%s7873_s4 + $0x288] sm:$0xff] }
 0x21c   :  { %4299 = vtanh.f32 %v1067_v18  ;;  %v6177_v18 = vld [vmem:[%s7873_s4 + $0x290] sm:$0xff] }
 0x21d   :  { %4301 = vpow2.f32 %v3385_v19  ;;  %v6198_v19 = vld [vmem:[%s7873_s4 + $0x270] sm:$0xff] }
 0x228   :  { %v4298_v31 = vpop.eup %4297 }
 0x229   :  { %v4300_v9 = vpop.eup %4299  ;;  %v1226_v23 = vadd.f32 1.0, %v4298_v31  ;;  %v6213_v31 = vld [vmem:[%s7873_s4 + $0x258] sm:$0xff] }
 0x22a   :  { %v1070_v58 = vmul.f32 %v4300_v9, %v1069_v38  ;;  %v4302_v28 = vpop.eup %4301  ;;  %v6241_v38 = vld [vmem:[%s7873_s4 + $0x228] sm:$0xff]  ;;  %v6255_v9 = vld [vmem:[%s7873_s4 + $0x210] sm:$0xff] }
 0x22b   :  { %4303 = vrcp.f32 %v1226_v23  ;;  %v1233_v30 = vadd.f32 1.0, %v4302_v28  ;;  %v6269_v23 = vld [vmem:[%s7873_s4 + $0x1f8] sm:$0xff] }
 0x22c   :  { %v1072_v1 = vadd.f32 %v1071_v48, %v1070_v58  ;;  %v6283_v48 = vld [vmem:[%s7873_s4 + $0x1e0] sm:$0xff] }
 0x22d   :  { %4305 = vrcp.f32 %v1233_v30  ;;  %v6311_v30 = vld [vmem:[%s7873_s4 + $0x1b0] sm:$0xff] }
 0x22e   :  { %v1080_v25 = vsel %vm1078_vm12, %v1072_v1, 0.0  ;;  %v6117_v57 = vsel %vm1078_vm12, %v1072_v1, %v5735_v6  ;;  %v6134_v6 = vld [vmem:[%s7873_s4 + $0x2d8] sm:$0xff]  ;;  %v6297_v1 = vld [vmem:[%s7873_s4 + $0x1c8] sm:$0xff] }
 0x22f   :  { %3386 = vst [vmem:[%s7877_s6 + $0x8] sm:$0xff] %v1080_v25  ;;  %1321 = vmatmul.mubr.f32.vlgmr.msra.gmra.mxu1 %v6117_v57  ;;  %3869 = vmatmul.mubr.f32.vlgmr.msra.gmra.mxu0 %v6117_v57 }
 0x230   :  { %1428 = vmatpush1.msra.mxu1 %v6127_v4  ;;  %3872 = vmatpush3.msra.mxu0 %v5367_v27  ;;  %v6148_v27 = vld [vmem:[%s7873_s4 + $0x2c0] sm:$0xff] }
 0x231   :  { %1429 = vmatprep.subr.mxu1 %v6134_v6  ;;  %3873 = vmatprep.subr.mxu0 %v8094_v14 }
 0x232   :  { %1430 = vmatpush1.msra.mxu1 %v6141_v5  ;;  %3874 = vmatpush3.msra.mxu0 %v5376_v3  ;;  %v6162_v3 = vld [vmem:[%s7873_s4 + $0x2a8] sm:$0xff] }
 0x233   :  { %1431 = vmatprep.subr.mxu1 %v6148_v27  ;;  %3875 = vmatprep.subr.mxu0 %v8094_v14 }
 0x234   :  { %1432 = vmatpush1.msra.mxu1 %v6155_v33  ;;  %3876 = vmatpush3.msra.mxu0 %v5386_v29  ;;  %v1236_v29 = vadd.f32 %v5758_v8, %v1218_v17  ;;  %v6191_v17 = vld [vmem:[%s7873_s4 + $0x278] sm:$0xff] }
 0x235   :  { %1433 = vmatprep.subr.mxu1 %v6162_v3  ;;  %3877 = vmatprep.subr.mxu0 %v8094_v14 }
 0x236   :  { %1434 = vmatpush1.msra.mxu1 %v6169_v26  ;;  %3878 = vmatpush3.msra.mxu0 %v5395_v20 }
 0x237   :  { %1435 = vmatprep.subr.mxu1 %v6177_v18  ;;  %3879 = vmatprep.subr.mxu0 %v8094_v14 }
 0x238   :  { %v4304_v13 = vpop.eup %4303  ;;  %1436 = vmatpush1.msra.mxu1 %v6184_v0  ;;  %3880 = vmatpush3.msra.mxu0 %v5406_v21 }
 0x239   :  { %v1237_v20 = vmul.f32 %v4304_v13, %v1236_v29  ;;  %1437 = vmatprep.subr.mxu1 %v6191_v17  ;;  %3881 = vmatprep.subr.mxu0 %v8094_v14  ;;  %v6319_v13 = vld [vmem:[%s7873_s4 + $0x1a0] sm:$0xff] }
 0x23a   :  { %1438 = vmatpush1.msra.mxu1 %v6198_v19  ;;  %3882 = vmatpush3.msra.mxu0 %v5414_v22  ;;  %v6220_v22 = vld [vmem:[%s7873_s4 + $0x248] sm:$0xff]  ;;  %v4306_v58 = vpop.eup %4305  ;;  %8203 = vst [vmem:[#allocation75_spill] sm:$0xff] %v6319_v13 }
 0x23b   :  { %v1238_v21 = vadd.f32 %v1237_v20, %v5716_v55  ;;  %1439 = vmatprep.subr.mxu1 %v6206_v24  ;;  %3883 = vmatprep.subr.mxu0 %v8094_v14  ;;  %v6227_v55 = vld [vmem:[%s7873_s4 + $0x240] sm:$0xff]  ;;  %v1240_v25 = vsub.f32 1.0, %v4306_v58  ;;  %v1242_v29 = vmul.f32 %v4306_v58, %v5827_v7  ;;  %v6326_v20 = vld [vmem:[%s7873_s4 + $0x198] sm:$0xff]  ;;  %v6335_v58 = vld [vmem:[%s7873_s4 + $0x188] sm:$0xff] }
 0x23c   :  { %1440 = vmatpush1.msra.mxu1 %v6213_v31  ;;  %3884 = vmatpush3.msra.mxu0 %v5425_v35  ;;  %v6234_v35 = vld [vmem:[%s7873_s4 + $0x230] sm:$0xff]  ;;  %8204 = vst [vmem:[#allocation76_spill] sm:$0xff] %v6326_v20  ;;  %8206 = vst [vmem:[#allocation78_spill] sm:$0xff] %v6335_v58 }
 0x23d   :  { %4307 = vtanh.f32 %v1238_v21  ;;  %1441 = vmatprep.subr.mxu1 %v6220_v22  ;;  %3885 = vmatprep.subr.mxu0 %v8094_v14 }
 0x23e   :  { %1442 = vmatpush1.msra.mxu1 %v6227_v55  ;;  %3886 = vmatpush3.msra.mxu0 %v5433_v36  ;;  %v6248_v36 = vld [vmem:[%s7873_s4 + $0x218] sm:$0xff] }
 0x23f   :  { %1443 = vmatprep.subr.mxu1 %v6234_v35  ;;  %3887 = vmatprep.subr.mxu0 %v8094_v14 }
 0x240   :  { %1444 = vmatpush1.msra.mxu1 %v6241_v38  ;;  %3888 = vmatpush3.msra.mxu0 %v5443_v39  ;;  %v6262_v39 = vld [vmem:[%s7873_s4 + $0x200] sm:$0xff] }
 0x241   :  { %1445 = vmatprep.subr.mxu1 %v6248_v36  ;;  %3889 = vmatprep.subr.mxu0 %v8094_v14 }
 0x242   :  { %1446 = vmatpush1.msra.mxu1 %v6255_v9  ;;  %3890 = vmatpush3.msra.mxu0 %v5451_v40  ;;  %v6276_v40 = vld [vmem:[%s7873_s4 + $0x1e8] sm:$0xff] }
 0x243   :  { %1447 = vmatprep.subr.mxu1 %v6262_v39  ;;  %3891 = vmatprep.subr.mxu0 %v8094_v14 }
 0x244   :  { %1448 = vmatpush1.msra.mxu1 %v6269_v23  ;;  %3892 = vmatpush3.msra.mxu0 %v5460_v41  ;;  %v6290_v41 = vld [vmem:[%s7873_s4 + $0x1d0] sm:$0xff] }
 0x245   :  { %1449 = vmatprep.subr.mxu1 %v6276_v40  ;;  %3893 = vmatprep.subr.mxu0 %v8094_v14 }
 0x246   :  { %1450 = vmatpush1.msra.mxu1 %v6283_v48  ;;  %3894 = vmatpush3.msra.mxu0 %v5469_v42  ;;  %v6304_v42 = vld [vmem:[%s7873_s4 + $0x1b8] sm:$0xff] }
 0x247   :  { %1451 = vmatprep.subr.mxu1 %v6290_v41  ;;  %3895 = vmatprep.subr.mxu0 %v8094_v14 }
 0x248   :  { %1452 = vmatpush1.msra.mxu1 %v6297_v1  ;;  %3896 = vmatpush3.msra.mxu0 %v5478_v43 }
 0x249   :  { %1453 = vmatprep.subr.mxu1 %v6304_v42  ;;  %3897 = vmatprep.subr.mxu0 %v8094_v14 }
 0x24a   :  { %v4308_v28 = vpop.eup %4307  ;;  %1454 = vmatpush1.msra.mxu1 %v6311_v30  ;;  %3898 = vmatpush3.msra.mxu0 %v5487_v44  ;;  %v6330_v44 = vpop.permute.xlu1 %1247 }
 0x24b   :  { %v1241_v43 = vmul.f32 %v4308_v28, %v1240_v25  ;;  %1455 = vmatprep.subr.mxu1 %v6319_v13  ;;  %3899 = vmatprep.subr.mxu0 %v8094_v14  ;;  %8205 = vst [vmem:[#allocation77_spill] sm:$0xff] %v6330_v44  ;;  %vm1249_vm13 = vcmp.eq.s32.totalorder %v6330_v44, 1  ;;  %v6343_v25 = vld [vmem:[%s7873_s4 + $0x180] sm:$0xff] }
 0x24c   :  { %1456 = vmatpush1.msra.mxu1 %v6326_v20  ;;  %3900 = vmatpush3.msra.mxu0 %v5496_v46  ;;  %8207 = vst [vmem:[#allocation79_spill] sm:$0xff] %v6343_v25  ;;  %v8215_v44 = vld [vmem:[#allocation22_spill] sm:$0xff] }
 0x24d   :  { %v1243_v21 = vadd.f32 %v1242_v29, %v1241_v43  ;;  %1457 = vmatprep.subr.mxu1 %v6335_v58  ;;  %3901 = vmatprep.subr.mxu0 %v8094_v14  ;;  %v6396_v43 = vld [vmem:[%s7873_s4 + $0xd0] sm:$0xff]  ;;  %v8211_v29 = vld [vmem:[#allocation19_spill] sm:$0xff] }
 0x24e   :  { %1458 = vmatpush1.msra.mxu1 %v6343_v25  ;;  %1491 = vmatprep.mubr.f32.mxu1 %v8094_v14  ;;  %8210 = vst [vmem:[#allocation80_spill] sm:$0xff] %v6396_v43 }
 0x24f   :  { %v1251_v46 = vsel %vm1249_vm13, %v1243_v21, 0.0  ;;  %3902 = vmatpush3.msra.mxu0 %v5505_v47  ;;  %3903 = vmatprep.mubr.msk.f32.mxu0 %vm4627_vm2, %v8094_v14  ;;  %v6355_v28 = vsel %vm1249_vm13, %v1243_v21, %v5827_v7  ;;  %v8208_v47 = vld [vmem:[#allocation17_spill] sm:$0xff]  ;;  %v8209_v7 = vld [vmem:[#allocation18_spill] sm:$0xff]  ;;  %v8212_v21 = vld [vmem:[#allocation20_spill] sm:$0xff] }
 0x250   :  { %3387 = vst [vmem:[%s7878_s7 + $0x30] sm:$0xff] %v1251_v46  ;;  %1492 = vmatmul.mubr.f32.vlgmr.msra.gmra.mxu1 %v6355_v28  ;;  %3904 = vmatmul.mubr.f32.vlgmr.msra.gmra.mxu0 %v6355_v28  ;;  %v6405_v46 = vld [vmem:[%s7873_s4 + $0xb8] sm:$0xff] }
 0x251   :  { %1602 = vmatprep.subr.mxu1 %v5832_v10  ;;  %3906 = vmatprep.subr.mxu0 %v8094_v14  ;;  %8213 = vst [vmem:[#allocation81_spill] sm:$0xff] %v6405_v46 }
 0x252   :  { %1603 = vmatpush1.msra.mxu1 %v5843_v53  ;;  %3907 = vmatpush3.msra.mxu0 %v5849_v61 }
 0x253   :  { %1604 = vmatprep.subr.mxu1 %v5855_v62  ;;  %3908 = vmatprep.subr.mxu0 %v8094_v14 }
 0x254   :  { %1605 = vmatpush1.msra.mxu1 %v5862_v32  ;;  %3909 = vmatpush3.msra.mxu0 %v5868_v52 }
 0x255   :  { %1606 = vmatprep.subr.mxu1 %v5874_v50  ;;  %3910 = vmatprep.subr.mxu0 %v8094_v14 }
 0x256   :  { %1607 = vmatpush1.msra.mxu1 %v5881_v56  ;;  %3911 = vmatpush3.msra.mxu0 %v5887_v59 }
 0x257   :  { %1608 = vmatprep.subr.mxu1 %v5893_v60  ;;  %3912 = vmatprep.subr.mxu0 %v8094_v14  ;;  %v8239_v60 = vld [vmem:[#allocation52_spill] sm:$0xff] }
 0x258   :  { %1609 = vmatpush1.msra.mxu1 %v5900_v54  ;;  %3913 = vmatpush3.msra.mxu0 %v5906_v34 }
 0x259   :  { %1610 = vmatprep.subr.mxu1 %v5912_v51  ;;  %3914 = vmatprep.subr.mxu0 %v8094_v14 }
 0x25a   :  { %1611 = vmatpush1.msra.mxu1 %v5919_v37  ;;  %3915 = vmatpush3.msra.mxu0 %v5925_v49 }
 0x25b   :  { %1612 = vmatprep.subr.mxu1 %v5931_v11  ;;  %3916 = vmatprep.subr.mxu0 %v8094_v14 }
 0x25c   :  { %1613 = vmatpush1.msra.mxu1 %v5938_v12  ;;  %3917 = vmatpush3.msra.mxu0 %v5944_v2 }
 0x25d   :  { %1614 = vmatprep.subr.mxu1 %v5950_v15  ;;  %3918 = vmatprep.subr.mxu0 %v8094_v14 }
 0x25e   :  { %1615 = vmatpush1.msra.mxu1 %v5957_v16  ;;  %3919 = vmatpush3.msra.mxu0 %v5963_v45  ;;  %v8237_v16 = vld [vmem:[#allocation36_spill] sm:$0xff] }
 0x25f   :  { %1616 = vmatprep.subr.mxu1 %v8208_v47  ;;  %3920 = vmatprep.subr.mxu0 %v8094_v14 }
 0x260   :  { %1617 = vmatpush1.msra.mxu1 %v8209_v7  ;;  %3921 = vmatpush3.msra.mxu0 %v6396_v43  ;;  %v8218_v43 = vld [vmem:[#allocation24_spill] sm:$0xff] }
 0x261   :  { %1618 = vmatprep.subr.mxu1 %v8211_v29  ;;  %3922 = vmatprep.subr.mxu0 %v8094_v14  ;;  %v6414_v29 = vld [vmem:[%s7873_s4 + $0xa0] sm:$0xff] }
 0x262   :  { %1619 = vmatpush1.msra.mxu1 %v8212_v21  ;;  %3923 = vmatpush3.msra.mxu0 %v6405_v46  ;;  %8216 = vst [vmem:[#allocation82_spill] sm:$0xff] %v6414_v29  ;;  %v8217_v21 = vld [vmem:[#allocation23_spill] sm:$0xff]  ;;  %v8221_v46 = vld [vmem:[#allocation26_spill] sm:$0xff] }
 0x263   :  { %1620 = vmatprep.subr.mxu1 %v8214_v63  ;;  %3924 = vmatprep.subr.mxu0 %v8094_v14  ;;  %v6423_v63 = vld [vmem:[%s7873_s4 + $0x88] sm:$0xff] }
 0x264   :  { %1621 = vmatpush1.msra.mxu1 %v8215_v44  ;;  %3925 = vmatpush3.msra.mxu0 %v6414_v29  ;;  %8219 = vst [vmem:[#allocation83_spill] sm:$0xff] %v6423_v63  ;;  %v8220_v44 = vld [vmem:[#allocation25_spill] sm:$0xff]  ;;  %v8224_v29 = vld [vmem:[#allocation66_spill] sm:$0xff] }
 0x265   :  { %1622 = vmatprep.subr.mxu1 %v8217_v21  ;;  %3926 = vmatprep.subr.mxu0 %v8094_v14  ;;  %v6432_v21 = vld [vmem:[%s7873_s4 + $0x70] sm:$0xff] }
 0x266   :  { %1623 = vmatpush1.msra.mxu1 %v8218_v43  ;;  %3927 = vmatpush3.msra.mxu0 %v6423_v63  ;;  %8222 = vst [vmem:[#allocation84_spill] sm:$0xff] %v6432_v21  ;;  %v8223_v43 = vld [vmem:[#allocation65_spill] sm:$0xff]  ;;  %v8227_v63 = vld [vmem:[#allocation68_spill] sm:$0xff] }
 0x267   :  { %1624 = vmatprep.subr.mxu1 %v8220_v44  ;;  %3928 = vmatprep.subr.mxu0 %v8094_v14  ;;  %v6441_v44 = vld [vmem:[%s7873_s4 + $0x58] sm:$0xff] }
 0x268   :  { %1625 = vmatpush1.msra.mxu1 %v8221_v46  ;;  %3929 = vmatpush3.msra.mxu0 %v6432_v21  ;;  %8225 = vst [vmem:[#allocation85_spill] sm:$0xff] %v6441_v44  ;;  %v8226_v46 = vld [vmem:[#allocation67_spill] sm:$0xff]  ;;  %v8230_v21 = vld [vmem:[#allocation70_spill] sm:$0xff] }
 0x269   :  { %1626 = vmatprep.subr.mxu1 %v8223_v43  ;;  %3930 = vmatprep.subr.mxu0 %v8094_v14  ;;  %v6450_v43 = vld [vmem:[%s7873_s4 + $0x40] sm:$0xff] }
 0x26a   :  { %1627 = vmatpush1.msra.mxu1 %v8224_v29  ;;  %3931 = vmatpush3.msra.mxu0 %v6441_v44  ;;  %8228 = vst [vmem:[#allocation86_spill] sm:$0xff] %v6450_v43  ;;  %v8229_v29 = vld [vmem:[#allocation69_spill] sm:$0xff]  ;;  %v8233_v44 = vld [vmem:[#allocation72_spill] sm:$0xff] }
 0x26b   :  { %1628 = vmatprep.subr.mxu1 %v8226_v46  ;;  %3932 = vmatprep.subr.mxu0 %v8094_v14  ;;  %v6459_v46 = vld [vmem:[%s7873_s4 + $0x28] sm:$0xff] }
 0x26c   :  { %1629 = vmatpush1.msra.mxu1 %v8227_v63  ;;  %3933 = vmatpush3.msra.mxu0 %v6450_v43  ;;  %8231 = vst [vmem:[#allocation87_spill] sm:$0xff] %v6459_v46  ;;  %v8232_v63 = vld [vmem:[#allocation71_spill] sm:$0xff]  ;;  %v8236_v43 = vld [vmem:[#allocation34_spill] sm:$0xff] }
 0x26d   :  { %1630 = vmatprep.subr.mxu1 %v8229_v29  ;;  %3934 = vmatprep.subr.mxu0 %v8094_v14  ;;  %v6468_v29 = vld [vmem:[%s7873_s4 + $0x10] sm:$0xff] }
 0x26e   :  { %1631 = vmatpush1.msra.mxu1 %v8230_v21  ;;  %3935 = vmatpush3.msra.mxu0 %v6459_v46  ;;  %8234 = vst [vmem:[#allocation88_spill] sm:$0xff] %v6468_v29  ;;  %v8235_v21 = vld [vmem:[#allocation73_spill] sm:$0xff] }
 0x26f   :  { %1632 = vmatprep.subr.mxu1 %v8232_v63  ;;  %3936 = vmatprep.subr.mxu0 %v8094_v14 }
 0x270   :  { %1633 = vmatpush1.msra.mxu1 %v8233_v44  ;;  %3937 = vmatpush3.msra.mxu0 %v6468_v29 }
 0x271   :  { %1666 = vmatprep.mubr.f32.mxu1 %v8094_v14  ;;  %3938 = vmatprep.mubr.msk.f32.mxu0 %vm4627_vm2, %v8094_v14 }
 0x272   :  { %1773 = vmatprep.subr.mxu1 %v8235_v21  ;;  %3941 = vmatprep.subr.mxu0 %v8094_v14  ;;  %v8238_v21 = vld [vmem:[#allocation63_spill] sm:$0xff] }
 0x2ef   :  { %v1322_v63 = vpop.f32.mrf.mxu1  ;;  %v1393_v46 = vpop.f32.mrf.mxu0 }
 0x2f0   :  { %v1397_v44 = vadd.f32 %v1322_v63, %v8236_v43  ;;  %v1411_v37 = vadd.f32 %v8238_v21, %v1393_v46  ;;  %v8240_v43 = vld [vmem:[#allocation42_spill] sm:$0xff] }
 0x2f1   :  { %v3870_v7 = vpop.f32.mrf.mxu0  ;;  %v1324_v45 = vpop.f32.mrf.mxu1 }
 0x2f2   :  { %v3388_v47 = vmul.f32 -1.442695, %v1397_v44  ;;  %v1404_v15 = vadd.f32 %v1324_v45, %v8237_v16 }
 0x2f4   :  { %4309 = vpow2.f32 %v3388_v47  ;;  %v3389_v29 = vmul.f32 -1.442695, %v1404_v15 }
 0x2f6   :  { %4311 = vpow2.f32 %v3389_v29 }
 0x301   :  { %v4310_v2 = vpop.eup %4309 }
 0x302   :  { %v1401_v12 = vadd.f32 1.0, %v4310_v2  ;;  %v8241_v2 = vld [vmem:[#allocation61_spill] sm:$0xff] }
 0x303   :  { %v4312_v11 = vpop.eup %4311 }
 0x304   :  { %4313 = vrcp.f32 %v1401_v12  ;;  %v1408_v49 = vadd.f32 1.0, %v4312_v11 }
 0x306   :  { %4315 = vrcp.f32 %v1408_v49 }
 0x310   :  { %v1493_v51 = vpop.f32.mrf.mxu1  ;;  %v1564_v34 = vpop.f32.mrf.mxu0 }
 0x311   :  { %v4314_v54 = vpop.eup %4313  ;;  %v1568_v63 = vadd.f32 %v1493_v51, %v8239_v60 }
 0x312   :  { %v1412_v7 = vmul.f32 %v4314_v54, %v1411_v37  ;;  %v3905_v44 = vpop.f32.mrf.mxu0  ;;  %v1495_v15 = vpop.f32.mrf.mxu1 }
 0x313   :  { %v3390_v47 = vmul.f32 -1.442695, %v1568_v63  ;;  %v1575_v12 = vadd.f32 %v1495_v15, %v8241_v2  ;;  %v4316_v11 = vpop.eup %4315  ;;  %v6483_v54 = vpop.permute.xlu0 %1422  ;;  %v6520_v63 = vld [vmem:[%s7873_s4 + $0x2c8] sm:$0xff]  ;;  %v6529_v44 = vld [vmem:[%s7873_s4 + $0x2b0] sm:$0xff] }
 0x314   :  { %v1413_v16 = vadd.f32 %v1412_v7, %v8240_v43  ;;  %v1415_v21 = vsub.f32 1.0, %v4316_v11  ;;  %v1417_v60 = vmul.f32 %v4316_v11, %v6117_v57  ;;  %8242 = vst [vmem:[#allocation34_spill] sm:$0xff] %v6483_v54  ;;  %vm1424_vm14 = vcmp.eq.s32.totalorder %v6483_v54, 1  ;;  %v6576_v11 = vld [vmem:[%s7873_s4 + $0x238] sm:$0xff] }
 0x315   :  { %4317 = vpow2.f32 %v3390_v47  ;;  %v3391_v45 = vmul.f32 -1.442695, %v1575_v12  ;;  %v1582_v47 = vadd.f32 %v5758_v8, %v1564_v34  ;;  %v6548_v8 = vld [vmem:[%s7873_s4 + $0x280] sm:$0xff]  ;;  %v6558_v12 = vld [vmem:[%s7873_s4 + $0x268] sm:$0xff]  ;;  %v8284_v54 = vld [vmem:[#allocation69_spill] sm:$0xff] }
 0x316   :  { %4319 = vtanh.f32 %v1413_v16  ;;  %v6539_v16 = vld [vmem:[%s7873_s4 + $0x298] sm:$0xff]  ;;  %v8243_v34 = vld [vmem:[#allocation62_spill] sm:$0xff] }
 0x317   :  { %4321 = vpow2.f32 %v3391_v45  ;;  %v6567_v45 = vld [vmem:[%s7873_s4 + $0x250] sm:$0xff] }
 0x322   :  { %v4318_v29 = vpop.eup %4317 }
 0x323   :  { %v4320_v46 = vpop.eup %4319  ;;  %v1572_v59 = vadd.f32 1.0, %v4318_v29  ;;  %v6585_v29 = vld [vmem:[%s7873_s4 + $0x220] sm:$0xff] }
 0x324   :  { %v1416_v56 = vmul.f32 %v4320_v46, %v1415_v21  ;;  %v6594_v21 = vld [vmem:[%s7873_s4 + $0x208] sm:$0xff] }
 0x325   :  { %4323 = vrcp.f32 %v1572_v59  ;;  %v4322_v59 = vpop.eup %4321 }
 0x326   :  { %v1418_v51 = vadd.f32 %v1417_v60, %v1416_v56  ;;  %v6502_v56 = vld [vmem:[%s7873_s4 + $0x2f8] sm:$0xff]  ;;  %v1579_v7 = vadd.f32 1.0, %v4322_v59  ;;  %v6603_v60 = vld [vmem:[%s7873_s4 + $0x1f0] sm:$0xff] }
 0x328   :  { %v6489_v37 = vsel %vm1424_vm14, %v1418_v51, %v6117_v57  ;;  %v1426_v49 = vsel %vm1424_vm14, %v1418_v51, 0.0  ;;  %v6511_v57 = vld [vmem:[%s7873_s4 + $0x2e0] sm:$0xff]  ;;  %4325 = vrcp.f32 %v1579_v7  ;;  %v6612_v51 = vld [vmem:[%s7873_s4 + $0x1d8] sm:$0xff] }
 0x329   :  { %3392 = vst [vmem:[%s7877_s6 + $0x10] sm:$0xff] %v1426_v49  ;;  %1667 = vmatmul.mubr.f32.vlgmr.msra.gmra.mxu1 %v6489_v37  ;;  %3939 = vmatmul.mubr.f32.vlgmr.msra.gmra.mxu0 %v6489_v37  ;;  %v6621_v7 = vld [vmem:[%s7873_s4 + $0x1c0] sm:$0xff] }
 0x32a   :  { %1774 = vmatpush1.msra.mxu1 %v6127_v4  ;;  %3942 = vmatpush3.msra.mxu0 %v6502_v56  ;;  %8244 = vst [vmem:[#allocation36_spill] sm:$0xff] %v6621_v7 }
 0x32b   :  { %1775 = vmatprep.subr.mxu1 %v6134_v6  ;;  %3943 = vmatprep.subr.mxu0 %v8094_v14 }
 0x32c   :  { %1776 = vmatpush1.msra.mxu1 %v6141_v5  ;;  %3944 = vmatpush3.msra.mxu0 %v6511_v57 }
 0x32d   :  { %1777 = vmatprep.subr.mxu1 %v6148_v27  ;;  %3945 = vmatprep.subr.mxu0 %v8094_v14 }
 0x32e   :  { %1778 = vmatpush1.msra.mxu1 %v6155_v33  ;;  %3946 = vmatpush3.msra.mxu0 %v6520_v63 }
 0x32f   :  { %1779 = vmatprep.subr.mxu1 %v6162_v3  ;;  %3947 = vmatprep.subr.mxu0 %v8094_v14 }
 0x330   :  { %1780 = vmatpush1.msra.mxu1 %v6169_v26  ;;  %3948 = vmatpush3.msra.mxu0 %v6529_v44 }
 0x331   :  { %1781 = vmatprep.subr.mxu1 %v6177_v18  ;;  %3949 = vmatprep.subr.mxu0 %v8094_v14 }
 0x332   :  { %v4324_v43 = vpop.eup %4323  ;;  %1782 = vmatpush1.msra.mxu1 %v6184_v0  ;;  %3950 = vmatpush3.msra.mxu0 %v6539_v16 }
 0x333   :  { %v1583_v15 = vmul.f32 %v4324_v43, %v1582_v47  ;;  %1783 = vmatprep.subr.mxu1 %v6191_v17  ;;  %3951 = vmatprep.subr.mxu0 %v8094_v14 }
 0x334   :  { %1784 = vmatpush1.msra.mxu1 %v6198_v19  ;;  %3952 = vmatpush3.msra.mxu0 %v6548_v8 }
 0x335   :  { %v1584_v2 = vadd.f32 %v1583_v15, %v8243_v34  ;;  %1785 = vmatprep.subr.mxu1 %v6206_v24  ;;  %3953 = vmatprep.subr.mxu0 %v8094_v14  ;;  %v4326_v46 = vpop.eup %4325  ;;  %v6631_v15 = vld [vmem:[%s7873_s4 + $0x1a8] sm:$0xff]  ;;  %v6634_v34 = vpop.permute.xlu1 %1593 }
 0x336   :  { %1786 = vmatpush1.msra.mxu1 %v6213_v31  ;;  %3954 = vmatpush3.msra.mxu0 %v6558_v12  ;;  %v1586_v49 = vsub.f32 1.0, %v4326_v46  ;;  %v1588_v43 = vmul.f32 %v4326_v46, %v6355_v28  ;;  %8245 = vst [vmem:[#allocation63_spill] sm:$0xff] %v6631_v15  ;;  %8246 = vst [vmem:[#allocation52_spill] sm:$0xff] %v6634_v34  ;;  %vm1595_vm15 = vcmp.eq.s32.totalorder %v6634_v34, 1  ;;  %v6644_v46 = vld [vmem:[%s7873_s4 + $0x190] sm:$0xff]  ;;  %v8287_v34 = vld [vmem:[#allocation71_spill] sm:$0xff] }
 0x337   :  { %4327 = vtanh.f32 %v1584_v2  ;;  %1787 = vmatprep.subr.mxu1 %v6220_v22  ;;  %3955 = vmatprep.subr.mxu0 %v8094_v14  ;;  %8247 = vst [vmem:[#allocation42_spill] sm:$0xff] %v6644_v46 }
 0x338   :  { %1788 = vmatpush1.msra.mxu1 %v6227_v55  ;;  %3956 = vmatpush3.msra.mxu0 %v6567_v45 }
 0x339   :  { %1789 = vmatprep.subr.mxu1 %v6234_v35  ;;  %3957 = vmatprep.subr.mxu0 %v8094_v14 }
 0x33a   :  { %1790 = vmatpush1.msra.mxu1 %v6241_v38  ;;  %3958 = vmatpush3.msra.mxu0 %v6576_v11 }
 0x33b   :  { %1791 = vmatprep.subr.mxu1 %v6248_v36  ;;  %3959 = vmatprep.subr.mxu0 %v8094_v14 }
 0x33c   :  { %1792 = vmatpush1.msra.mxu1 %v6255_v9  ;;  %3960 = vmatpush3.msra.mxu0 %v6585_v29 }
 0x33d   :  { %1793 = vmatprep.subr.mxu1 %v6262_v39  ;;  %3961 = vmatprep.subr.mxu0 %v8094_v14 }
 0x33e   :  { %1794 = vmatpush1.msra.mxu1 %v6269_v23  ;;  %3962 = vmatpush3.msra.mxu0 %v6594_v21 }
 0x33f   :  { %1795 = vmatprep.subr.mxu1 %v6276_v40  ;;  %3963 = vmatprep.subr.mxu0 %v8094_v14 }
 0x340   :  { %1796 = vmatpush1.msra.mxu1 %v6283_v48  ;;  %3964 = vmatpush3.msra.mxu0 %v6603_v60 }
 0x341   :  { %1797 = vmatprep.subr.mxu1 %v6290_v41  ;;  %3965 = vmatprep.subr.mxu0 %v8094_v14 }
 0x342   :  { %1798 = vmatpush1.msra.mxu1 %v6297_v1  ;;  %3966 = vmatpush3.msra.mxu0 %v6612_v51 }
 0x343   :  { %1799 = vmatprep.subr.mxu1 %v6304_v42  ;;  %3967 = vmatprep.subr.mxu0 %v8094_v14 }
 0x344   :  { %v4328_v59 = vpop.eup %4327  ;;  %1800 = vmatpush1.msra.mxu1 %v6311_v30  ;;  %3968 = vmatpush3.msra.mxu0 %v6621_v7  ;;  %v6741_v7 = vpop.permute.xlu0 %1768 }
 0x345   :  { %1801 = vmatprep.subr.mxu1 %v6319_v13  ;;  %3969 = vmatprep.subr.mxu0 %v8094_v14  ;;  %v1587_v47 = vmul.f32 %v4328_v59, %v1586_v49  ;;  %vm1770_vm0 = vcmp.eq.s32.totalorder %v6741_v7, 1 }
 0x346   :  { %1802 = vmatpush1.msra.mxu1 %v6326_v20  ;;  %3970 = vmatpush3.msra.mxu0 %v6631_v15 }
 0x347   :  { %1803 = vmatprep.subr.mxu1 %v6335_v58  ;;  %3971 = vmatprep.subr.mxu0 %v8094_v14  ;;  %v1589_v2 = vadd.f32 %v1588_v43, %v1587_v47  ;;  %v8251_v47 = vld [vmem:[#allocation5_spill] sm:$0xff]  ;;  %v8258_v43 = vld [vmem:[#allocation12_spill] sm:$0xff] }
 0x348   :  { %1804 = vmatpush1.msra.mxu1 %v6343_v25  ;;  %1837 = vmatprep.mubr.f32.mxu1 %v8094_v14 }
 0x349   :  { %3972 = vmatpush3.msra.mxu0 %v6644_v46  ;;  %3973 = vmatprep.mubr.msk.f32.mxu0 %vm4627_vm2, %v8094_v14  ;;  %v6652_v49 = vsel %vm1595_vm15, %v1589_v2, %v6355_v28  ;;  %v1597_v59 = vsel %vm1595_vm15, %v1589_v2, 0.0  ;;  %v8249_v28 = vld [vmem:[#allocation3_spill] sm:$0xff]  ;;  %v8259_v2 = vld [vmem:[#allocation13_spill] sm:$0xff] }
 0x34a   :  { %8248 = vst [vmem:[#allocation61_spill] sm:$0xff] %v6652_v49  ;;  %3393 = vst [vmem:[%s7878_s7 + $0x28] sm:$0xff] %v1597_v59  ;;  %1838 = vmatmul.mubr.f32.vlgmr.msra.gmra.mxu1 %v6652_v49  ;;  %3974 = vmatmul.mubr.f32.vlgmr.msra.gmra.mxu0 %v6652_v49  ;;  %v8260_v59 = vld [vmem:[#allocation14_spill] sm:$0xff] }
 0x34b   :  { %1948 = vmatprep.subr.mxu1 %v5832_v10  ;;  %3976 = vmatprep.subr.mxu0 %v8094_v14  ;;  %v8250_v10 = vld [vmem:[#allocation4_spill] sm:$0xff] }
 0x34c   :  { %1949 = vmatpush1.msra.mxu1 %v5843_v53  ;;  %3977 = vmatpush3.msra.mxu0 %v5849_v61  ;;  %v8252_v53 = vld [vmem:[#allocation6_spill] sm:$0xff]  ;;  %v8253_v61 = vld [vmem:[#allocation7_spill] sm:$0xff] }
 0x34d   :  { %1950 = vmatprep.subr.mxu1 %v5855_v62  ;;  %3978 = vmatprep.subr.mxu0 %v8094_v14  ;;  %v8254_v62 = vld [vmem:[#allocation8_spill] sm:$0xff] }
 0x34e   :  { %1951 = vmatpush1.msra.mxu1 %v5862_v32  ;;  %3979 = vmatpush3.msra.mxu0 %v5868_v52  ;;  %v8255_v32 = vld [vmem:[#allocation9_spill] sm:$0xff]  ;;  %v8256_v52 = vld [vmem:[#allocation10_spill] sm:$0xff] }
 0x34f   :  { %1952 = vmatprep.subr.mxu1 %v5874_v50  ;;  %3980 = vmatprep.subr.mxu0 %v8094_v14  ;;  %v8257_v50 = vld [vmem:[#allocation11_spill] sm:$0xff] }
 0x350   :  { %1953 = vmatpush1.msra.mxu1 %v8249_v28  ;;  %3981 = vmatpush3.msra.mxu0 %v8250_v10  ;;  %v8261_v28 = vld [vmem:[#allocation15_spill] sm:$0xff]  ;;  %v8262_v10 = vld [vmem:[#allocation16_spill] sm:$0xff] }
 0x351   :  { %1954 = vmatprep.subr.mxu1 %v8251_v47  ;;  %3982 = vmatprep.subr.mxu0 %v8094_v14  ;;  %v8263_v47 = vld [vmem:[#allocation17_spill] sm:$0xff] }
 0x352   :  { %1955 = vmatpush1.msra.mxu1 %v8252_v53  ;;  %3983 = vmatpush3.msra.mxu0 %v8253_v61  ;;  %v8264_v53 = vld [vmem:[#allocation18_spill] sm:$0xff]  ;;  %v8265_v61 = vld [vmem:[#allocation80_spill] sm:$0xff] }
 0x353   :  { %1956 = vmatprep.subr.mxu1 %v8254_v62  ;;  %3984 = vmatprep.subr.mxu0 %v8094_v14  ;;  %v8266_v62 = vld [vmem:[#allocation19_spill] sm:$0xff] }
 0x354   :  { %1957 = vmatpush1.msra.mxu1 %v8255_v32  ;;  %3985 = vmatpush3.msra.mxu0 %v8256_v52  ;;  %v8267_v32 = vld [vmem:[#allocation20_spill] sm:$0xff]  ;;  %v8268_v52 = vld [vmem:[#allocation81_spill] sm:$0xff] }
 0x355   :  { %1958 = vmatprep.subr.mxu1 %v8257_v50  ;;  %3986 = vmatprep.subr.mxu0 %v8094_v14  ;;  %v8269_v50 = vld [vmem:[#allocation21_spill] sm:$0xff] }
 0x356   :  { %1959 = vmatpush1.msra.mxu1 %v8258_v43  ;;  %3987 = vmatpush3.msra.mxu0 %v8259_v2  ;;  %v8270_v43 = vld [vmem:[#allocation22_spill] sm:$0xff] }
 0x357   :  { %1960 = vmatprep.subr.mxu1 %v8260_v59  ;;  %3988 = vmatprep.subr.mxu0 %v8094_v14  ;;  %v8271_v2 = vld [vmem:[#allocation82_spill] sm:$0xff]  ;;  %v8272_v59 = vld [vmem:[#allocation23_spill] sm:$0xff] }
 0x358   :  { %1961 = vmatpush1.msra.mxu1 %v8261_v28  ;;  %3989 = vmatpush3.msra.mxu0 %v8262_v10  ;;  %v8273_v28 = vld [vmem:[#allocation24_spill] sm:$0xff]  ;;  %v8274_v10 = vld [vmem:[#allocation83_spill] sm:$0xff] }
 0x359   :  { %1962 = vmatprep.subr.mxu1 %v8263_v47  ;;  %3990 = vmatprep.subr.mxu0 %v8094_v14  ;;  %v8275_v47 = vld [vmem:[#allocation25_spill] sm:$0xff] }
 0x35a   :  { %1963 = vmatpush1.msra.mxu1 %v8264_v53  ;;  %3991 = vmatpush3.msra.mxu0 %v8265_v61  ;;  %v8276_v53 = vld [vmem:[#allocation26_spill] sm:$0xff] }
 0x35b   :  { %1964 = vmatprep.subr.mxu1 %v8266_v62  ;;  %3992 = vmatprep.subr.mxu0 %v8094_v14  ;;  %v8277_v62 = vld [vmem:[#allocation84_spill] sm:$0xff] }
 0x35c   :  { %1965 = vmatpush1.msra.mxu1 %v8267_v32  ;;  %3993 = vmatpush3.msra.mxu0 %v8268_v52  ;;  %v8278_v32 = vld [vmem:[#allocation65_spill] sm:$0xff] }
 0x35d   :  { %1966 = vmatprep.subr.mxu1 %v8269_v50  ;;  %3994 = vmatprep.subr.mxu0 %v8094_v14  ;;  %v8279_v50 = vld [vmem:[#allocation66_spill] sm:$0xff] }
 0x35e   :  { %1967 = vmatpush1.msra.mxu1 %v8270_v43  ;;  %3995 = vmatpush3.msra.mxu0 %v8271_v2  ;;  %v8280_v43 = vld [vmem:[#allocation85_spill] sm:$0xff] }
 0x35f   :  { %1968 = vmatprep.subr.mxu1 %v8272_v59  ;;  %3996 = vmatprep.subr.mxu0 %v8094_v14  ;;  %v8281_v59 = vld [vmem:[#allocation67_spill] sm:$0xff] }
 0x360   :  { %1969 = vmatpush1.msra.mxu1 %v8273_v28  ;;  %3997 = vmatpush3.msra.mxu0 %v8274_v10  ;;  %v8282_v28 = vld [vmem:[#allocation68_spill] sm:$0xff] }
 0x361   :  { %1970 = vmatprep.subr.mxu1 %v8275_v47  ;;  %3998 = vmatprep.subr.mxu0 %v8094_v14  ;;  %v8283_v47 = vld [vmem:[#allocation86_spill] sm:$0xff] }
 0x362   :  { %1971 = vmatpush1.msra.mxu1 %v8276_v53  ;;  %3999 = vmatpush3.msra.mxu0 %v8277_v62  ;;  %v8285_v53 = vld [vmem:[#allocation70_spill] sm:$0xff] }
 0x363   :  { %1972 = vmatprep.subr.mxu1 %v8278_v32  ;;  %4000 = vmatprep.subr.mxu0 %v8094_v14  ;;  %v8286_v32 = vld [vmem:[#allocation87_spill] sm:$0xff] }
 0x364   :  { %1973 = vmatpush1.msra.mxu1 %v8279_v50  ;;  %4001 = vmatpush3.msra.mxu0 %v8280_v43  ;;  %v8288_v50 = vld [vmem:[#allocation72_spill] sm:$0xff] }
 0x365   :  { %1974 = vmatprep.subr.mxu1 %v8281_v59  ;;  %4002 = vmatprep.subr.mxu0 %v8094_v14  ;;  %v8289_v59 = vld [vmem:[#allocation88_spill] sm:$0xff] }
 0x366   :  { %1975 = vmatpush1.msra.mxu1 %v8282_v28  ;;  %4003 = vmatpush3.msra.mxu0 %v8283_v47 }
 0x367   :  { %1976 = vmatprep.subr.mxu1 %v8284_v54  ;;  %4004 = vmatprep.subr.mxu0 %v8094_v14  ;;  %v8290_v54 = vld [vmem:[#allocation73_spill] sm:$0xff] }
 0x368   :  { %1977 = vmatpush1.msra.mxu1 %v8285_v53  ;;  %4005 = vmatpush3.msra.mxu0 %v8286_v32  ;;  %v8291_v32 = vld [vmem:[#allocation38_spill] sm:$0xff] }
 0x369   :  { %1978 = vmatprep.subr.mxu1 %v8287_v34  ;;  %4006 = vmatprep.subr.mxu0 %v8094_v14 }
 0x36a   :  { %1979 = vmatpush1.msra.mxu1 %v8288_v50  ;;  %4007 = vmatpush3.msra.mxu0 %v8289_v59  ;;  %v8292_v50 = vld [vmem:[#allocation39_spill] sm:$0xff] }
 0x36b   :  { %2012 = vmatprep.mubr.f32.mxu1 %v8094_v14  ;;  %4008 = vmatprep.mubr.msk.f32.mxu0 %vm4627_vm2, %v8094_v14 }
 0x36c   :  { %2113 = vmatprep.subr.mxu1 %v8290_v54  ;;  %4011 = vmatprep.subr.mxu0 %v8094_v14  ;;  %v6735_v54 = vld [vmem:[%s7876_s5] ss:$0 sm:$0xff] }
 0x36d   :  { %8293 = vst [vmem:[#allocation62_spill] sm:$0xff] %v6735_v54 }
 0x3e9   :  { %v1668_v28 = vpop.f32.mrf.mxu1  ;;  %v1739_v53 = vpop.f32.mrf.mxu0 }
 0x3ea   :  { %v1743_v47 = vadd.f32 %v1668_v28, %v8291_v32  ;;  %v1757_v32 = vadd.f32 %v6735_v54, %v1739_v53 }
 0x3eb   :  { %v3940_v34 = vpop.f32.mrf.mxu0  ;;  %v1670_v62 = vpop.f32.mrf.mxu1 }
 0x3ec   :  { %v3394_v43 = vmul.f32 -1.442695, %v1743_v47  ;;  %v1750_v10 = vadd.f32 %v1670_v62, %v8292_v50 }
 0x3ee   :  { %4329 = vpow2.f32 %v3394_v43  ;;  %v3395_v59 = vmul.f32 -1.442695, %v1750_v10  ;;  %v8294_v43 = vld [vmem:[#allocation48_spill] sm:$0xff] }
 0x3f0   :  { %4331 = vpow2.f32 %v3395_v59 }
 0x3fb   :  { %v4330_v2 = vpop.eup %4329 }
 0x3fc   :  { %v1747_v52 = vadd.f32 1.0, %v4330_v2  ;;  %v8295_v2 = vld [vmem:[#allocation45_spill] sm:$0xff] }
 0x3fd   :  { %v4332_v61 = vpop.eup %4331 }
 0x3fe   :  { %4333 = vrcp.f32 %v1747_v52  ;;  %v1754_v46 = vadd.f32 1.0, %v4332_v61  ;;  %v8296_v61 = vld [vmem:[#allocation59_spill] sm:$0xff] }
 0x400   :  { %4335 = vrcp.f32 %v1754_v46 }
 0x40a   :  { %v1839_v28 = vpop.f32.mrf.mxu1  ;;  %v1910_v47 = vpop.f32.mrf.mxu0 }
 0x40b   :  { %v4334_v34 = vpop.eup %4333  ;;  %v1914_v25 = vadd.f32 %v1839_v28, %v8294_v43  ;;  %v6912_v43 = vld [vmem:[%s7873_s4 + $0x120] sm:$0xff] }
 0x40c   :  { %v1758_v62 = vmul.f32 %v4334_v34, %v1757_v32  ;;  %v3975_v10 = vpop.f32.mrf.mxu0  ;;  %v1841_v50 = vpop.f32.mrf.mxu1  ;;  %v6905_v34 = vld [vmem:[%s7873_s4 + $0x128] sm:$0xff]  ;;  %8309 = vst [vmem:[#allocation6_spill] sm:$0xff] %v6912_v43 }
 0x40d   :  { %v3396_v59 = vmul.f32 -1.442695, %v1914_v25  ;;  %v1921_v58 = vadd.f32 %v1841_v50, %v8296_v61  ;;  %v4336_v20 = vpop.eup %4335  ;;  %8308 = vst [vmem:[#allocation5_spill] sm:$0xff] %v6905_v34  ;;  %v6924_v10 = vld [vmem:[%s7873_s4 + $0x110] sm:$0xff]  ;;  %v6956_v61 = vld [vmem:[%s7873_s4 + $0x100] sm:$0xff] }
 0x40e   :  { %v1759_v52 = vadd.f32 %v1758_v62, %v8295_v2  ;;  %v1761_v54 = vsub.f32 1.0, %v4336_v20  ;;  %v1763_v46 = vmul.f32 %v4336_v20, %v6489_v37  ;;  %v6867_v20 = vld [vmem:[%s7873_s4 + $0x158] sm:$0xff]  ;;  %v6918_v62 = vld [vmem:[%s7873_s4 + $0x130] sm:$0xff]  ;;  %8311 = vst [vmem:[#allocation8_spill] sm:$0xff] %v6924_v10  ;;  %8316 = vst [vmem:[#allocation13_spill] sm:$0xff] %v6956_v61 }
 0x40f   :  { %4337 = vpow2.f32 %v3396_v59  ;;  %v3397_v15 = vmul.f32 -1.442695, %v1921_v58  ;;  %8310 = vst [vmem:[#allocation7_spill] sm:$0xff] %v6918_v62  ;;  %v6931_v59 = vld [vmem:[%s7873_s4 + $0x108] sm:$0xff]  ;;  %v6937_v2 = vld [vmem:[%s7873_s4 + $0x118] sm:$0xff]  ;;  %v6950_v50 = vld [vmem:[%s7873_s4 + $0xf0] sm:$0xff] }
 0x410   :  { %4339 = vtanh.f32 %v1759_v52  ;;  %8312 = vst [vmem:[#allocation9_spill] sm:$0xff] %v6931_v59  ;;  %8313 = vst [vmem:[#allocation10_spill] sm:$0xff] %v6937_v2  ;;  %v6943_v52 = vld [vmem:[%s7873_s4 + $0xf8] sm:$0xff] }
 0x411   :  { %4341 = vpow2.f32 %v3397_v15  ;;  %v6880_v15 = vld [vmem:[%s7873_s4 + $0x160] sm:$0xff]  ;;  %8314 = vst [vmem:[#allocation11_spill] sm:$0xff] %v6943_v52  ;;  %8315 = vst [vmem:[#allocation12_spill] sm:$0xff] %v6950_v50 }
 0x41c   :  { %v4338_v53 = vpop.eup %4337 }
 0x41d   :  { %v4340_v49 = vpop.eup %4339  ;;  %v1918_v13 = vadd.f32 1.0, %v4338_v53  ;;  %v6962_v53 = vld [vmem:[%s7873_s4 + $0xe0] sm:$0xff] }
 0x41e   :  { %v1762_v32 = vmul.f32 %v4340_v49, %v1761_v54  ;;  %v6886_v49 = vld [vmem:[%s7873_s4 + $0x140] sm:$0xff]  ;;  %v6893_v54 = vld [vmem:[%s7873_s4 + $0x138] sm:$0xff]  ;;  %8317 = vst [vmem:[#allocation14_spill] sm:$0xff] %v6962_v53 }
 0x41f   :  { %4343 = vrcp.f32 %v1918_v13  ;;  %v4342_v13 = vpop.eup %4341  ;;  %8306 = vst [vmem:[#allocation3_spill] sm:$0xff] %v6893_v54 }
 0x420   :  { %v1764_v25 = vadd.f32 %v1763_v46, %v1762_v32  ;;  %v6969_v32 = vld [vmem:[%s7873_s4 + $0xd8] sm:$0xff]  ;;  %v6975_v46 = vld [vmem:[%s7873_s4 + $0xe8] sm:$0xff] }
 0x421   :  { %8318 = vst [vmem:[#allocation15_spill] sm:$0xff] %v6969_v32  ;;  %8319 = vst [vmem:[#allocation16_spill] sm:$0xff] %v6975_v46 }
 0x422   :  { %v6748_v28 = vsel %vm1770_vm0, %v1764_v25, %v6489_v37  ;;  %v1772_v58 = vsel %vm1770_vm0, %v1764_v25, 0.0  ;;  %v6874_v37 = vld [vmem:[%s7873_s4 + $0x150] sm:$0xff]  ;;  %v6981_v25 = vld [vmem:[%s7873_s4 + $0xc8] sm:$0xff] }
 0x423   :  { %3398 = vst [vmem:[%s7877_s6 + $0x18] sm:$0xff] %v1772_v58  ;;  %2013 = vmatmul.mubr.f32.vlgmr.msra.gmra.mxu1 %v6748_v28  ;;  %4009 = vmatmul.mubr.f32.vlgmr.msra.gmra.mxu0 %v6748_v28  ;;  %8320 = vst [vmem:[#allocation17_spill] sm:$0xff] %v6981_v25  ;;  %v6988_v58 = vld [vmem:[%s7873_s4 + $0xc0] sm:$0xff] }
 0x424   :  { %2114 = vmatpush1.msra.mxu1 %v6127_v4  ;;  %4012 = vmatpush3.msra.mxu0 %v6502_v56  ;;  %v1925_v4 = vadd.f32 1.0, %v4342_v13  ;;  %8321 = vst [vmem:[#allocation18_spill] sm:$0xff] %v6988_v58  ;;  %v8322_v13 = vld [vmem:[#allocation80_spill] sm:$0xff] }
 0x425   :  { %2115 = vmatprep.subr.mxu1 %v6134_v6  ;;  %4013 = vmatprep.subr.mxu0 %v8094_v14  ;;  %v6774_v6 = vld [vmem:[%s7876_s5 + $0x1] ss:$0 sm:$0xff] }
 0x426   :  { %2116 = vmatpush1.msra.mxu1 %v6141_v5  ;;  %4014 = vmatpush3.msra.mxu0 %v6511_v57  ;;  %v1928_v5 = vadd.f32 %v6774_v6, %v1910_v47  ;;  %4345 = vrcp.f32 %v1925_v4  ;;  %v6899_v47 = vld [vmem:[%s7873_s4 + $0x148] sm:$0xff]  ;;  %v6995_v4 = vld [vmem:[%s7873_s4 + $0xb0] sm:$0xff] }
 0x427   :  { %2117 = vmatprep.subr.mxu1 %v6148_v27  ;;  %4015 = vmatprep.subr.mxu0 %v8094_v14  ;;  %8307 = vst [vmem:[#allocation4_spill] sm:$0xff] %v6899_v47  ;;  %8323 = vst [vmem:[#allocation19_spill] sm:$0xff] %v6995_v4 }
 0x428   :  { %2118 = vmatpush1.msra.mxu1 %v6155_v33  ;;  %4016 = vmatpush3.msra.mxu0 %v6520_v63  ;;  %v8359_v7 = vld [vmem:[#allocation16_spill] sm:$0xff] }
 0x429   :  { %2119 = vmatprep.subr.mxu1 %v6162_v3  ;;  %4017 = vmatprep.subr.mxu0 %v8094_v14  ;;  %v8297_v3 = vld [vmem:[#allocation60_spill] sm:$0xff] }
 0x42a   :  { %2120 = vmatpush1.msra.mxu1 %v6169_v26  ;;  %4018 = vmatpush3.msra.mxu0 %v6529_v44 }
 0x42b   :  { %2121 = vmatprep.subr.mxu1 %v6177_v18  ;;  %4019 = vmatprep.subr.mxu0 %v8094_v14 }
 0x42c   :  { %v4344_v27 = vpop.eup %4343  ;;  %2122 = vmatpush1.msra.mxu1 %v6184_v0  ;;  %4020 = vmatpush3.msra.mxu0 %v6539_v16 }
 0x42d   :  { %v1929_v33 = vmul.f32 %v4344_v27, %v1928_v5  ;;  %2123 = vmatprep.subr.mxu1 %v6191_v17  ;;  %4021 = vmatprep.subr.mxu0 %v8094_v14  ;;  %v7002_v5 = vld [vmem:[%s7873_s4 + $0xa8] sm:$0xff]  ;;  %v8325_v27 = vld [vmem:[#allocation81_spill] sm:$0xff] }
 0x42e   :  { %2124 = vmatpush1.msra.mxu1 %v6198_v19  ;;  %4022 = vmatpush3.msra.mxu0 %v6548_v8  ;;  %v8298_v19 = vld [vmem:[#allocation36_spill] sm:$0xff]  ;;  %8324 = vst [vmem:[#allocation20_spill] sm:$0xff] %v7002_v5 }
 0x42f   :  { %v1930_v26 = vadd.f32 %v1929_v33, %v8297_v3  ;;  %2125 = vmatprep.subr.mxu1 %v6206_v24  ;;  %4023 = vmatprep.subr.mxu0 %v8094_v14  ;;  %v6818_v24 = vpop.permute.xlu1 %1939  ;;  %v7009_v33 = vld [vmem:[%s7873_s4 + $0x98] sm:$0xff]  ;;  %v7016_v3 = vld [vmem:[%s7873_s4 + $0x90] sm:$0xff] }
 0x430   :  { %2126 = vmatpush1.msra.mxu1 %v6213_v31  ;;  %4024 = vmatpush3.msra.mxu0 %v6558_v12  ;;  %v8299_v31 = vld [vmem:[#allocation75_spill] sm:$0xff]  ;;  %vm1941_vm1 = vcmp.eq.s32.totalorder %v6818_v24, 1  ;;  %8326 = vst [vmem:[#allocation21_spill] sm:$0xff] %v7009_v33  ;;  %8327 = vst [vmem:[#allocation22_spill] sm:$0xff] %v7016_v3 }
 0x431   :  { %4347 = vtanh.f32 %v1930_v26  ;;  %2127 = vmatprep.subr.mxu1 %v6220_v22  ;;  %4025 = vmatprep.subr.mxu0 %v8094_v14  ;;  %v8328_v26 = vld [vmem:[#allocation82_spill] sm:$0xff] }
 0x432   :  { %2128 = vmatpush1.msra.mxu1 %v6227_v55  ;;  %4026 = vmatpush3.msra.mxu0 %v6567_v45  ;;  %v8300_v55 = vld [vmem:[#allocation61_spill] sm:$0xff] }
 0x433   :  { %2129 = vmatprep.subr.mxu1 %v6234_v35  ;;  %4027 = vmatprep.subr.mxu0 %v8094_v14  ;;  %v4346_v18 = vpop.eup %4345 }
 0x434   :  { %2130 = vmatpush1.msra.mxu1 %v6241_v38  ;;  %4028 = vmatpush3.msra.mxu0 %v6576_v11  ;;  %v1932_v0 = vsub.f32 1.0, %v4346_v18  ;;  %v1934_v35 = vmul.f32 %v4346_v18, %v8300_v55  ;;  %v8301_v38 = vld [vmem:[#allocation76_spill] sm:$0xff]  ;;  %v7023_v18 = vld [vmem:[%s7873_s4 + $0x80] sm:$0xff] }
 0x435   :  { %2131 = vmatprep.subr.mxu1 %v6248_v36  ;;  %4029 = vmatprep.subr.mxu0 %v8094_v14  ;;  %v8302_v36 = vld [vmem:[#allocation63_spill] sm:$0xff]  ;;  %8329 = vst [vmem:[#allocation23_spill] sm:$0xff] %v7023_v18 }
 0x436   :  { %2132 = vmatpush1.msra.mxu1 %v6255_v9  ;;  %4030 = vmatpush3.msra.mxu0 %v6585_v29  ;;  %v8303_v9 = vld [vmem:[#allocation78_spill] sm:$0xff] }
 0x437   :  { %2133 = vmatprep.subr.mxu1 %v6262_v39  ;;  %4031 = vmatprep.subr.mxu0 %v8094_v14 }
 0x438   :  { %2134 = vmatpush1.msra.mxu1 %v6269_v23  ;;  %4032 = vmatpush3.msra.mxu0 %v6594_v21  ;;  %v8304_v23 = vld [vmem:[#allocation79_spill] sm:$0xff] }
 0x439   :  { %2135 = vmatprep.subr.mxu1 %v6276_v40  ;;  %4033 = vmatprep.subr.mxu0 %v8094_v14  ;;  %v8305_v40 = vld [vmem:[#allocation42_spill] sm:$0xff] }
 0x43a   :  { %2136 = vmatpush1.msra.mxu1 %v6283_v48  ;;  %4034 = vmatpush3.msra.mxu0 %v6603_v60 }
 0x43b   :  { %2137 = vmatprep.subr.mxu1 %v6290_v41  ;;  %4035 = vmatprep.subr.mxu0 %v8094_v14 }
 0x43c   :  { %2138 = vmatpush1.msra.mxu1 %v6297_v1  ;;  %4036 = vmatpush3.msra.mxu0 %v6612_v51  ;;  %v6848_v1 = vld [vmem:[%s7873_s4 + $0x170] sm:$0xff] }
 0x43d   :  { %2139 = vmatprep.subr.mxu1 %v6304_v42  ;;  %4037 = vmatprep.subr.mxu0 %v8094_v14  ;;  %v6855_v42 = vld [vmem:[%s7873_s4 + $0x168] sm:$0xff] }
 0x43e   :  { %v4348_v17 = vpop.eup %4347  ;;  %2140 = vmatpush1.msra.mxu1 %v6311_v30  ;;  %4038 = vmatpush3.msra.mxu0 %v8298_v19  ;;  %v6861_v30 = vld [vmem:[%s7873_s4 + $0x178] sm:$0xff] }
 0x43f   :  { %2141 = vmatprep.subr.mxu1 %v8299_v31  ;;  %4039 = vmatprep.subr.mxu0 %v8094_v14  ;;  %v1933_v22 = vmul.f32 %v4348_v17, %v1932_v0  ;;  %v7030_v0 = vld [vmem:[%s7873_s4 + $0x78] sm:$0xff]  ;;  %v8331_v17 = vld [vmem:[#allocation83_spill] sm:$0xff] }
 0x440   :  { %2142 = vmatpush1.msra.mxu1 %v8301_v38  ;;  %4040 = vmatpush3.msra.mxu0 %v8302_v36  ;;  %8330 = vst [vmem:[#allocation24_spill] sm:$0xff] %v7030_v0  ;;  %v7037_v31 = vld [vmem:[%s7873_s4 + $0x68] sm:$0xff] }
 0x441   :  { %2143 = vmatprep.subr.mxu1 %v8303_v9  ;;  %4041 = vmatprep.subr.mxu0 %v8094_v14  ;;  %v1935_v39 = vadd.f32 %v1934_v35, %v1933_v22  ;;  %8332 = vst [vmem:[#allocation25_spill] sm:$0xff] %v7037_v31  ;;  %v7044_v22 = vld [vmem:[%s7873_s4 + $0x60] sm:$0xff]  ;;  %v7051_v35 = vld [vmem:[%s7873_s4 + $0x50] sm:$0xff]  ;;  %v7058_v38 = vld [vmem:[%s7873_s4 + $0x48] sm:$0xff] }
 0x442   :  { %2144 = vmatpush1.msra.mxu1 %v8304_v23  ;;  %2177 = vmatprep.mubr.f32.mxu1 %v8094_v14  ;;  %8333 = vst [vmem:[#allocation26_spill] sm:$0xff] %v7044_v22  ;;  %8335 = vst [vmem:[#allocation65_spill] sm:$0xff] %v7051_v35  ;;  %v8337_v9 = vld [vmem:[#allocation85_spill] sm:$0xff]  ;;  %v7072_v23 = vld [vmem:[%s7873_s4 + $0x30] sm:$0xff] }
 0x443   :  { %4042 = vmatpush3.msra.mxu0 %v8305_v40  ;;  %4043 = vmatprep.mubr.msk.f32.mxu0 %vm4627_vm2, %v8094_v14  ;;  %v6836_v48 = vsel %vm1941_vm1, %v1935_v39, %v8300_v55  ;;  %v1943_v41 = vsel %vm1941_vm1, %v1935_v39, 0.0  ;;  %v8334_v55 = vld [vmem:[#allocation84_spill] sm:$0xff]  ;;  %8336 = vst [vmem:[#allocation66_spill] sm:$0xff] %v7058_v38  ;;  %v7065_v39 = vld [vmem:[%s7873_s4 + $0x38] sm:$0xff]  ;;  %8339 = vst [vmem:[#allocation68_spill] sm:$0xff] %v7072_v23 }
 0x444   :  { %3399 = vst [vmem:[%s7878_s7 + $0x20] sm:$0xff] %v1943_v41  ;;  %2178 = vmatmul.mubr.f32.vlgmr.msra.gmra.mxu1 %v6836_v48  ;;  %4044 = vmatmul.mubr.f32.vlgmr.msra.gmra.mxu0 %v6836_v48  ;;  %8338 = vst [vmem:[#allocation67_spill] sm:$0xff] %v7065_v39  ;;  %v8340_v41 = vld [vmem:[#allocation86_spill] sm:$0xff] }
 0x445   :  { %2282 = vmatprep.subr.mxu1 %v6848_v1  ;;  %4046 = vmatprep.subr.mxu0 %v8094_v14 }
 0x446   :  { %2283 = vmatpush1.msra.mxu1 %v6855_v42  ;;  %4047 = vmatpush3.msra.mxu0 %v6861_v30 }
 0x447   :  { %2284 = vmatprep.subr.mxu1 %v6867_v20  ;;  %4048 = vmatprep.subr.mxu0 %v8094_v14 }
 0x448   :  { %2285 = vmatpush1.msra.mxu1 %v6874_v37  ;;  %4049 = vmatpush3.msra.mxu0 %v6880_v15 }
 0x449   :  { %2286 = vmatprep.subr.mxu1 %v6886_v49  ;;  %4050 = vmatprep.subr.mxu0 %v8094_v14 }
 0x44a   :  { %2287 = vmatpush1.msra.mxu1 %v6893_v54  ;;  %4051 = vmatpush3.msra.mxu0 %v6899_v47 }
 0x44b   :  { %2288 = vmatprep.subr.mxu1 %v6905_v34  ;;  %4052 = vmatprep.subr.mxu0 %v8094_v14 }
 0x44c   :  { %2289 = vmatpush1.msra.mxu1 %v6912_v43  ;;  %4053 = vmatpush3.msra.mxu0 %v6918_v62 }
 0x44d   :  { %2290 = vmatprep.subr.mxu1 %v6924_v10  ;;  %4054 = vmatprep.subr.mxu0 %v8094_v14 }
 0x44e   :  { %2291 = vmatpush1.msra.mxu1 %v6931_v59  ;;  %4055 = vmatpush3.msra.mxu0 %v6937_v2 }
 0x44f   :  { %2292 = vmatprep.subr.mxu1 %v6943_v52  ;;  %4056 = vmatprep.subr.mxu0 %v8094_v14 }
 0x450   :  { %2293 = vmatpush1.msra.mxu1 %v6950_v50  ;;  %4057 = vmatpush3.msra.mxu0 %v6956_v61 }
 0x451   :  { %2294 = vmatprep.subr.mxu1 %v6962_v53  ;;  %4058 = vmatprep.subr.mxu0 %v8094_v14 }
 0x452   :  { %2295 = vmatpush1.msra.mxu1 %v6969_v32  ;;  %4059 = vmatpush3.msra.mxu0 %v6975_v46 }
 0x453   :  { %2296 = vmatprep.subr.mxu1 %v6981_v25  ;;  %4060 = vmatprep.subr.mxu0 %v8094_v14 }
 0x454   :  { %2297 = vmatpush1.msra.mxu1 %v6988_v58  ;;  %4061 = vmatpush3.msra.mxu0 %v8322_v13  ;;  %v7079_v13 = vld [vmem:[%s7873_s4 + $0x20] sm:$0xff] }
 0x455   :  { %2298 = vmatprep.subr.mxu1 %v6995_v4  ;;  %4062 = vmatprep.subr.mxu0 %v8094_v14  ;;  %8341 = vst [vmem:[#allocation69_spill] sm:$0xff] %v7079_v13  ;;  %v8351_v58 = vld [vmem:[#allocation46_spill] sm:$0xff] }
 0x456   :  { %2299 = vmatpush1.msra.mxu1 %v7002_v5  ;;  %4063 = vmatpush3.msra.mxu0 %v8325_v27  ;;  %v7086_v27 = vld [vmem:[%s7873_s4 + $0x18] sm:$0xff] }
 0x457   :  { %2300 = vmatprep.subr.mxu1 %v7009_v33  ;;  %4064 = vmatprep.subr.mxu0 %v8094_v14  ;;  %8342 = vst [vmem:[#allocation70_spill] sm:$0xff] %v7086_v27 }
 0x458   :  { %2301 = vmatpush1.msra.mxu1 %v7016_v3  ;;  %4065 = vmatpush3.msra.mxu0 %v8328_v26  ;;  %v8343_v26 = vld [vmem:[#allocation87_spill] sm:$0xff] }
 0x459   :  { %2302 = vmatprep.subr.mxu1 %v7023_v18  ;;  %4066 = vmatprep.subr.mxu0 %v8094_v14 }
 0x45a   :  { %2303 = vmatpush1.msra.mxu1 %v7030_v0  ;;  %4067 = vmatpush3.msra.mxu0 %v8331_v17  ;;  %v7093_v17 = vld [vmem:[%s7873_s4 + $0x8] sm:$0xff] }
 0x45b   :  { %2304 = vmatprep.subr.mxu1 %v7037_v31  ;;  %4068 = vmatprep.subr.mxu0 %v8094_v14  ;;  %8344 = vst [vmem:[#allocation71_spill] sm:$0xff] %v7093_v17 }
 0x45c   :  { %2305 = vmatpush1.msra.mxu1 %v7044_v22  ;;  %4069 = vmatpush3.msra.mxu0 %v8334_v55  ;;  %v7100_v55 = vld [vmem:[%s7873_s4] sm:$0xff] }
 0x45d   :  { %2306 = vmatprep.subr.mxu1 %v7051_v35  ;;  %4070 = vmatprep.subr.mxu0 %v8094_v14  ;;  %8345 = vst [vmem:[#allocation72_spill] sm:$0xff] %v7100_v55 }
 0x45e   :  { %2307 = vmatpush1.msra.mxu1 %v7058_v38  ;;  %4071 = vmatpush3.msra.mxu0 %v8337_v9  ;;  %v8346_v9 = vld [vmem:[#allocation88_spill] sm:$0xff] }
 0x45f   :  { %2308 = vmatprep.subr.mxu1 %v7065_v39  ;;  %4072 = vmatprep.subr.mxu0 %v8094_v14  ;;  %v8349_v39 = vld [vmem:[#allocation28_spill] sm:$0xff] }
 0x460   :  { %2309 = vmatpush1.msra.mxu1 %v7072_v23  ;;  %4073 = vmatpush3.msra.mxu0 %v8340_v41  ;;  %v7110_v41 = vld [vmem:[%s7873_s4 + $0x2f0] sm:$0xff] }
 0x461   :  { %2310 = vmatprep.subr.mxu1 %v7079_v13  ;;  %4074 = vmatprep.subr.mxu0 %v8094_v14  ;;  %8347 = vst [vmem:[#allocation73_spill] sm:$0xff] %v7110_v41 }
 0x462   :  { %2311 = vmatpush1.msra.mxu1 %v7086_v27  ;;  %4075 = vmatpush3.msra.mxu0 %v8343_v26  ;;  %v8348_v27 = vld [vmem:[#allocation27_spill] sm:$0xff] }
 0x463   :  { %2312 = vmatprep.subr.mxu1 %v7093_v17  ;;  %4076 = vmatprep.subr.mxu0 %v8094_v14 }
 0x464   :  { %2313 = vmatpush1.msra.mxu1 %v7100_v55  ;;  %4077 = vmatpush3.msra.mxu0 %v8346_v9 }
 0x465   :  { %2346 = vmatprep.mubr.f32.mxu1 %v8094_v14  ;;  %4078 = vmatprep.mubr.msk.f32.mxu0 %vm4627_vm2, %v8094_v14 }
 0x466   :  { %2447 = vmatprep.subr.mxu1 %v7110_v41  ;;  %4081 = vmatprep.subr.mxu0 %v8094_v14  ;;  %v8350_v41 = vld [vmem:[#allocation62_spill] sm:$0xff] }
 0x4e3   :  { %v2014_v26 = vpop.f32.mrf.mxu1  ;;  %v2085_v17 = vpop.f32.mrf.mxu0 }
 0x4e4   :  { %v2089_v55 = vadd.f32 %v2014_v26, %v8348_v27  ;;  %v2103_v3 = vadd.f32 %v8350_v41, %v2085_v17 }
 0x4e5   :  { %v4010_v13 = vpop.f32.mrf.mxu0  ;;  %v2016_v23 = vpop.f32.mrf.mxu1 }
 0x4e6   :  { %v3400_v9 = vmul.f32 -1.442695, %v2089_v55  ;;  %v2096_v38 = vadd.f32 %v2016_v23, %v8349_v39 }
 0x4e8   :  { %4349 = vpow2.f32 %v3400_v9  ;;  %v3401_v35 = vmul.f32 -1.442695, %v2096_v38  ;;  %v8352_v9 = vld [vmem:[#allocation47_spill] sm:$0xff] }
 0x4ea   :  { %4351 = vpow2.f32 %v3401_v35 }
 0x4f5   :  { %v4350_v22 = vpop.eup %4349 }
 0x4f6   :  { %v2093_v31 = vadd.f32 1.0, %v4350_v22  ;;  %v8353_v22 = vld [vmem:[#allocation57_spill] sm:$0xff] }
 0x4f7   :  { %v4352_v0 = vpop.eup %4351 }
 0x4f8   :  { %4353 = vrcp.f32 %v2093_v31  ;;  %v2100_v18 = vadd.f32 1.0, %v4352_v0 }
 0x4fa   :  { %4355 = vrcp.f32 %v2100_v18  ;;  %v7164_v18 = vld [vmem:[%s7873_s4 + $0x2b8] sm:$0xff] }
 0x504   :  { %v2179_v33 = vpop.f32.mrf.mxu1  ;;  %v2250_v5 = vpop.f32.mrf.mxu0 }
 0x505   :  { %v4354_v4 = vpop.eup %4353  ;;  %v2254_v27 = vadd.f32 %v2179_v33, %v8351_v58 }
 0x506   :  { %v2104_v13 = vmul.f32 %v4354_v4, %v2103_v3  ;;  %v4045_v55 = vpop.f32.mrf.mxu0  ;;  %v2181_v38 = vpop.f32.mrf.mxu1 }
 0x507   :  { %v3402_v26 = vmul.f32 -1.442695, %v2254_v27  ;;  %v2261_v31 = vadd.f32 %v2181_v38, %v8353_v22  ;;  %v4356_v0 = vpop.eup %4355  ;;  %v7178_v27 = vld [vmem:[%s7873_s4 + $0x2a0] sm:$0xff]  ;;  %v7222_v22 = vld [vmem:[%s7873_s4 + $0x258] sm:$0xff] }
 0x508   :  { %v2105_v39 = vadd.f32 %v2104_v13, %v8352_v9  ;;  %v2107_v17 = vsub.f32 1.0, %v4356_v0  ;;  %v2109_v58 = vmul.f32 %v4356_v0, %v6748_v28  ;;  %v7186_v13 = vld [vmem:[%s7873_s4 + $0x290] sm:$0xff]  ;;  %v7215_v38 = vld [vmem:[%s7873_s4 + $0x260] sm:$0xff] }
 0x509   :  { %4357 = vpow2.f32 %v3402_v26  ;;  %v3403_v35 = vmul.f32 -1.442695, %v2261_v31  ;;  %v7193_v26 = vld [vmem:[%s7873_s4 + $0x288] sm:$0xff]  ;;  %v7207_v9 = vld [vmem:[%s7873_s4 + $0x270] sm:$0xff]  ;;  %v7236_v31 = vld [vmem:[%s7873_s4 + $0x240] sm:$0xff] }
 0x50a   :  { %4359 = vtanh.f32 %v2105_v39  ;;  %v7264_v0 = vld [vmem:[%s7873_s4 + $0x210] sm:$0xff] }
 0x50b   :  { %4361 = vpow2.f32 %v3403_v35  ;;  %v7250_v35 = vld [vmem:[%s7873_s4 + $0x228] sm:$0xff] }
 0x516   :  { %v4358_v23 = vpop.eup %4357 }
 0x517   :  { %v4360_v41 = vpop.eup %4359  ;;  %v2258_v25 = vadd.f32 1.0, %v4358_v23  ;;  %v7278_v23 = vld [vmem:[%s7873_s4 + $0x1f8] sm:$0xff] }
 0x518   :  { %v2108_v46 = vmul.f32 %v4360_v41, %v2107_v17  ;;  %v4362_v24 = vpop.eup %4361 }
 0x519   :  { %4363 = vrcp.f32 %v2258_v25  ;;  %v7150_v25 = vld [vmem:[%s7873_s4 + $0x2d0] sm:$0xff]  ;;  %v2265_v41 = vadd.f32 1.0, %v4362_v24 }
 0x51a   :  { %v2110_v4 = vadd.f32 %v2109_v58, %v2108_v46  ;;  %v7136_v46 = vld [vmem:[%s7873_s4 + $0x2e8] sm:$0xff]  ;;  %v7292_v58 = vld [vmem:[%s7873_s4 + $0x1e0] sm:$0xff] }
 0x51b   :  { %4365 = vrcp.f32 %v2265_v41  ;;  %v7320_v41 = vld [vmem:[%s7873_s4 + $0x1b0] sm:$0xff] }
 0x51c   :  { %v7124_v33 = vsel %vm1941_vm1, %v2110_v4, %v6748_v28  ;;  %v2112_v3 = vsel %vm1941_vm1, %v2110_v4, 0.0  ;;  %v7143_v28 = vld [vmem:[%s7873_s4 + $0x2d8] sm:$0xff]  ;;  %v7306_v4 = vld [vmem:[%s7873_s4 + $0x1c8] sm:$0xff] }
 0x51d   :  { %3404 = vst [vmem:[%s7877_s6 + $0x20] sm:$0xff] %v2112_v3  ;;  %2347 = vmatmul.mubr.f32.vlgmr.msra.gmra.mxu1 %v7124_v33  ;;  %4079 = vmatmul.mubr.f32.vlgmr.msra.gmra.mxu0 %v7124_v33 }
 0x51e   :  { %2448 = vmatpush1.msra.mxu1 %v7136_v46  ;;  %4082 = vmatpush3.msra.mxu0 %v6502_v56  ;;  %v7157_v56 = vld [vmem:[%s7873_s4 + $0x2c0] sm:$0xff] }
 0x51f   :  { %2449 = vmatprep.subr.mxu1 %v7143_v28  ;;  %4083 = vmatprep.subr.mxu0 %v8094_v14 }
 0x520   :  { %2450 = vmatpush1.msra.mxu1 %v7150_v25  ;;  %4084 = vmatpush3.msra.mxu0 %v6511_v57  ;;  %v7171_v57 = vld [vmem:[%s7873_s4 + $0x2a8] sm:$0xff] }
 0x521   :  { %2451 = vmatprep.subr.mxu1 %v7157_v56  ;;  %4085 = vmatprep.subr.mxu0 %v8094_v14 }
 0x522   :  { %2452 = vmatpush1.msra.mxu1 %v7164_v18  ;;  %4086 = vmatpush3.msra.mxu0 %v6520_v63  ;;  %v2268_v63 = vadd.f32 %v6774_v6, %v2250_v5  ;;  %v7200_v5 = vld [vmem:[%s7873_s4 + $0x278] sm:$0xff] }
 0x523   :  { %2453 = vmatprep.subr.mxu1 %v7171_v57  ;;  %4087 = vmatprep.subr.mxu0 %v8094_v14 }
 0x524   :  { %2454 = vmatpush1.msra.mxu1 %v7178_v27  ;;  %4088 = vmatpush3.msra.mxu0 %v6529_v44 }
 0x525   :  { %2455 = vmatprep.subr.mxu1 %v7186_v13  ;;  %4089 = vmatprep.subr.mxu0 %v8094_v14 }
 0x526   :  { %v4364_v55 = vpop.eup %4363  ;;  %2456 = vmatpush1.msra.mxu1 %v7193_v26  ;;  %4090 = vmatpush3.msra.mxu0 %v6539_v16  ;;  %v8354_v16 = vld [vmem:[#allocation58_spill] sm:$0xff] }
 0x527   :  { %v2269_v44 = vmul.f32 %v4364_v55, %v2268_v63  ;;  %2457 = vmatprep.subr.mxu1 %v7200_v5  ;;  %4091 = vmatprep.subr.mxu0 %v8094_v14 }
 0x528   :  { %2458 = vmatpush1.msra.mxu1 %v7207_v9  ;;  %4092 = vmatpush3.msra.mxu0 %v6548_v8  ;;  %v7229_v8 = vld [vmem:[%s7873_s4 + $0x248] sm:$0xff]  ;;  %v4366_v17 = vpop.eup %4365 }
 0x529   :  { %v2270_v39 = vadd.f32 %v2269_v44, %v8354_v16  ;;  %2459 = vmatprep.subr.mxu1 %v7215_v38  ;;  %4093 = vmatprep.subr.mxu0 %v8094_v14  ;;  %v2272_v3 = vsub.f32 1.0, %v4366_v17  ;;  %v2274_v55 = vmul.f32 %v4366_v17, %v6836_v48  ;;  %v7335_v44 = vld [vmem:[%s7873_s4 + $0x198] sm:$0xff] }
 0x52a   :  { %2460 = vmatpush1.msra.mxu1 %v7222_v22  ;;  %4094 = vmatpush3.msra.mxu0 %v6558_v12  ;;  %v7243_v12 = vld [vmem:[%s7873_s4 + $0x230] sm:$0xff]  ;;  %8356 = vst [vmem:[#allocation39_spill] sm:$0xff] %v7335_v44 }
 0x52b   :  { %4367 = vtanh.f32 %v2270_v39  ;;  %2461 = vmatprep.subr.mxu1 %v7229_v8  ;;  %4095 = vmatprep.subr.mxu0 %v8094_v14  ;;  %v7349_v39 = vld [vmem:[%s7873_s4 + $0x180] sm:$0xff] }
 0x52c   :  { %2462 = vmatpush1.msra.mxu1 %v7236_v31  ;;  %4096 = vmatpush3.msra.mxu0 %v6567_v45  ;;  %v7257_v45 = vld [vmem:[%s7873_s4 + $0x218] sm:$0xff]  ;;  %8358 = vst [vmem:[#allocation45_spill] sm:$0xff] %v7349_v39 }
 0x52d   :  { %2463 = vmatprep.subr.mxu1 %v7243_v12  ;;  %4097 = vmatprep.subr.mxu0 %v8094_v14 }
 0x52e   :  { %2464 = vmatpush1.msra.mxu1 %v7250_v35  ;;  %4098 = vmatpush3.msra.mxu0 %v6576_v11  ;;  %v7271_v11 = vld [vmem:[%s7873_s4 + $0x200] sm:$0xff] }
 0x52f   :  { %2465 = vmatprep.subr.mxu1 %v7257_v45  ;;  %4099 = vmatprep.subr.mxu0 %v8094_v14 }
 0x530   :  { %2466 = vmatpush1.msra.mxu1 %v7264_v0  ;;  %4100 = vmatpush3.msra.mxu0 %v6585_v29  ;;  %v7285_v29 = vld [vmem:[%s7873_s4 + $0x1e8] sm:$0xff] }
 0x531   :  { %2467 = vmatprep.subr.mxu1 %v7271_v11  ;;  %4101 = vmatprep.subr.mxu0 %v8094_v14 }
 0x532   :  { %2468 = vmatpush1.msra.mxu1 %v7278_v23  ;;  %4102 = vmatpush3.msra.mxu0 %v6594_v21  ;;  %v7299_v21 = vld [vmem:[%s7873_s4 + $0x1d0] sm:$0xff] }
 0x533   :  { %2469 = vmatprep.subr.mxu1 %v7285_v29  ;;  %4103 = vmatprep.subr.mxu0 %v8094_v14 }
 0x534   :  { %2470 = vmatpush1.msra.mxu1 %v7292_v58  ;;  %4104 = vmatpush3.msra.mxu0 %v6603_v60  ;;  %v7313_v60 = vld [vmem:[%s7873_s4 + $0x1b8] sm:$0xff] }
 0x535   :  { %2471 = vmatprep.subr.mxu1 %v7299_v21  ;;  %4105 = vmatprep.subr.mxu0 %v8094_v14 }
 0x536   :  { %2472 = vmatpush1.msra.mxu1 %v7306_v4  ;;  %4106 = vmatpush3.msra.mxu0 %v6612_v51  ;;  %v7327_v51 = vld [vmem:[%s7873_s4 + $0x1a0] sm:$0xff] }
 0x537   :  { %2473 = vmatprep.subr.mxu1 %v7313_v60  ;;  %4107 = vmatprep.subr.mxu0 %v8094_v14  ;;  %8355 = vst [vmem:[#allocation38_spill] sm:$0xff] %v7327_v51 }
 0x538   :  { %v4368_v24 = vpop.eup %4367  ;;  %2474 = vmatpush1.msra.mxu1 %v7320_v41  ;;  %4108 = vmatpush3.msra.mxu0 %v8298_v19  ;;  %v7342_v19 = vld [vmem:[%s7873_s4 + $0x188] sm:$0xff] }
 0x539   :  { %2475 = vmatprep.subr.mxu1 %v7327_v51  ;;  %4109 = vmatprep.subr.mxu0 %v8094_v14  ;;  %v2273_v63 = vmul.f32 %v4368_v24, %v2272_v3  ;;  %8357 = vst [vmem:[#allocation48_spill] sm:$0xff] %v7342_v19  ;;  %v7402_v3 = vld [vmem:[%s7873_s4 + $0xd0] sm:$0xff]  ;;  %v8363_v24 = vld [vmem:[#allocation19_spill] sm:$0xff] }
 0x53a   :  { %2476 = vmatpush1.msra.mxu1 %v7335_v44  ;;  %4110 = vmatpush3.msra.mxu0 %v8302_v36  ;;  %8362 = vst [vmem:[#allocation59_spill] sm:$0xff] %v7402_v3 }
 0x53b   :  { %2477 = vmatprep.subr.mxu1 %v7342_v19  ;;  %4111 = vmatprep.subr.mxu0 %v8094_v14  ;;  %v2275_v16 = vadd.f32 %v2274_v55, %v2273_v63  ;;  %v8364_v63 = vld [vmem:[#allocation20_spill] sm:$0xff]  ;;  %v7411_v55 = vld [vmem:[%s7873_s4 + $0xb8] sm:$0xff] }
 0x53c   :  { %2478 = vmatpush1.msra.mxu1 %v7349_v39  ;;  %2511 = vmatprep.mubr.f32.mxu1 %v8094_v14  ;;  %8365 = vst [vmem:[#allocation60_spill] sm:$0xff] %v7411_v55 }
 0x53d   :  { %4112 = vmatpush3.msra.mxu0 %v8305_v40  ;;  %4113 = vmatprep.mubr.msk.f32.mxu0 %vm4627_vm2, %v8094_v14  ;;  %v7359_v36 = vsel %vm1770_vm0, %v2275_v16, %v6836_v48  ;;  %v2277_v17 = vsel %vm1770_vm0, %v2275_v16, 0.0  ;;  %v8360_v40 = vld [vmem:[#allocation17_spill] sm:$0xff]  ;;  %v8361_v48 = vld [vmem:[#allocation18_spill] sm:$0xff] }
 0x53e   :  { %3405 = vst [vmem:[%s7878_s7 + $0x18] sm:$0xff] %v2277_v17  ;;  %2512 = vmatmul.mubr.f32.vlgmr.msra.gmra.mxu1 %v7359_v36  ;;  %4114 = vmatmul.mubr.f32.vlgmr.msra.gmra.mxu0 %v7359_v36  ;;  %v8366_v16 = vld [vmem:[#allocation21_spill] sm:$0xff]  ;;  %v8367_v17 = vld [vmem:[#allocation22_spill] sm:$0xff] }
 0x53f   :  { %2616 = vmatprep.subr.mxu1 %v6848_v1  ;;  %4116 = vmatprep.subr.mxu0 %v8094_v14 }
 0x540   :  { %2617 = vmatpush1.msra.mxu1 %v6855_v42  ;;  %4117 = vmatpush3.msra.mxu0 %v6861_v30 }
 0x541   :  { %2618 = vmatprep.subr.mxu1 %v6867_v20  ;;  %4118 = vmatprep.subr.mxu0 %v8094_v14 }
 0x542   :  { %2619 = vmatpush1.msra.mxu1 %v6874_v37  ;;  %4119 = vmatpush3.msra.mxu0 %v6880_v15 }
 0x543   :  { %2620 = vmatprep.subr.mxu1 %v6886_v49  ;;  %4120 = vmatprep.subr.mxu0 %v8094_v14 }
 0x544   :  { %2621 = vmatpush1.msra.mxu1 %v6893_v54  ;;  %4121 = vmatpush3.msra.mxu0 %v6899_v47 }
 0x545   :  { %2622 = vmatprep.subr.mxu1 %v6905_v34  ;;  %4122 = vmatprep.subr.mxu0 %v8094_v14  ;;  %v8391_v34 = vld [vmem:[#allocation44_spill] sm:$0xff] }
 0x546   :  { %2623 = vmatpush1.msra.mxu1 %v6912_v43  ;;  %4123 = vmatpush3.msra.mxu0 %v6918_v62 }
 0x547   :  { %2624 = vmatprep.subr.mxu1 %v6924_v10  ;;  %4124 = vmatprep.subr.mxu0 %v8094_v14 }
 0x548   :  { %2625 = vmatpush1.msra.mxu1 %v6931_v59  ;;  %4125 = vmatpush3.msra.mxu0 %v6937_v2 }
 0x549   :  { %2626 = vmatprep.subr.mxu1 %v6943_v52  ;;  %4126 = vmatprep.subr.mxu0 %v8094_v14 }
 0x54a   :  { %2627 = vmatpush1.msra.mxu1 %v6950_v50  ;;  %4127 = vmatpush3.msra.mxu0 %v6956_v61 }
 0x54b   :  { %2628 = vmatprep.subr.mxu1 %v6962_v53  ;;  %4128 = vmatprep.subr.mxu0 %v8094_v14 }
 0x54c   :  { %2629 = vmatpush1.msra.mxu1 %v6969_v32  ;;  %4129 = vmatpush3.msra.mxu0 %v8359_v7  ;;  %v8389_v32 = vld [vmem:[#allocation30_spill] sm:$0xff] }
 0x54d   :  { %2630 = vmatprep.subr.mxu1 %v8360_v40  ;;  %4130 = vmatprep.subr.mxu0 %v8094_v14 }
 0x54e   :  { %2631 = vmatpush1.msra.mxu1 %v8361_v48  ;;  %4131 = vmatpush3.msra.mxu0 %v7402_v3  ;;  %v8370_v3 = vld [vmem:[#allocation24_spill] sm:$0xff] }
 0x54f   :  { %2632 = vmatprep.subr.mxu1 %v8363_v24  ;;  %4132 = vmatprep.subr.mxu0 %v8094_v14  ;;  %v7420_v24 = vld [vmem:[%s7873_s4 + $0xa0] sm:$0xff] }
 0x550   :  { %2633 = vmatpush1.msra.mxu1 %v8364_v63  ;;  %4133 = vmatpush3.msra.mxu0 %v7411_v55  ;;  %8368 = vst [vmem:[#allocation36_spill] sm:$0xff] %v7420_v24  ;;  %v8369_v63 = vld [vmem:[#allocation23_spill] sm:$0xff]  ;;  %v8373_v55 = vld [vmem:[#allocation26_spill] sm:$0xff] }
 0x551   :  { %2634 = vmatprep.subr.mxu1 %v8366_v16  ;;  %4134 = vmatprep.subr.mxu0 %v8094_v14  ;;  %v7429_v16 = vld [vmem:[%s7873_s4 + $0x88] sm:$0xff] }
 0x552   :  { %2635 = vmatpush1.msra.mxu1 %v8367_v17  ;;  %4135 = vmatpush3.msra.mxu0 %v7420_v24  ;;  %8371 = vst [vmem:[#allocation75_spill] sm:$0xff] %v7429_v16  ;;  %v8372_v17 = vld [vmem:[#allocation25_spill] sm:$0xff]  ;;  %v8376_v24 = vld [vmem:[#allocation66_spill] sm:$0xff] }
 0x553   :  { %2636 = vmatprep.subr.mxu1 %v8369_v63  ;;  %4136 = vmatprep.subr.mxu0 %v8094_v14  ;;  %v7438_v63 = vld [vmem:[%s7873_s4 + $0x70] sm:$0xff] }
 0x554   :  { %2637 = vmatpush1.msra.mxu1 %v8370_v3  ;;  %4137 = vmatpush3.msra.mxu0 %v7429_v16  ;;  %8374 = vst [vmem:[#allocation61_spill] sm:$0xff] %v7438_v63  ;;  %v8375_v3 = vld [vmem:[#allocation65_spill] sm:$0xff]  ;;  %v8379_v16 = vld [vmem:[#allocation68_spill] sm:$0xff] }
 0x555   :  { %2638 = vmatprep.subr.mxu1 %v8372_v17  ;;  %4138 = vmatprep.subr.mxu0 %v8094_v14  ;;  %v7447_v17 = vld [vmem:[%s7873_s4 + $0x58] sm:$0xff] }
 0x556   :  { %2639 = vmatpush1.msra.mxu1 %v8373_v55  ;;  %4139 = vmatpush3.msra.mxu0 %v7438_v63  ;;  %8377 = vst [vmem:[#allocation76_spill] sm:$0xff] %v7447_v17  ;;  %v8378_v55 = vld [vmem:[#allocation67_spill] sm:$0xff]  ;;  %v8382_v63 = vld [vmem:[#allocation70_spill] sm:$0xff] }
 0x557   :  { %2640 = vmatprep.subr.mxu1 %v8375_v3  ;;  %4140 = vmatprep.subr.mxu0 %v8094_v14  ;;  %v7456_v3 = vld [vmem:[%s7873_s4 + $0x40] sm:$0xff] }
 0x558   :  { %2641 = vmatpush1.msra.mxu1 %v8376_v24  ;;  %4141 = vmatpush3.msra.mxu0 %v7447_v17  ;;  %8380 = vst [vmem:[#allocation63_spill] sm:$0xff] %v7456_v3  ;;  %v8381_v24 = vld [vmem:[#allocation69_spill] sm:$0xff]  ;;  %v8385_v17 = vld [vmem:[#allocation72_spill] sm:$0xff] }
 0x559   :  { %2642 = vmatprep.subr.mxu1 %v8378_v55  ;;  %4142 = vmatprep.subr.mxu0 %v8094_v14  ;;  %v7465_v55 = vld [vmem:[%s7873_s4 + $0x28] sm:$0xff] }
 0x55a   :  { %2643 = vmatpush1.msra.mxu1 %v8379_v16  ;;  %4143 = vmatpush3.msra.mxu0 %v7456_v3  ;;  %8383 = vst [vmem:[#allocation78_spill] sm:$0xff] %v7465_v55  ;;  %v8384_v16 = vld [vmem:[#allocation71_spill] sm:$0xff]  ;;  %v8388_v3 = vld [vmem:[#allocation29_spill] sm:$0xff] }
 0x55b   :  { %2644 = vmatprep.subr.mxu1 %v8381_v24  ;;  %4144 = vmatprep.subr.mxu0 %v8094_v14  ;;  %v7474_v24 = vld [vmem:[%s7873_s4 + $0x10] sm:$0xff] }
 0x55c   :  { %2645 = vmatpush1.msra.mxu1 %v8382_v63  ;;  %4145 = vmatpush3.msra.mxu0 %v7465_v55  ;;  %8386 = vst [vmem:[#allocation79_spill] sm:$0xff] %v7474_v24  ;;  %v8387_v63 = vld [vmem:[#allocation73_spill] sm:$0xff] }
 0x55d   :  { %2646 = vmatprep.subr.mxu1 %v8384_v16  ;;  %4146 = vmatprep.subr.mxu0 %v8094_v14 }
 0x55e   :  { %2647 = vmatpush1.msra.mxu1 %v8385_v17  ;;  %4147 = vmatpush3.msra.mxu0 %v7474_v24 }
 0x55f   :  { %2680 = vmatprep.mubr.f32.mxu1 %v8094_v14  ;;  %4148 = vmatprep.mubr.msk.f32.mxu0 %vm4627_vm2, %v8094_v14 }
 0x560   :  { %2781 = vmatprep.subr.mxu1 %v8387_v63  ;;  %4151 = vmatprep.subr.mxu0 %v8094_v14  ;;  %v8390_v63 = vld [vmem:[#allocation62_spill] sm:$0xff] }
 0x5dd   :  { %v2348_v16 = vpop.f32.mrf.mxu1  ;;  %v2419_v55 = vpop.f32.mrf.mxu0 }
 0x5de   :  { %v2423_v17 = vadd.f32 %v2348_v16, %v8388_v3  ;;  %v2437_v59 = vadd.f32 %v8390_v63, %v2419_v55 }
 0x5df   :  { %v4080_v48 = vpop.f32.mrf.mxu0  ;;  %v2350_v7 = vpop.f32.mrf.mxu1 }
 0x5e0   :  { %v3406_v40 = vmul.f32 -1.442695, %v2423_v17  ;;  %v2430_v53 = vadd.f32 %v2350_v7, %v8389_v32  ;;  %v8392_v17 = vld [vmem:[#allocation50_spill] sm:$0xff] }
 0x5e2   :  { %4369 = vpow2.f32 %v3406_v40  ;;  %v3407_v24 = vmul.f32 -1.442695, %v2430_v53 }
 0x5e4   :  { %4371 = vpow2.f32 %v3407_v24 }
 0x5ef   :  { %v4370_v61 = vpop.eup %4369 }
 0x5f0   :  { %v2427_v50 = vadd.f32 1.0, %v4370_v61  ;;  %v8393_v61 = vld [vmem:[#allocation55_spill] sm:$0xff] }
 0x5f1   :  { %v4372_v52 = vpop.eup %4371 }
 0x5f2   :  { %4373 = vrcp.f32 %v2427_v50  ;;  %v2434_v2 = vadd.f32 1.0, %v4372_v52 }
 0x5f4   :  { %4375 = vrcp.f32 %v2434_v2 }
 0x5fe   :  { %v2513_v10 = vpop.f32.mrf.mxu1  ;;  %v2584_v62 = vpop.f32.mrf.mxu0 }
 0x5ff   :  { %v4374_v43 = vpop.eup %4373  ;;  %v2588_v3 = vadd.f32 %v2513_v10, %v8391_v34 }
 0x600   :  { %v2438_v48 = vmul.f32 %v4374_v43, %v2437_v59  ;;  %v4115_v16 = vpop.f32.mrf.mxu0  ;;  %v2515_v53 = vpop.f32.mrf.mxu1 }
 0x601   :  { %v3408_v40 = vmul.f32 -1.442695, %v2588_v3  ;;  %v2595_v50 = vadd.f32 %v2515_v53, %v8393_v61  ;;  %v4376_v52 = vpop.eup %4375  ;;  %v7523_v3 = vld [vmem:[%s7873_s4 + $0x2c8] sm:$0xff]  ;;  %v7532_v16 = vld [vmem:[%s7873_s4 + $0x2b0] sm:$0xff] }
 0x602   :  { %v2439_v32 = vadd.f32 %v2438_v48, %v8392_v17  ;;  %v2441_v63 = vsub.f32 1.0, %v4376_v52  ;;  %v2443_v34 = vmul.f32 %v4376_v52, %v7124_v33  ;;  %v7579_v52 = vld [vmem:[%s7873_s4 + $0x238] sm:$0xff] }
 0x603   :  { %4377 = vpow2.f32 %v3408_v40  ;;  %v3409_v7 = vmul.f32 -1.442695, %v2595_v50  ;;  %v2602_v40 = vadd.f32 %v6774_v6, %v2584_v62  ;;  %v7551_v6 = vld [vmem:[%s7873_s4 + $0x280] sm:$0xff]  ;;  %v8395_v62 = vld [vmem:[#allocation56_spill] sm:$0xff]  ;;  %v7561_v50 = vld [vmem:[%s7873_s4 + $0x268] sm:$0xff] }
 0x604   :  { %4379 = vtanh.f32 %v2439_v32  ;;  %v7542_v32 = vld [vmem:[%s7873_s4 + $0x298] sm:$0xff] }
 0x605   :  { %4381 = vpow2.f32 %v3409_v7  ;;  %v7570_v7 = vld [vmem:[%s7873_s4 + $0x250] sm:$0xff] }
 0x610   :  { %v4378_v24 = vpop.eup %4377 }
 0x611   :  { %v4380_v55 = vpop.eup %4379  ;;  %v2592_v47 = vadd.f32 1.0, %v4378_v24  ;;  %v7588_v24 = vld [vmem:[%s7873_s4 + $0x220] sm:$0xff] }
 0x612   :  { %v2442_v54 = vmul.f32 %v4380_v55, %v2441_v63  ;;  %v7597_v63 = vld [vmem:[%s7873_s4 + $0x208] sm:$0xff] }
 0x613   :  { %4383 = vrcp.f32 %v2592_v47  ;;  %v4382_v47 = vpop.eup %4381 }
 0x614   :  { %v2444_v43 = vadd.f32 %v2443_v34, %v2442_v54  ;;  %v7505_v54 = vld [vmem:[%s7873_s4 + $0x2f8] sm:$0xff]  ;;  %v2599_v48 = vadd.f32 1.0, %v4382_v47  ;;  %v7606_v34 = vld [vmem:[%s7873_s4 + $0x1f0] sm:$0xff]  ;;  %v7624_v47 = vld [vmem:[%s7873_s4 + $0x1c0] sm:$0xff] }
 0x615   :  { %8396 = vst [vmem:[#allocation42_spill] sm:$0xff] %v7624_v47 }
 0x616   :  { %v7492_v59 = vsel %vm1595_vm15, %v2444_v43, %v7124_v33  ;;  %v2446_v2 = vsel %vm1595_vm15, %v2444_v43, 0.0  ;;  %v7514_v33 = vld [vmem:[%s7873_s4 + $0x2e0] sm:$0xff]  ;;  %4385 = vrcp.f32 %v2599_v48  ;;  %v7615_v43 = vld [vmem:[%s7873_s4 + $0x1d8] sm:$0xff] }
 0x617   :  { %3410 = vst [vmem:[%s7877_s6 + $0x28] sm:$0xff] %v2446_v2  ;;  %2681 = vmatmul.mubr.f32.vlgmr.msra.gmra.mxu1 %v7492_v59  ;;  %4149 = vmatmul.mubr.f32.vlgmr.msra.gmra.mxu0 %v7492_v59 }
 0x618   :  { %2782 = vmatpush1.msra.mxu1 %v7136_v46  ;;  %4152 = vmatpush3.msra.mxu0 %v7505_v54 }
 0x619   :  { %2783 = vmatprep.subr.mxu1 %v7143_v28  ;;  %4153 = vmatprep.subr.mxu0 %v8094_v14 }
 0x61a   :  { %2784 = vmatpush1.msra.mxu1 %v7150_v25  ;;  %4154 = vmatpush3.msra.mxu0 %v7514_v33 }
 0x61b   :  { %2785 = vmatprep.subr.mxu1 %v7157_v56  ;;  %4155 = vmatprep.subr.mxu0 %v8094_v14 }
 0x61c   :  { %2786 = vmatpush1.msra.mxu1 %v7164_v18  ;;  %4156 = vmatpush3.msra.mxu0 %v7523_v3 }
 0x61d   :  { %2787 = vmatprep.subr.mxu1 %v7171_v57  ;;  %4157 = vmatprep.subr.mxu0 %v8094_v14 }
 0x61e   :  { %2788 = vmatpush1.msra.mxu1 %v7178_v27  ;;  %4158 = vmatpush3.msra.mxu0 %v7532_v16 }
 0x61f   :  { %2789 = vmatprep.subr.mxu1 %v7186_v13  ;;  %4159 = vmatprep.subr.mxu0 %v8094_v14 }
 0x620   :  { %v4384_v17 = vpop.eup %4383  ;;  %2790 = vmatpush1.msra.mxu1 %v7193_v26  ;;  %4160 = vmatpush3.msra.mxu0 %v7542_v32 }
 0x621   :  { %v2603_v53 = vmul.f32 %v4384_v17, %v2602_v40  ;;  %2791 = vmatprep.subr.mxu1 %v7200_v5  ;;  %4161 = vmatprep.subr.mxu0 %v8094_v14  ;;  %v7634_v17 = vld [vmem:[%s7873_s4 + $0x1a8] sm:$0xff] }
 0x622   :  { %2792 = vmatpush1.msra.mxu1 %v7207_v9  ;;  %4162 = vmatpush3.msra.mxu0 %v7551_v6  ;;  %8397 = vst [vmem:[#allocation80_spill] sm:$0xff] %v7634_v17 }
 0x623   :  { %v2604_v61 = vadd.f32 %v2603_v53, %v8395_v62  ;;  %2793 = vmatprep.subr.mxu1 %v7215_v38  ;;  %4163 = vmatprep.subr.mxu0 %v8094_v14  ;;  %v4386_v55 = vpop.eup %4385  ;;  %v7644_v62 = vld [vmem:[%s7873_s4 + $0x190] sm:$0xff] }
 0x624   :  { %2794 = vmatpush1.msra.mxu1 %v7222_v22  ;;  %4164 = vmatpush3.msra.mxu0 %v7561_v50  ;;  %v2606_v10 = vsub.f32 1.0, %v4386_v55  ;;  %v2608_v40 = vmul.f32 %v4386_v55, %v7359_v36  ;;  %8398 = vst [vmem:[#allocation81_spill] sm:$0xff] %v7644_v62 }
 0x625   :  { %4387 = vtanh.f32 %v2604_v61  ;;  %2795 = vmatprep.subr.mxu1 %v7229_v8  ;;  %4165 = vmatprep.subr.mxu0 %v8094_v14  ;;  %v8413_v61 = vld [vmem:[#allocation15_spill] sm:$0xff] }
 0x626   :  { %2796 = vmatpush1.msra.mxu1 %v7236_v31  ;;  %4166 = vmatpush3.msra.mxu0 %v7570_v7 }
 0x627   :  { %2797 = vmatprep.subr.mxu1 %v7243_v12  ;;  %4167 = vmatprep.subr.mxu0 %v8094_v14 }
 0x628   :  { %2798 = vmatpush1.msra.mxu1 %v7250_v35  ;;  %4168 = vmatpush3.msra.mxu0 %v7579_v52 }
 0x629   :  { %2799 = vmatprep.subr.mxu1 %v7257_v45  ;;  %4169 = vmatprep.subr.mxu0 %v8094_v14 }
 0x62a   :  { %2800 = vmatpush1.msra.mxu1 %v7264_v0  ;;  %4170 = vmatpush3.msra.mxu0 %v7588_v24 }
 0x62b   :  { %2801 = vmatprep.subr.mxu1 %v7271_v11  ;;  %4171 = vmatprep.subr.mxu0 %v8094_v14 }
 0x62c   :  { %2802 = vmatpush1.msra.mxu1 %v7278_v23  ;;  %4172 = vmatpush3.msra.mxu0 %v7597_v63 }
 0x62d   :  { %2803 = vmatprep.subr.mxu1 %v7285_v29  ;;  %4173 = vmatprep.subr.mxu0 %v8094_v14 }
 0x62e   :  { %2804 = vmatpush1.msra.mxu1 %v7292_v58  ;;  %4174 = vmatpush3.msra.mxu0 %v7606_v34 }
 0x62f   :  { %2805 = vmatprep.subr.mxu1 %v7299_v21  ;;  %4175 = vmatprep.subr.mxu0 %v8094_v14 }
 0x630   :  { %2806 = vmatpush1.msra.mxu1 %v7306_v4  ;;  %4176 = vmatpush3.msra.mxu0 %v7615_v43 }
 0x631   :  { %2807 = vmatprep.subr.mxu1 %v7313_v60  ;;  %4177 = vmatprep.subr.mxu0 %v8094_v14 }
 0x632   :  { %v4388_v2 = vpop.eup %4387  ;;  %2808 = vmatpush1.msra.mxu1 %v7320_v41  ;;  %4178 = vmatpush3.msra.mxu0 %v7624_v47 }
 0x633   :  { %2809 = vmatprep.subr.mxu1 %v7327_v51  ;;  %4179 = vmatprep.subr.mxu0 %v8094_v14  ;;  %v2607_v48 = vmul.f32 %v4388_v2, %v2606_v10  ;;  %v8403_v2 = vld [vmem:[#allocation5_spill] sm:$0xff] }
 0x634   :  { %2810 = vmatpush1.msra.mxu1 %v7335_v44  ;;  %4180 = vmatpush3.msra.mxu0 %v7634_v17 }
 0x635   :  { %2811 = vmatprep.subr.mxu1 %v7342_v19  ;;  %4181 = vmatprep.subr.mxu0 %v8094_v14  ;;  %v2609_v53 = vadd.f32 %v2608_v40, %v2607_v48  ;;  %v8410_v48 = vld [vmem:[#allocation12_spill] sm:$0xff]  ;;  %v8411_v40 = vld [vmem:[#allocation13_spill] sm:$0xff] }
 0x636   :  { %2812 = vmatpush1.msra.mxu1 %v7349_v39  ;;  %2845 = vmatprep.mubr.f32.mxu1 %v8094_v14 }
 0x637   :  { %4182 = vmatpush3.msra.mxu0 %v7644_v62  ;;  %4183 = vmatprep.mubr.msk.f32.mxu0 %vm4627_vm2, %v8094_v14  ;;  %v7652_v55 = vsel %vm1424_vm14, %v2609_v53, %v7359_v36  ;;  %v2611_v10 = vsel %vm1424_vm14, %v2609_v53, 0.0  ;;  %v8401_v36 = vld [vmem:[#allocation3_spill] sm:$0xff]  ;;  %v8412_v53 = vld [vmem:[#allocation14_spill] sm:$0xff] }
 0x638   :  { %8400 = vst [vmem:[#allocation82_spill] sm:$0xff] %v7652_v55  ;;  %3411 = vst [vmem:[%s7878_s7 + $0x10] sm:$0xff] %v2611_v10  ;;  %2846 = vmatmul.mubr.f32.vlgmr.msra.gmra.mxu1 %v7652_v55  ;;  %4184 = vmatmul.mubr.f32.vlgmr.msra.gmra.mxu0 %v7652_v55  ;;  %v8414_v10 = vld [vmem:[#allocation16_spill] sm:$0xff] }
 0x639   :  { %2950 = vmatprep.subr.mxu1 %v6848_v1  ;;  %4186 = vmatprep.subr.mxu0 %v8094_v14  ;;  %v8402_v1 = vld [vmem:[#allocation4_spill] sm:$0xff] }
 0x63a   :  { %2951 = vmatpush1.msra.mxu1 %v6855_v42  ;;  %4187 = vmatpush3.msra.mxu0 %v6861_v30  ;;  %v8404_v42 = vld [vmem:[#allocation6_spill] sm:$0xff]  ;;  %v8405_v30 = vld [vmem:[#allocation7_spill] sm:$0xff] }
 0x63b   :  { %2952 = vmatprep.subr.mxu1 %v6867_v20  ;;  %4188 = vmatprep.subr.mxu0 %v8094_v14  ;;  %v8406_v20 = vld [vmem:[#allocation8_spill] sm:$0xff] }
 0x63c   :  { %2953 = vmatpush1.msra.mxu1 %v6874_v37  ;;  %4189 = vmatpush3.msra.mxu0 %v6880_v15  ;;  %v8407_v37 = vld [vmem:[#allocation9_spill] sm:$0xff]  ;;  %v8408_v15 = vld [vmem:[#allocation10_spill] sm:$0xff] }
 0x63d   :  { %2954 = vmatprep.subr.mxu1 %v6886_v49  ;;  %4190 = vmatprep.subr.mxu0 %v8094_v14  ;;  %v8409_v49 = vld [vmem:[#allocation11_spill] sm:$0xff] }
 0x63e   :  { %2955 = vmatpush1.msra.mxu1 %v8401_v36  ;;  %4191 = vmatpush3.msra.mxu0 %v8402_v1  ;;  %v8415_v36 = vld [vmem:[#allocation17_spill] sm:$0xff]  ;;  %v8416_v1 = vld [vmem:[#allocation18_spill] sm:$0xff] }
 0x63f   :  { %2956 = vmatprep.subr.mxu1 %v8403_v2  ;;  %4192 = vmatprep.subr.mxu0 %v8094_v14  ;;  %v8417_v2 = vld [vmem:[#allocation59_spill] sm:$0xff] }
 0x640   :  { %2957 = vmatpush1.msra.mxu1 %v8404_v42  ;;  %4193 = vmatpush3.msra.mxu0 %v8405_v30  ;;  %v8418_v42 = vld [vmem:[#allocation19_spill] sm:$0xff]  ;;  %v8419_v30 = vld [vmem:[#allocation20_spill] sm:$0xff] }
 0x641   :  { %2958 = vmatprep.subr.mxu1 %v8406_v20  ;;  %4194 = vmatprep.subr.mxu0 %v8094_v14  ;;  %v8420_v20 = vld [vmem:[#allocation60_spill] sm:$0xff] }
 0x642   :  { %2959 = vmatpush1.msra.mxu1 %v8407_v37  ;;  %4195 = vmatpush3.msra.mxu0 %v8408_v15  ;;  %v8421_v37 = vld [vmem:[#allocation21_spill] sm:$0xff]  ;;  %v8422_v15 = vld [vmem:[#allocation22_spill] sm:$0xff] }
 0x643   :  { %2960 = vmatprep.subr.mxu1 %v8409_v49  ;;  %4196 = vmatprep.subr.mxu0 %v8094_v14  ;;  %v8423_v49 = vld [vmem:[#allocation36_spill] sm:$0xff] }
 0x644   :  { %2961 = vmatpush1.msra.mxu1 %v8410_v48  ;;  %4197 = vmatpush3.msra.mxu0 %v8411_v40  ;;  %v8424_v48 = vld [vmem:[#allocation23_spill] sm:$0xff]  ;;  %v8425_v40 = vld [vmem:[#allocation24_spill] sm:$0xff] }
 0x645   :  { %2962 = vmatprep.subr.mxu1 %v8412_v53  ;;  %4198 = vmatprep.subr.mxu0 %v8094_v14  ;;  %v8426_v53 = vld [vmem:[#allocation75_spill] sm:$0xff] }
 0x646   :  { %2963 = vmatpush1.msra.mxu1 %v8413_v61  ;;  %4199 = vmatpush3.msra.mxu0 %v8414_v10  ;;  %v8427_v61 = vld [vmem:[#allocation25_spill] sm:$0xff]  ;;  %v8428_v10 = vld [vmem:[#allocation26_spill] sm:$0xff] }
 0x647   :  { %2964 = vmatprep.subr.mxu1 %v8415_v36  ;;  %4200 = vmatprep.subr.mxu0 %v8094_v14  ;;  %v8429_v36 = vld [vmem:[#allocation61_spill] sm:$0xff] }
 0x648   :  { %2965 = vmatpush1.msra.mxu1 %v8416_v1  ;;  %4201 = vmatpush3.msra.mxu0 %v8417_v2  ;;  %v8430_v1 = vld [vmem:[#allocation65_spill] sm:$0xff]  ;;  %v8431_v2 = vld [vmem:[#allocation66_spill] sm:$0xff] }
 0x649   :  { %2966 = vmatprep.subr.mxu1 %v8418_v42  ;;  %4202 = vmatprep.subr.mxu0 %v8094_v14  ;;  %v8432_v42 = vld [vmem:[#allocation76_spill] sm:$0xff] }
 0x64a   :  { %2967 = vmatpush1.msra.mxu1 %v8419_v30  ;;  %4203 = vmatpush3.msra.mxu0 %v8420_v20  ;;  %v8433_v30 = vld [vmem:[#allocation67_spill] sm:$0xff]  ;;  %v8434_v20 = vld [vmem:[#allocation68_spill] sm:$0xff] }
 0x64b   :  { %2968 = vmatprep.subr.mxu1 %v8421_v37  ;;  %4204 = vmatprep.subr.mxu0 %v8094_v14  ;;  %v8435_v37 = vld [vmem:[#allocation63_spill] sm:$0xff] }
 0x64c   :  { %2969 = vmatpush1.msra.mxu1 %v8422_v15  ;;  %4205 = vmatpush3.msra.mxu0 %v8423_v49  ;;  %v8436_v15 = vld [vmem:[#allocation69_spill] sm:$0xff]  ;;  %v8437_v49 = vld [vmem:[#allocation70_spill] sm:$0xff] }
 0x64d   :  { %2970 = vmatprep.subr.mxu1 %v8424_v48  ;;  %4206 = vmatprep.subr.mxu0 %v8094_v14  ;;  %v8438_v48 = vld [vmem:[#allocation78_spill] sm:$0xff] }
 0x64e   :  { %2971 = vmatpush1.msra.mxu1 %v8425_v40  ;;  %4207 = vmatpush3.msra.mxu0 %v8426_v53  ;;  %v8439_v40 = vld [vmem:[#allocation71_spill] sm:$0xff]  ;;  %v8440_v53 = vld [vmem:[#allocation72_spill] sm:$0xff] }
 0x64f   :  { %2972 = vmatprep.subr.mxu1 %v8427_v61  ;;  %4208 = vmatprep.subr.mxu0 %v8094_v14  ;;  %v8441_v61 = vld [vmem:[#allocation79_spill] sm:$0xff] }
 0x650   :  { %2973 = vmatpush1.msra.mxu1 %v8428_v10  ;;  %4209 = vmatpush3.msra.mxu0 %v8429_v36  ;;  %v8442_v10 = vld [vmem:[#allocation73_spill] sm:$0xff] }
 0x651   :  { %2974 = vmatprep.subr.mxu1 %v8430_v1  ;;  %4210 = vmatprep.subr.mxu0 %v8094_v14 }
 0x652   :  { %2975 = vmatpush1.msra.mxu1 %v8431_v2  ;;  %4211 = vmatpush3.msra.mxu0 %v8432_v42  ;;  %v8443_v2 = vld [vmem:[#allocation31_spill] sm:$0xff] }
 0x653   :  { %2976 = vmatprep.subr.mxu1 %v8433_v30  ;;  %4212 = vmatprep.subr.mxu0 %v8094_v14 }
 0x654   :  { %2977 = vmatpush1.msra.mxu1 %v8434_v20  ;;  %4213 = vmatpush3.msra.mxu0 %v8435_v37 }
 0x655   :  { %2978 = vmatprep.subr.mxu1 %v8436_v15  ;;  %4214 = vmatprep.subr.mxu0 %v8094_v14  ;;  %v8444_v15 = vld [vmem:[#allocation32_spill] sm:$0xff] }
 0x656   :  { %2979 = vmatpush1.msra.mxu1 %v8437_v49  ;;  %4215 = vmatpush3.msra.mxu0 %v8438_v48 }
 0x657   :  { %2980 = vmatprep.subr.mxu1 %v8439_v40  ;;  %4216 = vmatprep.subr.mxu0 %v8094_v14 }
 0x658   :  { %2981 = vmatpush1.msra.mxu1 %v8440_v53  ;;  %4217 = vmatpush3.msra.mxu0 %v8441_v61 }
 0x659   :  { %3014 = vmatprep.mubr.f32.mxu1 %v8094_v14  ;;  %4218 = vmatprep.mubr.msk.f32.mxu0 %vm4627_vm2, %v8094_v14 }
 0x65a   :  { %3115 = vmatprep.subr.mxu1 %v8442_v10  ;;  %4221 = vmatprep.subr.mxu0 %v8094_v14  ;;  %v7735_v10 = vld [vmem:[%s7876_s5] ss:$0 sm:$0xff] }
 0x65b   :  { %8445 = vst [vmem:[#allocation83_spill] sm:$0xff] %v7735_v10 }
 0x6d7   :  { %v2682_v36 = vpop.f32.mrf.mxu1  ;;  %v2753_v1 = vpop.f32.mrf.mxu0 }
 0x6d8   :  { %v2757_v42 = vadd.f32 %v2682_v36, %v8443_v2  ;;  %v2771_v36 = vadd.f32 %v7735_v10, %v2753_v1 }
 0x6d9   :  { %v4150_v30 = vpop.f32.mrf.mxu0  ;;  %v2684_v37 = vpop.f32.mrf.mxu1 }
 0x6da   :  { %v3412_v20 = vmul.f32 -1.442695, %v2757_v42  ;;  %v2764_v49 = vadd.f32 %v2684_v37, %v8444_v15 }
 0x6dc   :  { %4389 = vpow2.f32 %v3412_v20  ;;  %v3413_v48 = vmul.f32 -1.442695, %v2764_v49  ;;  %v8446_v20 = vld [vmem:[#allocation40_spill] sm:$0xff] }
 0x6de   :  { %4391 = vpow2.f32 %v3413_v48  ;;  %v8447_v48 = vld [vmem:[#allocation53_spill] sm:$0xff] }
 0x6e9   :  { %v4390_v40 = vpop.eup %4389 }
 0x6ea   :  { %v2761_v53 = vadd.f32 1.0, %v4390_v40 }
 0x6eb   :  { %v4392_v61 = vpop.eup %4391 }
 0x6ec   :  { %4393 = vrcp.f32 %v2761_v53  ;;  %v2768_v62 = vadd.f32 1.0, %v4392_v61  ;;  %v8448_v61 = vld [vmem:[#allocation49_spill] sm:$0xff] }
 0x6ee   :  { %4395 = vrcp.f32 %v2768_v62 }
 0x6f8   :  { %v2847_v2 = vpop.f32.mrf.mxu1  ;;  %v2918_v42 = vpop.f32.mrf.mxu0 }
 0x6f9   :  { %v4394_v30 = vpop.eup %4393  ;;  %v2922_v39 = vadd.f32 %v2847_v2, %v8446_v20 }
 0x6fa   :  { %v2772_v37 = vmul.f32 %v4394_v30, %v2771_v36  ;;  %v4185_v15 = vpop.f32.mrf.mxu0  ;;  %v2849_v53 = vpop.f32.mrf.mxu1 }
 0x6fb   :  { %v3414_v49 = vmul.f32 -1.442695, %v2922_v39  ;;  %v2929_v19 = vadd.f32 %v2849_v53, %v8448_v61  ;;  %v4396_v44 = vpop.eup %4395  ;;  %v8465_v15 = vld [vmem:[#allocation41_spill] sm:$0xff] }
 0x6fc   :  { %v2773_v40 = vadd.f32 %v2772_v37, %v8447_v48  ;;  %v2775_v10 = vsub.f32 1.0, %v4396_v44  ;;  %v2777_v36 = vmul.f32 %v4396_v44, %v7492_v59 }
 0x6fd   :  { %4397 = vpow2.f32 %v3414_v49  ;;  %v3415_v17 = vmul.f32 -1.442695, %v2929_v19 }
 0x6fe   :  { %4399 = vtanh.f32 %v2773_v40 }
 0x6ff   :  { %4401 = vpow2.f32 %v3415_v17 }
 0x70a   :  { %v4398_v1 = vpop.eup %4397 }
 0x70b   :  { %v4400_v55 = vpop.eup %4399  ;;  %v2926_v51 = vadd.f32 1.0, %v4398_v1 }
 0x70c   :  { %v2776_v47 = vmul.f32 %v4400_v55, %v2775_v10 }
 0x70d   :  { %4403 = vrcp.f32 %v2926_v51  ;;  %v4402_v51 = vpop.eup %4401 }
 0x70e   :  { %v2778_v62 = vadd.f32 %v2777_v36, %v2776_v47 }
 0x710   :  { %v7745_v2 = vsel %vm1249_vm13, %v2778_v62, %v7492_v59  ;;  %v2780_v30 = vsel %vm1249_vm13, %v2778_v62, 0.0 }
 0x711   :  { %3416 = vst [vmem:[%s7877_s6 + $0x30] sm:$0xff] %v2780_v30  ;;  %3015 = vmatmul.mubr.f32.vlgmr.msra.gmra.mxu1 %v7745_v2  ;;  %4219 = vmatmul.mubr.f32.vlgmr.msra.gmra.mxu0 %v7745_v2 }
 0x712   :  { %3116 = vmatpush1.msra.mxu1 %v7136_v46  ;;  %4222 = vmatpush3.msra.mxu0 %v7505_v54  ;;  %v2933_v46 = vadd.f32 1.0, %v4402_v51  ;;  %v8461_v54 = vld [vmem:[#allocation35_spill] sm:$0xff] }
 0x713   :  { %3117 = vmatprep.subr.mxu1 %v7143_v28  ;;  %4223 = vmatprep.subr.mxu0 %v8094_v14  ;;  %v7771_v28 = vld [vmem:[%s7876_s5 + $0x1] ss:$0 sm:$0xff] }
 0x714   :  { %3118 = vmatpush1.msra.mxu1 %v7150_v25  ;;  %4224 = vmatpush3.msra.mxu0 %v7514_v33  ;;  %v2936_v25 = vadd.f32 %v7771_v28, %v2918_v42  ;;  %4405 = vrcp.f32 %v2933_v46  ;;  %v8464_v42 = vld [vmem:[#allocation54_spill] sm:$0xff] }
 0x715   :  { %3119 = vmatprep.subr.mxu1 %v7157_v56  ;;  %4225 = vmatprep.subr.mxu0 %v8094_v14 }
 0x716   :  { %3120 = vmatpush1.msra.mxu1 %v7164_v18  ;;  %4226 = vmatpush3.msra.mxu0 %v7523_v3 }
 0x717   :  { %3121 = vmatprep.subr.mxu1 %v7171_v57  ;;  %4227 = vmatprep.subr.mxu0 %v8094_v14  ;;  %v8450_v57 = vld [vmem:[#allocation51_spill] sm:$0xff] }
 0x718   :  { %3122 = vmatpush1.msra.mxu1 %v7178_v27  ;;  %4228 = vmatpush3.msra.mxu0 %v7532_v16 }
 0x719   :  { %3123 = vmatprep.subr.mxu1 %v7186_v13  ;;  %4229 = vmatprep.subr.mxu0 %v8094_v14 }
 0x71a   :  { %v4404_v56 = vpop.eup %4403  ;;  %3124 = vmatpush1.msra.mxu1 %v7193_v26  ;;  %4230 = vmatpush3.msra.mxu0 %v7542_v32 }
 0x71b   :  { %v2937_v18 = vmul.f32 %v4404_v56, %v2936_v25  ;;  %3125 = vmatprep.subr.mxu1 %v7200_v5  ;;  %4231 = vmatprep.subr.mxu0 %v8094_v14 }
 0x71c   :  { %3126 = vmatpush1.msra.mxu1 %v7207_v9  ;;  %4232 = vmatpush3.msra.mxu0 %v7551_v6  ;;  %v8451_v9 = vld [vmem:[#allocation42_spill] sm:$0xff] }
 0x71d   :  { %v2938_v27 = vadd.f32 %v2937_v18, %v8450_v57  ;;  %3127 = vmatprep.subr.mxu1 %v7215_v38  ;;  %4233 = vmatprep.subr.mxu0 %v8094_v14  ;;  %v8452_v38 = vld [vmem:[#allocation38_spill] sm:$0xff] }
 0x71e   :  { %3128 = vmatpush1.msra.mxu1 %v7222_v22  ;;  %4234 = vmatpush3.msra.mxu0 %v7561_v50 }
 0x71f   :  { %4407 = vtanh.f32 %v2938_v27  ;;  %3129 = vmatprep.subr.mxu1 %v7229_v8  ;;  %4235 = vmatprep.subr.mxu0 %v8094_v14  ;;  %v8453_v8 = vld [vmem:[#allocation82_spill] sm:$0xff] }
 0x720   :  { %3130 = vmatpush1.msra.mxu1 %v7236_v31  ;;  %4236 = vmatpush3.msra.mxu0 %v7570_v7  ;;  %v8462_v7 = vld [vmem:[#allocation83_spill] sm:$0xff] }
 0x721   :  { %3131 = vmatprep.subr.mxu1 %v7243_v12  ;;  %4237 = vmatprep.subr.mxu0 %v8094_v14  ;;  %v4406_v13 = vpop.eup %4405  ;;  %v8454_v12 = vld [vmem:[#allocation39_spill] sm:$0xff] }
 0x722   :  { %3132 = vmatpush1.msra.mxu1 %v7250_v35  ;;  %4238 = vmatpush3.msra.mxu0 %v7579_v52  ;;  %v2940_v26 = vsub.f32 1.0, %v4406_v13  ;;  %v2942_v31 = vmul.f32 %v4406_v13, %v8453_v8  ;;  %v8455_v35 = vld [vmem:[#allocation80_spill] sm:$0xff] }
 0x723   :  { %3133 = vmatprep.subr.mxu1 %v7257_v45  ;;  %4239 = vmatprep.subr.mxu0 %v8094_v14  ;;  %v8456_v45 = vld [vmem:[#allocation48_spill] sm:$0xff] }
 0x724   :  { %3134 = vmatpush1.msra.mxu1 %v7264_v0  ;;  %4240 = vmatpush3.msra.mxu0 %v7588_v24 }
 0x725   :  { %3135 = vmatprep.subr.mxu1 %v7271_v11  ;;  %4241 = vmatprep.subr.mxu0 %v8094_v14  ;;  %v8457_v11 = vld [vmem:[#allocation45_spill] sm:$0xff] }
 0x726   :  { %3136 = vmatpush1.msra.mxu1 %v7278_v23  ;;  %4242 = vmatpush3.msra.mxu0 %v7597_v63  ;;  %v8458_v23 = vld [vmem:[#allocation81_spill] sm:$0xff] }
 0x727   :  { %3137 = vmatprep.subr.mxu1 %v7285_v29  ;;  %4243 = vmatprep.subr.mxu0 %v8094_v14 }
 0x728   :  { %3138 = vmatpush1.msra.mxu1 %v7292_v58  ;;  %4244 = vmatpush3.msra.mxu0 %v7606_v34 }
 0x729   :  { %3139 = vmatprep.subr.mxu1 %v7299_v21  ;;  %4245 = vmatprep.subr.mxu0 %v8094_v14 }
 0x72a   :  { %3140 = vmatpush1.msra.mxu1 %v7306_v4  ;;  %4246 = vmatpush3.msra.mxu0 %v7615_v43  ;;  %v8463_v43 = vld [vmem:[#allocation37_spill] sm:$0xff] }
 0x72b   :  { %3141 = vmatprep.subr.mxu1 %v7313_v60  ;;  %4247 = vmatprep.subr.mxu0 %v8094_v14 }
 0x72c   :  { %v4408_v5 = vpop.eup %4407  ;;  %3142 = vmatpush1.msra.mxu1 %v7320_v41  ;;  %4248 = vmatpush3.msra.mxu0 %v8451_v9  ;;  %v8460_v41 = vld [vmem:[#allocation33_spill] sm:$0xff] }
 0x72d   :  { %3143 = vmatprep.subr.mxu1 %v8452_v38  ;;  %4249 = vmatprep.subr.mxu0 %v8094_v14  ;;  %v2941_v22 = vmul.f32 %v4408_v5, %v2940_v26  ;;  %v8467_v26 = vld [vmem:[#allocation43_spill] sm:$0xff] }
 0x72e   :  { %3144 = vmatpush1.msra.mxu1 %v8454_v12  ;;  %4250 = vmatpush3.msra.mxu0 %v8455_v35 }
 0x72f   :  { %3145 = vmatprep.subr.mxu1 %v8456_v45  ;;  %4251 = vmatprep.subr.mxu0 %v8094_v14  ;;  %v2943_v0 = vadd.f32 %v2942_v31, %v2941_v22 }
 0x730   :  { %3146 = vmatpush1.msra.mxu1 %v8457_v11  ;;  %3179 = vmatprep.mubr.f32.mxu1 %v8094_v14 }
 0x731   :  { %4252 = vmatpush3.msra.mxu0 %v8458_v23  ;;  %4253 = vmatprep.mubr.msk.f32.mxu0 %vm4627_vm2, %v8094_v14  ;;  %v7830_v58 = vsel %vm1078_vm12, %v2943_v0, %v8453_v8  ;;  %v2945_v21 = vsel %vm1078_vm12, %v2943_v0, 0.0 }
 0x732   :  { %3417 = vst [vmem:[%s7878_s7 + $0x8] sm:$0xff] %v2945_v21  ;;  %3180 = vmatmul.mubr.f32.vlgmr.msra.gmra.mxu1 %v7830_v58  ;;  %4254 = vmatmul.mubr.f32.vlgmr.msra.gmra.mxu0 %v7830_v58 }
 0x7d1   :  { %v3016_v4 = vpop.f32.mrf.mxu1  ;;  %v3087_v60 = vpop.f32.mrf.mxu0 }
 0x7d2   :  { %v3091_v14 = vadd.f32 %v3016_v4, %v8460_v41  ;;  %v3105_v52 = vadd.f32 %v8462_v7, %v3087_v60 }
 0x7d3   :  { %v4220_v44 = vpop.f32.mrf.mxu0  ;;  %v3018_v59 = vpop.f32.mrf.mxu1 }
 0x7d4   :  { %v3418_v19 = vmul.f32 -1.442695, %v3091_v14  ;;  %v3098_v33 = vadd.f32 %v3018_v59, %v8461_v54 }
 0x7d6   :  { %4409 = vpow2.f32 %v3418_v19  ;;  %v3419_v3 = vmul.f32 -1.442695, %v3098_v33 }
 0x7d8   :  { %4411 = vpow2.f32 %v3419_v3 }
 0x7e3   :  { %v4410_v16 = vpop.eup %4409 }
 0x7e4   :  { %v3095_v32 = vadd.f32 1.0, %v4410_v16 }
 0x7e5   :  { %v4412_v6 = vpop.eup %4411 }
 0x7e6   :  { %4413 = vrcp.f32 %v3095_v32  ;;  %v3102_v50 = vadd.f32 1.0, %v4412_v6 }
 0x7e8   :  { %4415 = vrcp.f32 %v3102_v50 }
 0x7f2   :  { %v3181_v24 = vpop.f32.mrf.mxu1  ;;  %v3252_v63 = vpop.f32.mrf.mxu0 }
 0x7f3   :  { %v4414_v34 = vpop.eup %4413  ;;  %v3256_v47 = vadd.f32 %v3181_v24, %v8463_v43  ;;  %v3270_v57 = vadd.f32 %v7771_v28, %v3252_v63 }
 0x7f4   :  { %v3106_v17 = vmul.f32 %v4414_v34, %v3105_v52  ;;  %v4255_v55 = vpop.f32.mrf.mxu0  ;;  %v3183_v37 = vpop.f32.mrf.mxu1 }
 0x7f5   :  { %v3420_v10 = vmul.f32 -1.442695, %v3256_v47  ;;  %v3263_v49 = vadd.f32 %v3183_v37, %v8465_v15  ;;  %v4416_v40 = vpop.eup %4415 }
 0x7f6   :  { %v3107_v20 = vadd.f32 %v3106_v17, %v8464_v42  ;;  %v3109_v61 = vsub.f32 1.0, %v4416_v40  ;;  %v3111_v39 = vmul.f32 %v4416_v40, %v7745_v2 }
 0x7f7   :  { %4417 = vpow2.f32 %v3420_v10  ;;  %v3421_v48 = vmul.f32 -1.442695, %v3263_v49 }
 0x7f8   :  { %4419 = vtanh.f32 %v3107_v20 }
 0x7f9   :  { %4421 = vpow2.f32 %v3421_v48 }
 0x804   :  { %v4418_v53 = vpop.eup %4417 }
 0x805   :  { %v4420_v1 = vpop.eup %4419  ;;  %v3260_v36 = vadd.f32 1.0, %v4418_v53 }
 0x806   :  { %v3110_v62 = vmul.f32 %v4420_v1, %v3109_v61  ;;  %v4422_v56 = vpop.eup %4421 }
 0x807   :  { %4423 = vrcp.f32 %v3260_v36  ;;  %v3267_v18 = vadd.f32 1.0, %v4422_v56 }
 0x808   :  { %v3112_v30 = vadd.f32 %v3111_v39, %v3110_v62 }
 0x809   :  { %4425 = vrcp.f32 %v3267_v18 }
 0x80a   :  { %v3113_v46 = vsel %vm905_vm11, %v3112_v30, %v7745_v2  ;;  %v3114_v25 = vsel %vm905_vm11, %v3112_v30, 0.0 }
 0x80b   :  { %3422 = vst [vmem:[%s7877_s6 + $0x38] sm:$0xff] %v3114_v25  ;;  %3283 = vst [vmem:[%s7879_s8] sm:$0xff] %v3113_v46 }
 0x814   :  { %v4424_v27 = vpop.eup %4423 }
 0x815   :  { %v3271_v13 = vmul.f32 %v4424_v27, %v3270_v57 }
 0x816   :  { %v4426_v5 = vpop.eup %4425 }
 0x817   :  { %v3272_v2 = vadd.f32 %v3271_v13, %v8467_v26  ;;  %v3274_v9 = vsub.f32 1.0, %v4426_v5  ;;  %v3276_v8 = vmul.f32 %v4426_v5, %v7830_v58 }
 0x819   :  { %4427 = vtanh.f32 %v3272_v2 }
 0x826   :  { %v4428_v38 = vpop.eup %4427 }
 0x827   :  { %v3275_v22 = vmul.f32 %v4428_v38, %v3274_v9 }
 0x829   :  { %v3277_v31 = vadd.f32 %v3276_v8, %v3275_v22 }
 0x82b   :  { %v3278_v35 = vsel %vm729_vm10, %v3277_v31, %v7830_v58  ;;  %v3279_v28 = vsel %vm729_vm10, %v3277_v31, 0.0 }
 0x82c   :  { %3282 = vst [vmem:[%s7878_s7] sm:$0xff] %v3279_v28  ;;  %3423 = vst [vmem:[%s7879_s8 + $0x8] sm:$0xff] %v3278_v35 }

</bundles_post_ra>
